<compile_context>
chip_gen: v5e
topology: v5e:2x2
jax: 0.10.0
libtpu: 0.0.40
codegen_flags: <defaults>
</compile_context>

<pallas_src>
import jax
import jax.numpy as jnp
from jax import lax
from jax.experimental import pallas as pl
from jax.experimental.pallas import tpu as pltpu

CIN = 6          # conv in/out channels
KSIZE = 5        # conv kernel size
HID = 12         # LSTM hidden / linear width
GATES = 4 * HID  # i, f, g, o
N_LAYERS = 120   # LSTM num_layers
BN_EPS = 1e-5


def _vae_encoder_kernel(
    # ---- inputs ----
    x_ref,                       # (N, L, 6)   channels-last input
    cacc_w_ref, cacc_b_ref,      # (5, 6, 6) tap-major (cin, cout), (1, 6)
    cang_w_ref, cang_b_ref,      # (5, 6, 6), (1, 6)
    bn1_g_ref, bn1_b_ref,        # (1, 6) each
    bn2_g_ref, bn2_b_ref,        # (1, 6) each
    attn_w_ref, attn_b_ref,      # (6, 12), (1, 12)
    wih_ref, whh_ref, blstm_ref, # (120, 12, 48), (120, 12, 48), (120, 48); pre-scaled
    lin1_w_ref, lin1_b_ref,      # (12, 12), (1, 12)
    lin2_w_ref, lin2_b_ref,      # (12, 12), (1, 12)
    mu_w_ref, mu_b_ref,          # (12, 12), (1, 12)
    lv_w_ref, lv_b_ref,          # (12, 12), (1, 12)
    eps_ref,                     # (120*N, 12) reparam noise, layer-major
    # ---- outputs ----
    packed_ref,                  # (120*N, 48) = [sample | latent | mu | logvar]
    # ---- scratch ----
    hs_ref,                      # (120*N, 12) final hidden per layer, layer-major
):
    N, L, _ = x_ref.shape
    L1 = L - (KSIZE - 1)
    T = L1 - (KSIZE - 1)

    # ---------------- conv -> BN(train) -> ReLU -> conv -> BN -> ReLU --------
    def conv1d(xn, w_ref, b_ref, lout):
        # out[t, o] = sum_{k, ci} xn[t + k, ci] * w[k, ci, o] + b[o]
        acc = jnp.zeros((lout, CIN), jnp.float32)
        for k in range(KSIZE):
            acc = acc + jnp.dot(xn[k:k + lout, :], w_ref[k],
                                preferred_element_type=jnp.float32)
        return acc + b_ref[...]

    def batchnorm_relu(vals, lout, g_ref, b_ref):
        # BatchNorm1d in training mode: batch statistics, biased variance.
        cnt = float(N * lout)
        s = jnp.zeros((1, CIN), jnp.float32)
        sq = jnp.zeros((1, CIN), jnp.float32)
        for v in vals:
            s = s + jnp.sum(v, axis=0, keepdims=True)
            sq = sq + jnp.sum(v * v, axis=0, keepdims=True)
        mean = s / cnt
        var = sq / cnt - mean * mean
        inv = lax.rsqrt(var + BN_EPS)
        return [jnp.maximum((v - mean) * inv * g_ref[...] + b_ref[...], 0.0)
                for v in vals]

    conv1 = [conv1d(x_ref[n], cacc_w_ref, cacc_b_ref, L1) for n in range(N)]
    act1 = batchnorm_relu(conv1, L1, bn1_g_ref, bn1_b_ref)
    conv2 = [conv1d(a, cang_w_ref, cang_b_ref, T) for a in act1]
    act2 = batchnorm_relu(conv2, T, bn2_g_ref, bn2_b_ref)

    # attn Linear(6 -> 12) + ReLU per batch item (already channels-last),
    # then interleave into a time-major (T*N, 12) LSTM input: row t*N + n.
    att = [jnp.maximum(jnp.dot(a, attn_w_ref[...],
                               preferred_element_type=jnp.float32)
                       + attn_b_ref[...], 0.0) for a in act2]
    rows = []
    for t in range(T):
        for n in range(N):
            rows.append(att[n][t:t + 1, :])
    seq0 = jnp.concatenate(rows, axis=0)                     # (T*N, 12)

    # ---------------- 120-layer stacked LSTM, batch-vectorised ---------------
    # sigmoid(x) = 0.5 * tanh(x/2) + 0.5 ; the x/2 prescale of the i,f,o gate
    # columns was folded into wih/whh/blstm in the wrapper, so one tanh over
    # the full 48-wide gate slab + a mul/add fixup covers all 4 gates.
    col = lax.broadcasted_iota(jnp.int32, (1, GATES), 1)
    is_g = jnp.logical_and(col >= 2 * HID, col < 3 * HID)
    fix_scale = jnp.where(is_g, 1.0, 0.5).astype(jnp.float32)
    fix_off = jnp.where(is_g, 0.0, 0.5).astype(jnp.float32)

    def layer_body(l, seq):
        wih_l = wih_ref[l]                                   # (12, 48)
        whh_l = whh_ref[l]                                   # (12, 48)
        b_l = blstm_ref[pl.ds(l, 1), :]                      # (1, 48)

        # hoisted input-to-hidden projection for all T steps at once
        gx = jnp.dot(seq, wih_l, preferred_element_type=jnp.float32) + b_l

        h = jnp.zeros((N, HID), jnp.float32)
        c = jnp.zeros((N, HID), jnp.float32)
        outs = []
        for t in range(T):                                   # static unroll
            g_all = gx[t * N:(t + 1) * N, :] + jnp.dot(
                h, whh_l, preferred_element_type=jnp.float32)  # (N, 48)
            t_all = jnp.tanh(g_all)                          # one 48-wide EUP pass
            act = t_all * fix_scale + fix_off                # i,f,o->sigmoid, g->tanh
            i_g = act[:, 0:HID]
            f_g = act[:, HID:2 * HID]
            g_g = act[:, 2 * HID:3 * HID]
            o_g = act[:, 3 * HID:4 * HID]
            c = f_g * c + i_g * g_g
            h = o_g * jnp.tanh(c)
            outs.append(h)

        hs_ref[pl.ds(l * N, N), :] = h                       # final h of layer l
        return jnp.concatenate(outs, axis=0)                 # (T*N, 12) next input

    lax.fori_loop(0, N_LAYERS, layer_body, seq0)

    # ---------------- head: lin1 -> ReLU -> lin2 -> ReLU -> mu / log_var -----
    hidden = hs_ref[...]                                     # (120*N, 12)
    h1 = jnp.maximum(jnp.dot(hidden, lin1_w_ref[...],
                             preferred_element_type=jnp.float32)
                     + lin1_b_ref[...], 0.0)
    out = jnp.maximum(jnp.dot(h1, lin2_w_ref[...],
                              preferred_element_type=jnp.float32)
                      + lin2_b_ref[...], 0.0)
    # TODO(synk): self.mu_act / self.sigm_act are never defined in the PyTorch
    # __init__ (forward would raise AttributeError); treated as identity.
    mu = (jnp.dot(out, mu_w_ref[...], preferred_element_type=jnp.float32)
          + mu_b_ref[...])
    log_var = (jnp.dot(out, lv_w_ref[...], preferred_element_type=jnp.float32)
               + lv_b_ref[...])
    std = jnp.exp(log_var * 0.5)
    z = mu + std * eps_ref[...]                              # rsample

    packed_ref[...] = jnp.concatenate([z, out, mu, log_var], axis=-1)


def vae_encoder_forward(x, params, eps_noise):
    """x: (N, 6, L) float32 (PyTorch NCL). Returns PyTorch-order 6-tuple."""
    N, C, L = x.shape
    assert C == CIN and L > 2 * (KSIZE - 1)
    x_nlc = jnp.transpose(x, (0, 2, 1)).astype(jnp.float32)

    # Fold the sigmoid-as-tanh prescale (x/2) into the i, f, o gate columns.
    col = jnp.arange(GATES)
    gate_scale = jnp.where((col >= 2 * HID) & (col < 3 * HID),
                           1.0, 0.5).astype(jnp.float32)
    wih_s = params["wih"] * gate_scale
    whh_s = params["whh"] * gate_scale
    blstm_s = params["blstm"] * gate_scale

    # Noise in layer-major order to match the kernel's hidden-state layout.
    eps_k = jnp.transpose(eps_noise.astype(jnp.float32), (1, 0, 2)
                          ).reshape(N_LAYERS * N, HID)

    inputs = (
        x_nlc,
        params["cacc_w"], params["cacc_b"],
        params["cang_w"], params["cang_b"],
        params["bn1_g"], params["bn1_b"],
        params["bn2_g"], params["bn2_b"],
        params["attn_w"], params["attn_b"],
        wih_s, whh_s, blstm_s,
        params["lin1_w"], params["lin1_b"],
        params["lin2_w"], params["lin2_b"],
        params["mu_w"], params["mu_b"],
        params["lv_w"], params["lv_b"],
        eps_k,
    )

    vmem_spec = pl.BlockSpec(memory_space=pltpu.MemorySpace.VMEM)
    packed = pl.pallas_call(
        _vae_encoder_kernel,
        out_shape=jax.ShapeDtypeStruct((N_LAYERS * N, GATES), jnp.float32),
        in_specs=[vmem_spec] * len(inputs),
        out_specs=vmem_spec,
        scratch_shapes=[pltpu.VMEM((N_LAYERS * N, HID), jnp.float32)],
        compiler_params=pltpu.CompilerParams(vmem_limit_bytes=8 << 20),
    )(*inputs)

    packed = jnp.transpose(packed.reshape(N_LAYERS, N, GATES), (1, 0, 2))
    sample = packed[..., 0:HID]
    latent = packed[..., HID:2 * HID]
    mu = packed[..., 2 * HID:3 * HID]
    log_var = packed[..., 3 * HID:4 * HID]
    # indices1 = indices2 = 0 in the reference module
    return sample, latent, mu, log_var, 0, 0


def init_params(key):
    ks = jax.random.split(key, 18)
    relu_gain = float(jnp.sqrt(2.0))

    def xavier(k, shape, fan_in, fan_out, gain=1.0):
        std = gain * (2.0 / (fan_in + fan_out)) ** 0.5
        return std * jax.random.normal(k, shape, jnp.float32)

    def uniform(k, shape, bound):
        return jax.random.uniform(k, shape, jnp.float32, -bound, bound)

    # Conv1d weights generated in torch layout (cout, cin, k), stored tap-major.
    cacc_w_t = xavier(ks[0], (CIN, CIN, KSIZE), CIN * KSIZE, CIN * KSIZE, relu_gain)
    cang_w_t = xavier(ks[1], (CIN, CIN, KSIZE), CIN * KSIZE, CIN * KSIZE, relu_gain)
    conv_bound = 1.0 / (CIN * KSIZE) ** 0.5
    cacc_b = uniform(ks[2], (1, CIN), conv_bound)
    cang_b = uniform(ks[3], (1, CIN), conv_bound)

    attn_w_t = xavier(ks[4], (HID, CIN), CIN, HID, relu_gain)   # torch (out, in)
    attn_b = uniform(ks[5], (1, HID), 1.0 / CIN ** 0.5)

    lstm_bound = 1.0 / HID ** 0.5
    wih = uniform(ks[6], (N_LAYERS, GATES, HID), lstm_bound)
    whh = uniform(ks[7], (N_LAYERS, GATES, HID), lstm_bound)
    bih = uniform(ks[8], (N_LAYERS, GATES), lstm_bound)
    bhh = uniform(ks[9], (N_LAYERS, GATES), lstm_bound)

    def linear(kw, kb, gain):
        w = xavier(kw, (HID, HID), HID, HID, gain)               # torch (out, in)
        b = uniform(kb, (1, HID), 1.0 / HID ** 0.5)
        return jnp.transpose(w), b                               # kernel uses (in, out)

    lin1_w, lin1_b = linear(ks[10], ks[11], relu_gain)
    lin2_w, lin2_b = linear(ks[12], ks[13], relu_gain)
    mu_w, mu_b = linear(ks[14], ks[15], 1.0)
    lv_w, lv_b = linear(ks[16], ks[17], 1.0)

    return dict(
        cacc_w=jnp.transpose(cacc_w_t, (2, 1, 0)),   # (k, cin, cout)
        cacc_b=cacc_b,
        cang_w=jnp.transpose(cang_w_t, (2, 1, 0)),
        cang_b=cang_b,
        bn1_g=jnp.ones((1, CIN), jnp.float32), bn1_b=jnp.zeros((1, CIN), jnp.float32),
        bn2_g=jnp.ones((1, CIN), jnp.float32), bn2_b=jnp.zeros((1, CIN), jnp.float32),
        attn_w=jnp.transpose(attn_w_t), attn_b=attn_b,
        wih=jnp.transpose(wih, (0, 2, 1)),           # (120, 12, 48)
        whh=jnp.transpose(whh, (0, 2, 1)),           # (120, 12, 48)
        blstm=bih + bhh,                             # (120, 48)
        lin1_w=lin1_w, lin1_b=lin1_b,
        lin2_w=lin2_w, lin2_b=lin2_b,
        mu_w=mu_w, mu_b=mu_b,
        lv_w=lv_w, lv_b=lv_b,
    )


if __name__ == "__main__":
    key = jax.random.PRNGKey(0)
    kx, keps, kp = jax.random.split(key, 3)

    N, L = 2, 16                      # input (N, 6, 16) -> conv -> conv -> T = 8
    x = jax.random.normal(kx, (N, CIN, L), jnp.float32)
    eps_noise = jax.random.normal(keps, (N, N_LAYERS, HID), jnp.float32)
    params = init_params(kp)

    sample, latent, mu, log_var, i1, i2 = vae_encoder_forward(x, params, eps_noise)
    jax.block_until_ready((sample, latent, mu, log_var))

    assert sample.shape == (N, N_LAYERS, HID)
    assert latent.shape == (N, N_LAYERS, HID)
    assert mu.shape == (N, N_LAYERS, HID)
    assert log_var.shape == (N, N_LAYERS, HID)
    assert bool(jnp.all(jnp.isfinite(sample)))
    assert bool(jnp.all(jnp.isfinite(latent)))
    print("KERNEL_OK")
</pallas_src>

<mosaic_0001>
module attributes {stable_mosaic.version = 11 : i64} {
  func.func @_vae_encoder_kernel(%arg0: memref<2x16x6xf32, #tpu.memory_space<vmem>>, %arg1: memref<5x6x6xf32, #tpu.memory_space<vmem>>, %arg2: memref<1x6xf32, #tpu.memory_space<vmem>>, %arg3: memref<5x6x6xf32, #tpu.memory_space<vmem>>, %arg4: memref<1x6xf32, #tpu.memory_space<vmem>>, %arg5: memref<1x6xf32, #tpu.memory_space<vmem>>, %arg6: memref<1x6xf32, #tpu.memory_space<vmem>>, %arg7: memref<1x6xf32, #tpu.memory_space<vmem>>, %arg8: memref<1x6xf32, #tpu.memory_space<vmem>>, %arg9: memref<6x12xf32, #tpu.memory_space<vmem>>, %arg10: memref<1x12xf32, #tpu.memory_space<vmem>>, %arg11: memref<120x12x48xf32, #tpu.memory_space<vmem>>, %arg12: memref<120x12x48xf32, #tpu.memory_space<vmem>>, %arg13: memref<120x48xf32, #tpu.memory_space<vmem>>, %arg14: memref<12x12xf32, #tpu.memory_space<vmem>>, %arg15: memref<1x12xf32, #tpu.memory_space<vmem>>, %arg16: memref<12x12xf32, #tpu.memory_space<vmem>>, %arg17: memref<1x12xf32, #tpu.memory_space<vmem>>, %arg18: memref<12x12xf32, #tpu.memory_space<vmem>>, %arg19: memref<1x12xf32, #tpu.memory_space<vmem>>, %arg20: memref<12x12xf32, #tpu.memory_space<vmem>>, %arg21: memref<1x12xf32, #tpu.memory_space<vmem>>, %arg22: memref<240x12xf32, #tpu.memory_space<vmem>>, %arg23: memref<240x48xf32, #tpu.memory_space<vmem>>, %arg24: memref<240x12xf32, #tpu.memory_space<vmem>>) attributes {dimension_semantics = [], scalar_prefetch = 0 : i64, scratch_operands = 1 : i64, tpu.core_type = #tpu.core_type<tc>} {
    %c0 = arith.constant 0 : index
    %c0_0 = arith.constant 0 : index
    %c0_1 = arith.constant 0 : index
    %0 = vector.load %arg0[%c0, %c0_0, %c0_1] : memref<2x16x6xf32, #tpu.memory_space<vmem>>, vector<1x16x6xf32>
    %1 = vector.shape_cast %0 : vector<1x16x6xf32> to vector<16x6xf32>
    %cst = arith.constant 0.000000e+00 : f32
    %2 = vector.broadcast %cst : f32 to vector<12x6xf32>
    %3 = vector.extract_strided_slice %1 {offsets = [0, 0], sizes = [12, 6], strides = [1, 1]} : vector<16x6xf32> to vector<12x6xf32>
    %c0_2 = arith.constant 0 : index
    %c0_3 = arith.constant 0 : index
    %c0_4 = arith.constant 0 : index
    %4 = vector.load %arg1[%c0_2, %c0_3, %c0_4] : memref<5x6x6xf32, #tpu.memory_space<vmem>>, vector<1x6x6xf32>
    %5 = vector.shape_cast %4 : vector<1x6x6xf32> to vector<6x6xf32>
    %cst_5 = arith.constant dense<0.000000e+00> : vector<12x6xf32>
    %6 = tpu.matmul %3, %5, %cst_5 {dimension_numbers = #tpu.dot_dimension_numbers<[1], [0], [0], [1], [0, 0, 1, 1], [], []>} : vector<12x6xf32>, vector<6x6xf32>, vector<12x6xf32> -> vector<12x6xf32>
    %7 = arith.addf %2, %6 : vector<12x6xf32>
    %8 = vector.extract_strided_slice %1 {offsets = [1, 0], sizes = [12, 6], strides = [1, 1]} : vector<16x6xf32> to vector<12x6xf32>
    %c1 = arith.constant 1 : index
    %c0_6 = arith.constant 0 : index
    %c0_7 = arith.constant 0 : index
    %9 = vector.load %arg1[%c1, %c0_6, %c0_7] : memref<5x6x6xf32, #tpu.memory_space<vmem>>, vector<1x6x6xf32>
    %10 = vector.shape_cast %9 : vector<1x6x6xf32> to vector<6x6xf32>
    %cst_8 = arith.constant dense<0.000000e+00> : vector<12x6xf32>
    %11 = tpu.matmul %8, %10, %cst_8 {dimension_numbers = #tpu.dot_dimension_numbers<[1], [0], [0], [1], [0, 0, 1, 1], [], []>} : vector<12x6xf32>, vector<6x6xf32>, vector<12x6xf32> -> vector<12x6xf32>
    %12 = arith.addf %7, %11 : vector<12x6xf32>
    %13 = vector.extract_strided_slice %1 {offsets = [2, 0], sizes = [12, 6], strides = [1, 1]} : vector<16x6xf32> to vector<12x6xf32>
    %c2 = arith.constant 2 : index
    %c0_9 = arith.constant 0 : index
    %c0_10 = arith.constant 0 : index
    %14 = vector.load %arg1[%c2, %c0_9, %c0_10] : memref<5x6x6xf32, #tpu.memory_space<vmem>>, vector<1x6x6xf32>
    %15 = vector.shape_cast %14 : vector<1x6x6xf32> to vector<6x6xf32>
    %cst_11 = arith.constant dense<0.000000e+00> : vector<12x6xf32>
    %16 = tpu.matmul %13, %15, %cst_11 {dimension_numbers = #tpu.dot_dimension_numbers<[1], [0], [0], [1], [0, 0, 1, 1], [], []>} : vector<12x6xf32>, vector<6x6xf32>, vector<12x6xf32> -> vector<12x6xf32>
    %17 = arith.addf %12, %16 : vector<12x6xf32>
    %18 = vector.extract_strided_slice %1 {offsets = [3, 0], sizes = [12, 6], strides = [1, 1]} : vector<16x6xf32> to vector<12x6xf32>
    %c3 = arith.constant 3 : index
    %c0_12 = arith.constant 0 : index
    %c0_13 = arith.constant 0 : index
    %19 = vector.load %arg1[%c3, %c0_12, %c0_13] : memref<5x6x6xf32, #tpu.memory_space<vmem>>, vector<1x6x6xf32>
    %20 = vector.shape_cast %19 : vector<1x6x6xf32> to vector<6x6xf32>
    %cst_14 = arith.constant dense<0.000000e+00> : vector<12x6xf32>
    %21 = tpu.matmul %18, %20, %cst_14 {dimension_numbers = #tpu.dot_dimension_numbers<[1], [0], [0], [1], [0, 0, 1, 1], [], []>} : vector<12x6xf32>, vector<6x6xf32>, vector<12x6xf32> -> vector<12x6xf32>
    %22 = arith.addf %17, %21 : vector<12x6xf32>
    %23 = vector.extract_strided_slice %1 {offsets = [4, 0], sizes = [12, 6], strides = [1, 1]} : vector<16x6xf32> to vector<12x6xf32>
    %c4 = arith.constant 4 : index
    %c0_15 = arith.constant 0 : index
    %c0_16 = arith.constant 0 : index
    %24 = vector.load %arg1[%c4, %c0_15, %c0_16] : memref<5x6x6xf32, #tpu.memory_space<vmem>>, vector<1x6x6xf32>
    %25 = vector.shape_cast %24 : vector<1x6x6xf32> to vector<6x6xf32>
    %cst_17 = arith.constant dense<0.000000e+00> : vector<12x6xf32>
    %26 = tpu.matmul %23, %25, %cst_17 {dimension_numbers = #tpu.dot_dimension_numbers<[1], [0], [0], [1], [0, 0, 1, 1], [], []>} : vector<12x6xf32>, vector<6x6xf32>, vector<12x6xf32> -> vector<12x6xf32>
    %27 = arith.addf %22, %26 : vector<12x6xf32>
    %c0_18 = arith.constant 0 : index
    %c0_19 = arith.constant 0 : index
    %28 = vector.load %arg2[%c0_18, %c0_19] : memref<1x6xf32, #tpu.memory_space<vmem>>, vector<1x6xf32>
    %29 = vector.broadcast %28 : vector<1x6xf32> to vector<12x6xf32>
    %30 = arith.addf %27, %29 : vector<12x6xf32>
    %c1_20 = arith.constant 1 : index
    %c0_21 = arith.constant 0 : index
    %c0_22 = arith.constant 0 : index
    %31 = vector.load %arg0[%c1_20, %c0_21, %c0_22] : memref<2x16x6xf32, #tpu.memory_space<vmem>>, vector<1x16x6xf32>
    %32 = vector.shape_cast %31 : vector<1x16x6xf32> to vector<16x6xf32>
    %cst_23 = arith.constant 0.000000e+00 : f32
    %33 = vector.broadcast %cst_23 : f32 to vector<12x6xf32>
    %34 = vector.extract_strided_slice %32 {offsets = [0, 0], sizes = [12, 6], strides = [1, 1]} : vector<16x6xf32> to vector<12x6xf32>
    %c0_24 = arith.constant 0 : index
    %c0_25 = arith.constant 0 : index
    %c0_26 = arith.constant 0 : index
    %35 = vector.load %arg1[%c0_24, %c0_25, %c0_26] : memref<5x6x6xf32, #tpu.memory_space<vmem>>, vector<1x6x6xf32>
    %36 = vector.shape_cast %35 : vector<1x6x6xf32> to vector<6x6xf32>
    %cst_27 = arith.constant dense<0.000000e+00> : vector<12x6xf32>
    %37 = tpu.matmul %34, %36, %cst_27 {dimension_numbers = #tpu.dot_dimension_numbers<[1], [0], [0], [1], [0, 0, 1, 1], [], []>} : vector<12x6xf32>, vector<6x6xf32>, vector<12x6xf32> -> vector<12x6xf32>
    %38 = arith.addf %33, %37 : vector<12x6xf32>
    %39 = vector.extract_strided_slice %32 {offsets = [1, 0], sizes = [12, 6], strides = [1, 1]} : vector<16x6xf32> to vector<12x6xf32>
    %c1_28 = arith.constant 1 : index
    %c0_29 = arith.constant 0 : index
    %c0_30 = arith.constant 0 : index
    %40 = vector.load %arg1[%c1_28, %c0_29, %c0_30] : memref<5x6x6xf32, #tpu.memory_space<vmem>>, vector<1x6x6xf32>
    %41 = vector.shape_cast %40 : vector<1x6x6xf32> to vector<6x6xf32>
    %cst_31 = arith.constant dense<0.000000e+00> : vector<12x6xf32>
    %42 = tpu.matmul %39, %41, %cst_31 {dimension_numbers = #tpu.dot_dimension_numbers<[1], [0], [0], [1], [0, 0, 1, 1], [], []>} : vector<12x6xf32>, vector<6x6xf32>, vector<12x6xf32> -> vector<12x6xf32>
    %43 = arith.addf %38, %42 : vector<12x6xf32>
    %44 = vector.extract_strided_slice %32 {offsets = [2, 0], sizes = [12, 6], strides = [1, 1]} : vector<16x6xf32> to vector<12x6xf32>
    %c2_32 = arith.constant 2 : index
    %c0_33 = arith.constant 0 : index
    %c0_34 = arith.constant 0 : index
    %45 = vector.load %arg1[%c2_32, %c0_33, %c0_34] : memref<5x6x6xf32, #tpu.memory_space<vmem>>, vector<1x6x6xf32>
    %46 = vector.shape_cast %45 : vector<1x6x6xf32> to vector<6x6xf32>
    %cst_35 = arith.constant dense<0.000000e+00> : vector<12x6xf32>
    %47 = tpu.matmul %44, %46, %cst_35 {dimension_numbers = #tpu.dot_dimension_numbers<[1], [0], [0], [1], [0, 0, 1, 1], [], []>} : vector<12x6xf32>, vector<6x6xf32>, vector<12x6xf32> -> vector<12x6xf32>
    %48 = arith.addf %43, %47 : vector<12x6xf32>
    %49 = vector.extract_strided_slice %32 {offsets = [3, 0], sizes = [12, 6], strides = [1, 1]} : vector<16x6xf32> to vector<12x6xf32>
    %c3_36 = arith.constant 3 : index
    %c0_37 = arith.constant 0 : index
    %c0_38 = arith.constant 0 : index
    %50 = vector.load %arg1[%c3_36, %c0_37, %c0_38] : memref<5x6x6xf32, #tpu.memory_space<vmem>>, vector<1x6x6xf32>
    %51 = vector.shape_cast %50 : vector<1x6x6xf32> to vector<6x6xf32>
    %cst_39 = arith.constant dense<0.000000e+00> : vector<12x6xf32>
    %52 = tpu.matmul %49, %51, %cst_39 {dimension_numbers = #tpu.dot_dimension_numbers<[1], [0], [0], [1], [0, 0, 1, 1], [], []>} : vector<12x6xf32>, vector<6x6xf32>, vector<12x6xf32> -> vector<12x6xf32>
    %53 = arith.addf %48, %52 : vector<12x6xf32>
    %54 = vector.extract_strided_slice %32 {offsets = [4, 0], sizes = [12, 6], strides = [1, 1]} : vector<16x6xf32> to vector<12x6xf32>
    %c4_40 = arith.constant 4 : index
    %c0_41 = arith.constant 0 : index
    %c0_42 = arith.constant 0 : index
    %55 = vector.load %arg1[%c4_40, %c0_41, %c0_42] : memref<5x6x6xf32, #tpu.memory_space<vmem>>, vector<1x6x6xf32>
    %56 = vector.shape_cast %55 : vector<1x6x6xf32> to vector<6x6xf32>
    %cst_43 = arith.constant dense<0.000000e+00> : vector<12x6xf32>
    %57 = tpu.matmul %54, %56, %cst_43 {dimension_numbers = #tpu.dot_dimension_numbers<[1], [0], [0], [1], [0, 0, 1, 1], [], []>} : vector<12x6xf32>, vector<6x6xf32>, vector<12x6xf32> -> vector<12x6xf32>
    %58 = arith.addf %53, %57 : vector<12x6xf32>
    %c0_44 = arith.constant 0 : index
    %c0_45 = arith.constant 0 : index
    %59 = vector.load %arg2[%c0_44, %c0_45] : memref<1x6xf32, #tpu.memory_space<vmem>>, vector<1x6xf32>
    %60 = vector.broadcast %59 : vector<1x6xf32> to vector<12x6xf32>
    %61 = arith.addf %58, %60 : vector<12x6xf32>
    %cst_46 = arith.constant 0.000000e+00 : f32
    %62 = vector.broadcast %cst_46 : f32 to vector<1x6xf32>
    %cst_47 = arith.constant 0.000000e+00 : f32
    %63 = vector.broadcast %cst_47 : f32 to vector<1x6xf32>
    %cst_48 = arith.constant dense<0.000000e+00> : vector<6xf32>
    %64 = vector.multi_reduction <add>, %30, %cst_48 [0] : vector<12x6xf32> to vector<6xf32>
    %65 = vector.shape_cast %64 : vector<6xf32> to vector<1x6xf32>
    %66 = arith.addf %62, %65 : vector<1x6xf32>
    %67 = arith.mulf %30, %30 : vector<12x6xf32>
    %cst_49 = arith.constant dense<0.000000e+00> : vector<6xf32>
    %68 = vector.multi_reduction <add>, %67, %cst_49 [0] : vector<12x6xf32> to vector<6xf32>
    %69 = vector.shape_cast %68 : vector<6xf32> to vector<1x6xf32>
    %70 = arith.addf %63, %69 : vector<1x6xf32>
    %cst_50 = arith.constant dense<0.000000e+00> : vector<6xf32>
    %71 = vector.multi_reduction <add>, %61, %cst_50 [0] : vector<12x6xf32> to vector<6xf32>
    %72 = vector.shape_cast %71 : vector<6xf32> to vector<1x6xf32>
    %73 = arith.addf %66, %72 : vector<1x6xf32>
    %74 = arith.mulf %61, %61 : vector<12x6xf32>
    %cst_51 = arith.constant dense<0.000000e+00> : vector<6xf32>
    %75 = vector.multi_reduction <add>, %74, %cst_51 [0] : vector<12x6xf32> to vector<6xf32>
    %76 = vector.shape_cast %75 : vector<6xf32> to vector<1x6xf32>
    %77 = arith.addf %70, %76 : vector<1x6xf32>
    %cst_52 = arith.constant 2.400000e+01 : f32
    %78 = vector.broadcast %cst_52 : f32 to vector<1x6xf32>
    %79 = arith.divf %73, %78 : vector<1x6xf32>
    %cst_53 = arith.constant 2.400000e+01 : f32
    %80 = vector.broadcast %cst_53 : f32 to vector<1x6xf32>
    %81 = arith.divf %77, %80 : vector<1x6xf32>
    %82 = arith.mulf %79, %79 : vector<1x6xf32>
    %83 = arith.subf %81, %82 : vector<1x6xf32>
    %cst_54 = arith.constant 9.99999974E-6 : f32
    %84 = vector.broadcast %cst_54 : f32 to vector<1x6xf32>
    %85 = arith.addf %83, %84 : vector<1x6xf32>
    %86 = math.rsqrt %85 : vector<1x6xf32>
    %87 = vector.broadcast %79 : vector<1x6xf32> to vector<12x6xf32>
    %88 = arith.subf %30, %87 : vector<12x6xf32>
    %89 = vector.broadcast %86 : vector<1x6xf32> to vector<12x6xf32>
    %90 = arith.mulf %88, %89 : vector<12x6xf32>
    %c0_55 = arith.constant 0 : index
    %c0_56 = arith.constant 0 : index
    %91 = vector.load %arg5[%c0_55, %c0_56] : memref<1x6xf32, #tpu.memory_space<vmem>>, vector<1x6xf32>
    %92 = vector.broadcast %91 : vector<1x6xf32> to vector<12x6xf32>
    %93 = arith.mulf %90, %92 : vector<12x6xf32>
    %c0_57 = arith.constant 0 : index
    %c0_58 = arith.constant 0 : index
    %94 = vector.load %arg6[%c0_57, %c0_58] : memref<1x6xf32, #tpu.memory_space<vmem>>, vector<1x6xf32>
    %95 = vector.broadcast %94 : vector<1x6xf32> to vector<12x6xf32>
    %96 = arith.addf %93, %95 : vector<12x6xf32>
    %cst_59 = arith.constant 0.000000e+00 : f32
    %97 = vector.broadcast %cst_59 : f32 to vector<12x6xf32>
    %98 = arith.maximumf %96, %97 : vector<12x6xf32>
    %99 = vector.broadcast %79 : vector<1x6xf32> to vector<12x6xf32>
    %100 = arith.subf %61, %99 : vector<12x6xf32>
    %101 = vector.broadcast %86 : vector<1x6xf32> to vector<12x6xf32>
    %102 = arith.mulf %100, %101 : vector<12x6xf32>
    %c0_60 = arith.constant 0 : index
    %c0_61 = arith.constant 0 : index
    %103 = vector.load %arg5[%c0_60, %c0_61] : memref<1x6xf32, #tpu.memory_space<vmem>>, vector<1x6xf32>
    %104 = vector.broadcast %103 : vector<1x6xf32> to vector<12x6xf32>
    %105 = arith.mulf %102, %104 : vector<12x6xf32>
    %c0_62 = arith.constant 0 : index
    %c0_63 = arith.constant 0 : index
    %106 = vector.load %arg6[%c0_62, %c0_63] : memref<1x6xf32, #tpu.memory_space<vmem>>, vector<1x6xf32>
    %107 = vector.broadcast %106 : vector<1x6xf32> to vector<12x6xf32>
    %108 = arith.addf %105, %107 : vector<12x6xf32>
    %cst_64 = arith.constant 0.000000e+00 : f32
    %109 = vector.broadcast %cst_64 : f32 to vector<12x6xf32>
    %110 = arith.maximumf %108, %109 : vector<12x6xf32>
    %cst_65 = arith.constant 0.000000e+00 : f32
    %111 = vector.broadcast %cst_65 : f32 to vector<8x6xf32>
    %112 = vector.extract_strided_slice %98 {offsets = [0, 0], sizes = [8, 6], strides = [1, 1]} : vector<12x6xf32> to vector<8x6xf32>
    %c0_66 = arith.constant 0 : index
    %c0_67 = arith.constant 0 : index
    %c0_68 = arith.constant 0 : index
    %113 = vector.load %arg3[%c0_66, %c0_67, %c0_68] : memref<5x6x6xf32, #tpu.memory_space<vmem>>, vector<1x6x6xf32>
    %114 = vector.shape_cast %113 : vector<1x6x6xf32> to vector<6x6xf32>
    %cst_69 = arith.constant dense<0.000000e+00> : vector<8x6xf32>
    %115 = tpu.matmul %112, %114, %cst_69 {dimension_numbers = #tpu.dot_dimension_numbers<[1], [0], [0], [1], [0, 0, 1, 1], [], []>} : vector<8x6xf32>, vector<6x6xf32>, vector<8x6xf32> -> vector<8x6xf32>
    %116 = arith.addf %111, %115 : vector<8x6xf32>
    %117 = vector.extract_strided_slice %98 {offsets = [1, 0], sizes = [8, 6], strides = [1, 1]} : vector<12x6xf32> to vector<8x6xf32>
    %c1_70 = arith.constant 1 : index
    %c0_71 = arith.constant 0 : index
    %c0_72 = arith.constant 0 : index
    %118 = vector.load %arg3[%c1_70, %c0_71, %c0_72] : memref<5x6x6xf32, #tpu.memory_space<vmem>>, vector<1x6x6xf32>
    %119 = vector.shape_cast %118 : vector<1x6x6xf32> to vector<6x6xf32>
    %cst_73 = arith.constant dense<0.000000e+00> : vector<8x6xf32>
    %120 = tpu.matmul %117, %119, %cst_73 {dimension_numbers = #tpu.dot_dimension_numbers<[1], [0], [0], [1], [0, 0, 1, 1], [], []>} : vector<8x6xf32>, vector<6x6xf32>, vector<8x6xf32> -> vector<8x6xf32>
    %121 = arith.addf %116, %120 : vector<8x6xf32>
    %122 = vector.extract_strided_slice %98 {offsets = [2, 0], sizes = [8, 6], strides = [1, 1]} : vector<12x6xf32> to vector<8x6xf32>
    %c2_74 = arith.constant 2 : index
    %c0_75 = arith.constant 0 : index
    %c0_76 = arith.constant 0 : index
    %123 = vector.load %arg3[%c2_74, %c0_75, %c0_76] : memref<5x6x6xf32, #tpu.memory_space<vmem>>, vector<1x6x6xf32>
    %124 = vector.shape_cast %123 : vector<1x6x6xf32> to vector<6x6xf32>
    %cst_77 = arith.constant dense<0.000000e+00> : vector<8x6xf32>
    %125 = tpu.matmul %122, %124, %cst_77 {dimension_numbers = #tpu.dot_dimension_numbers<[1], [0], [0], [1], [0, 0, 1, 1], [], []>} : vector<8x6xf32>, vector<6x6xf32>, vector<8x6xf32> -> vector<8x6xf32>
    %126 = arith.addf %121, %125 : vector<8x6xf32>
    %127 = vector.extract_strided_slice %98 {offsets = [3, 0], sizes = [8, 6], strides = [1, 1]} : vector<12x6xf32> to vector<8x6xf32>
    %c3_78 = arith.constant 3 : index
    %c0_79 = arith.constant 0 : index
    %c0_80 = arith.constant 0 : index
    %128 = vector.load %arg3[%c3_78, %c0_79, %c0_80] : memref<5x6x6xf32, #tpu.memory_space<vmem>>, vector<1x6x6xf32>
    %129 = vector.shape_cast %128 : vector<1x6x6xf32> to vector<6x6xf32>
    %cst_81 = arith.constant dense<0.000000e+00> : vector<8x6xf32>
    %130 = tpu.matmul %127, %129, %cst_81 {dimension_numbers = #tpu.dot_dimension_numbers<[1], [0], [0], [1], [0, 0, 1, 1], [], []>} : vector<8x6xf32>, vector<6x6xf32>, vector<8x6xf32> -> vector<8x6xf32>
    %131 = arith.addf %126, %130 : vector<8x6xf32>
    %132 = vector.extract_strided_slice %98 {offsets = [4, 0], sizes = [8, 6], strides = [1, 1]} : vector<12x6xf32> to vector<8x6xf32>
    %c4_82 = arith.constant 4 : index
    %c0_83 = arith.constant 0 : index
    %c0_84 = arith.constant 0 : index
    %133 = vector.load %arg3[%c4_82, %c0_83, %c0_84] : memref<5x6x6xf32, #tpu.memory_space<vmem>>, vector<1x6x6xf32>
    %134 = vector.shape_cast %133 : vector<1x6x6xf32> to vector<6x6xf32>
    %cst_85 = arith.constant dense<0.000000e+00> : vector<8x6xf32>
    %135 = tpu.matmul %132, %134, %cst_85 {dimension_numbers = #tpu.dot_dimension_numbers<[1], [0], [0], [1], [0, 0, 1, 1], [], []>} : vector<8x6xf32>, vector<6x6xf32>, vector<8x6xf32> -> vector<8x6xf32>
    %136 = arith.addf %131, %135 : vector<8x6xf32>
    %c0_86 = arith.constant 0 : index
    %c0_87 = arith.constant 0 : index
    %137 = vector.load %arg4[%c0_86, %c0_87] : memref<1x6xf32, #tpu.memory_space<vmem>>, vector<1x6xf32>
    %138 = vector.broadcast %137 : vector<1x6xf32> to vector<8x6xf32>
    %139 = arith.addf %136, %138 : vector<8x6xf32>
    %cst_88 = arith.constant 0.000000e+00 : f32
    %140 = vector.broadcast %cst_88 : f32 to vector<8x6xf32>
    %141 = vector.extract_strided_slice %110 {offsets = [0, 0], sizes = [8, 6], strides = [1, 1]} : vector<12x6xf32> to vector<8x6xf32>
    %c0_89 = arith.constant 0 : index
    %c0_90 = arith.constant 0 : index
    %c0_91 = arith.constant 0 : index
    %142 = vector.load %arg3[%c0_89, %c0_90, %c0_91] : memref<5x6x6xf32, #tpu.memory_space<vmem>>, vector<1x6x6xf32>
    %143 = vector.shape_cast %142 : vector<1x6x6xf32> to vector<6x6xf32>
    %cst_92 = arith.constant dense<0.000000e+00> : vector<8x6xf32>
    %144 = tpu.matmul %141, %143, %cst_92 {dimension_numbers = #tpu.dot_dimension_numbers<[1], [0], [0], [1], [0, 0, 1, 1], [], []>} : vector<8x6xf32>, vector<6x6xf32>, vector<8x6xf32> -> vector<8x6xf32>
    %145 = arith.addf %140, %144 : vector<8x6xf32>
    %146 = vector.extract_strided_slice %110 {offsets = [1, 0], sizes = [8, 6], strides = [1, 1]} : vector<12x6xf32> to vector<8x6xf32>
    %c1_93 = arith.constant 1 : index
    %c0_94 = arith.constant 0 : index
    %c0_95 = arith.constant 0 : index
    %147 = vector.load %arg3[%c1_93, %c0_94, %c0_95] : memref<5x6x6xf32, #tpu.memory_space<vmem>>, vector<1x6x6xf32>
    %148 = vector.shape_cast %147 : vector<1x6x6xf32> to vector<6x6xf32>
    %cst_96 = arith.constant dense<0.000000e+00> : vector<8x6xf32>
    %149 = tpu.matmul %146, %148, %cst_96 {dimension_numbers = #tpu.dot_dimension_numbers<[1], [0], [0], [1], [0, 0, 1, 1], [], []>} : vector<8x6xf32>, vector<6x6xf32>, vector<8x6xf32> -> vector<8x6xf32>
    %150 = arith.addf %145, %149 : vector<8x6xf32>
    %151 = vector.extract_strided_slice %110 {offsets = [2, 0], sizes = [8, 6], strides = [1, 1]} : vector<12x6xf32> to vector<8x6xf32>
    %c2_97 = arith.constant 2 : index
    %c0_98 = arith.constant 0 : index
    %c0_99 = arith.constant 0 : index
    %152 = vector.load %arg3[%c2_97, %c0_98, %c0_99] : memref<5x6x6xf32, #tpu.memory_space<vmem>>, vector<1x6x6xf32>
    %153 = vector.shape_cast %152 : vector<1x6x6xf32> to vector<6x6xf32>
    %cst_100 = arith.constant dense<0.000000e+00> : vector<8x6xf32>
    %154 = tpu.matmul %151, %153, %cst_100 {dimension_numbers = #tpu.dot_dimension_numbers<[1], [0], [0], [1], [0, 0, 1, 1], [], []>} : vector<8x6xf32>, vector<6x6xf32>, vector<8x6xf32> -> vector<8x6xf32>
    %155 = arith.addf %150, %154 : vector<8x6xf32>
    %156 = vector.extract_strided_slice %110 {offsets = [3, 0], sizes = [8, 6], strides = [1, 1]} : vector<12x6xf32> to vector<8x6xf32>
    %c3_101 = arith.constant 3 : index
    %c0_102 = arith.constant 0 : index
    %c0_103 = arith.constant 0 : index
    %157 = vector.load %arg3[%c3_101, %c0_102, %c0_103] : memref<5x6x6xf32, #tpu.memory_space<vmem>>, vector<1x6x6xf32>
    %158 = vector.shape_cast %157 : vector<1x6x6xf32> to vector<6x6xf32>
    %cst_104 = arith.constant dense<0.000000e+00> : vector<8x6xf32>
    %159 = tpu.matmul %156, %158, %cst_104 {dimension_numbers = #tpu.dot_dimension_numbers<[1], [0], [0], [1], [0, 0, 1, 1], [], []>} : vector<8x6xf32>, vector<6x6xf32>, vector<8x6xf32> -> vector<8x6xf32>
    %160 = arith.addf %155, %159 : vector<8x6xf32>
    %161 = vector.extract_strided_slice %110 {offsets = [4, 0], sizes = [8, 6], strides = [1, 1]} : vector<12x6xf32> to vector<8x6xf32>
    %c4_105 = arith.constant 4 : index
    %c0_106 = arith.constant 0 : index
    %c0_107 = arith.constant 0 : index
    %162 = vector.load %arg3[%c4_105, %c0_106, %c0_107] : memref<5x6x6xf32, #tpu.memory_space<vmem>>, vector<1x6x6xf32>
    %163 = vector.shape_cast %162 : vector<1x6x6xf32> to vector<6x6xf32>
    %cst_108 = arith.constant dense<0.000000e+00> : vector<8x6xf32>
    %164 = tpu.matmul %161, %163, %cst_108 {dimension_numbers = #tpu.dot_dimension_numbers<[1], [0], [0], [1], [0, 0, 1, 1], [], []>} : vector<8x6xf32>, vector<6x6xf32>, vector<8x6xf32> -> vector<8x6xf32>
    %165 = arith.addf %160, %164 : vector<8x6xf32>
    %c0_109 = arith.constant 0 : index
    %c0_110 = arith.constant 0 : index
    %166 = vector.load %arg4[%c0_109, %c0_110] : memref<1x6xf32, #tpu.memory_space<vmem>>, vector<1x6xf32>
    %167 = vector.broadcast %166 : vector<1x6xf32> to vector<8x6xf32>
    %168 = arith.addf %165, %167 : vector<8x6xf32>
    %cst_111 = arith.constant 0.000000e+00 : f32
    %169 = vector.broadcast %cst_111 : f32 to vector<1x6xf32>
    %cst_112 = arith.constant 0.000000e+00 : f32
    %170 = vector.broadcast %cst_112 : f32 to vector<1x6xf32>
    %cst_113 = arith.constant dense<0.000000e+00> : vector<6xf32>
    %171 = vector.multi_reduction <add>, %139, %cst_113 [0] : vector<8x6xf32> to vector<6xf32>
    %172 = vector.shape_cast %171 : vector<6xf32> to vector<1x6xf32>
    %173 = arith.addf %169, %172 : vector<1x6xf32>
    %174 = arith.mulf %139, %139 : vector<8x6xf32>
    %cst_114 = arith.constant dense<0.000000e+00> : vector<6xf32>
    %175 = vector.multi_reduction <add>, %174, %cst_114 [0] : vector<8x6xf32> to vector<6xf32>
    %176 = vector.shape_cast %175 : vector<6xf32> to vector<1x6xf32>
    %177 = arith.addf %170, %176 : vector<1x6xf32>
    %cst_115 = arith.constant dense<0.000000e+00> : vector<6xf32>
    %178 = vector.multi_reduction <add>, %168, %cst_115 [0] : vector<8x6xf32> to vector<6xf32>
    %179 = vector.shape_cast %178 : vector<6xf32> to vector<1x6xf32>
    %180 = arith.addf %173, %179 : vector<1x6xf32>
    %181 = arith.mulf %168, %168 : vector<8x6xf32>
    %cst_116 = arith.constant dense<0.000000e+00> : vector<6xf32>
    %182 = vector.multi_reduction <add>, %181, %cst_116 [0] : vector<8x6xf32> to vector<6xf32>
    %183 = vector.shape_cast %182 : vector<6xf32> to vector<1x6xf32>
    %184 = arith.addf %177, %183 : vector<1x6xf32>
    %cst_117 = arith.constant 1.600000e+01 : f32
    %185 = vector.broadcast %cst_117 : f32 to vector<1x6xf32>
    %186 = arith.divf %180, %185 : vector<1x6xf32>
    %cst_118 = arith.constant 1.600000e+01 : f32
    %187 = vector.broadcast %cst_118 : f32 to vector<1x6xf32>
    %188 = arith.divf %184, %187 : vector<1x6xf32>
    %189 = arith.mulf %186, %186 : vector<1x6xf32>
    %190 = arith.subf %188, %189 : vector<1x6xf32>
    %cst_119 = arith.constant 9.99999974E-6 : f32
    %191 = vector.broadcast %cst_119 : f32 to vector<1x6xf32>
    %192 = arith.addf %190, %191 : vector<1x6xf32>
    %193 = math.rsqrt %192 : vector<1x6xf32>
    %194 = vector.broadcast %186 : vector<1x6xf32> to vector<8x6xf32>
    %195 = arith.subf %139, %194 : vector<8x6xf32>
    %196 = vector.broadcast %193 : vector<1x6xf32> to vector<8x6xf32>
    %197 = arith.mulf %195, %196 : vector<8x6xf32>
    %c0_120 = arith.constant 0 : index
    %c0_121 = arith.constant 0 : index
    %198 = vector.load %arg7[%c0_120, %c0_121] : memref<1x6xf32, #tpu.memory_space<vmem>>, vector<1x6xf32>
    %199 = vector.broadcast %198 : vector<1x6xf32> to vector<8x6xf32>
    %200 = arith.mulf %197, %199 : vector<8x6xf32>
    %c0_122 = arith.constant 0 : index
    %c0_123 = arith.constant 0 : index
    %201 = vector.load %arg8[%c0_122, %c0_123] : memref<1x6xf32, #tpu.memory_space<vmem>>, vector<1x6xf32>
    %202 = vector.broadcast %201 : vector<1x6xf32> to vector<8x6xf32>
    %203 = arith.addf %200, %202 : vector<8x6xf32>
    %cst_124 = arith.constant 0.000000e+00 : f32
    %204 = vector.broadcast %cst_124 : f32 to vector<8x6xf32>
    %205 = arith.maximumf %203, %204 : vector<8x6xf32>
    %206 = vector.broadcast %186 : vector<1x6xf32> to vector<8x6xf32>
    %207 = arith.subf %168, %206 : vector<8x6xf32>
    %208 = vector.broadcast %193 : vector<1x6xf32> to vector<8x6xf32>
    %209 = arith.mulf %207, %208 : vector<8x6xf32>
    %c0_125 = arith.constant 0 : index
    %c0_126 = arith.constant 0 : index
    %210 = vector.load %arg7[%c0_125, %c0_126] : memref<1x6xf32, #tpu.memory_space<vmem>>, vector<1x6xf32>
    %211 = vector.broadcast %210 : vector<1x6xf32> to vector<8x6xf32>
    %212 = arith.mulf %209, %211 : vector<8x6xf32>
    %c0_127 = arith.constant 0 : index
    %c0_128 = arith.constant 0 : index
    %213 = vector.load %arg8[%c0_127, %c0_128] : memref<1x6xf32, #tpu.memory_space<vmem>>, vector<1x6xf32>
    %214 = vector.broadcast %213 : vector<1x6xf32> to vector<8x6xf32>
    %215 = arith.addf %212, %214 : vector<8x6xf32>
    %cst_129 = arith.constant 0.000000e+00 : f32
    %216 = vector.broadcast %cst_129 : f32 to vector<8x6xf32>
    %217 = arith.maximumf %215, %216 : vector<8x6xf32>
    %c0_130 = arith.constant 0 : index
    %c0_131 = arith.constant 0 : index
    %218 = vector.load %arg9[%c0_130, %c0_131] : memref<6x12xf32, #tpu.memory_space<vmem>>, vector<6x12xf32>
    %cst_132 = arith.constant dense<0.000000e+00> : vector<8x12xf32>
    %219 = tpu.matmul %205, %218, %cst_132 {dimension_numbers = #tpu.dot_dimension_numbers<[1], [0], [0], [1], [0, 0, 1, 1], [], []>} : vector<8x6xf32>, vector<6x12xf32>, vector<8x12xf32> -> vector<8x12xf32>
    %c0_133 = arith.constant 0 : index
    %c0_134 = arith.constant 0 : index
    %220 = vector.load %arg10[%c0_133, %c0_134] : memref<1x12xf32, #tpu.memory_space<vmem>>, vector<1x12xf32>
    %221 = vector.broadcast %220 : vector<1x12xf32> to vector<8x12xf32>
    %222 = arith.addf %219, %221 : vector<8x12xf32>
    %cst_135 = arith.constant 0.000000e+00 : f32
    %223 = vector.broadcast %cst_135 : f32 to vector<8x12xf32>
    %224 = arith.maximumf %222, %223 : vector<8x12xf32>
    %c0_136 = arith.constant 0 : index
    %c0_137 = arith.constant 0 : index
    %225 = vector.load %arg9[%c0_136, %c0_137] : memref<6x12xf32, #tpu.memory_space<vmem>>, vector<6x12xf32>
    %cst_138 = arith.constant dense<0.000000e+00> : vector<8x12xf32>
    %226 = tpu.matmul %217, %225, %cst_138 {dimension_numbers = #tpu.dot_dimension_numbers<[1], [0], [0], [1], [0, 0, 1, 1], [], []>} : vector<8x6xf32>, vector<6x12xf32>, vector<8x12xf32> -> vector<8x12xf32>
    %c0_139 = arith.constant 0 : index
    %c0_140 = arith.constant 0 : index
    %227 = vector.load %arg10[%c0_139, %c0_140] : memref<1x12xf32, #tpu.memory_space<vmem>>, vector<1x12xf32>
    %228 = vector.broadcast %227 : vector<1x12xf32> to vector<8x12xf32>
    %229 = arith.addf %226, %228 : vector<8x12xf32>
    %cst_141 = arith.constant 0.000000e+00 : f32
    %230 = vector.broadcast %cst_141 : f32 to vector<8x12xf32>
    %231 = arith.maximumf %229, %230 : vector<8x12xf32>
    %232 = vector.extract_strided_slice %224 {offsets = [0, 0], sizes = [1, 12], strides = [1, 1]} : vector<8x12xf32> to vector<1x12xf32>
    %233 = vector.extract_strided_slice %231 {offsets = [0, 0], sizes = [1, 12], strides = [1, 1]} : vector<8x12xf32> to vector<1x12xf32>
    %234 = vector.extract_strided_slice %224 {offsets = [1, 0], sizes = [1, 12], strides = [1, 1]} : vector<8x12xf32> to vector<1x12xf32>
    %235 = vector.extract_strided_slice %231 {offsets = [1, 0], sizes = [1, 12], strides = [1, 1]} : vector<8x12xf32> to vector<1x12xf32>
    %236 = vector.extract_strided_slice %224 {offsets = [2, 0], sizes = [1, 12], strides = [1, 1]} : vector<8x12xf32> to vector<1x12xf32>
    %237 = vector.extract_strided_slice %231 {offsets = [2, 0], sizes = [1, 12], strides = [1, 1]} : vector<8x12xf32> to vector<1x12xf32>
    %238 = vector.extract_strided_slice %224 {offsets = [3, 0], sizes = [1, 12], strides = [1, 1]} : vector<8x12xf32> to vector<1x12xf32>
    %239 = vector.extract_strided_slice %231 {offsets = [3, 0], sizes = [1, 12], strides = [1, 1]} : vector<8x12xf32> to vector<1x12xf32>
    %240 = vector.extract_strided_slice %224 {offsets = [4, 0], sizes = [1, 12], strides = [1, 1]} : vector<8x12xf32> to vector<1x12xf32>
    %241 = vector.extract_strided_slice %231 {offsets = [4, 0], sizes = [1, 12], strides = [1, 1]} : vector<8x12xf32> to vector<1x12xf32>
    %242 = vector.extract_strided_slice %224 {offsets = [5, 0], sizes = [1, 12], strides = [1, 1]} : vector<8x12xf32> to vector<1x12xf32>
    %243 = vector.extract_strided_slice %231 {offsets = [5, 0], sizes = [1, 12], strides = [1, 1]} : vector<8x12xf32> to vector<1x12xf32>
    %244 = vector.extract_strided_slice %224 {offsets = [6, 0], sizes = [1, 12], strides = [1, 1]} : vector<8x12xf32> to vector<1x12xf32>
    %245 = vector.extract_strided_slice %231 {offsets = [6, 0], sizes = [1, 12], strides = [1, 1]} : vector<8x12xf32> to vector<1x12xf32>
    %246 = vector.extract_strided_slice %224 {offsets = [7, 0], sizes = [1, 12], strides = [1, 1]} : vector<8x12xf32> to vector<1x12xf32>
    %247 = vector.extract_strided_slice %231 {offsets = [7, 0], sizes = [1, 12], strides = [1, 1]} : vector<8x12xf32> to vector<1x12xf32>
    %248 = tpu.concatenate %232, %233, %234, %235, %236, %237, %238, %239, %240, %241, %242, %243, %244, %245, %246, %247 in 0 : vector<1x12xf32>, vector<1x12xf32>, vector<1x12xf32>, vector<1x12xf32>, vector<1x12xf32>, vector<1x12xf32>, vector<1x12xf32>, vector<1x12xf32>, vector<1x12xf32>, vector<1x12xf32>, vector<1x12xf32>, vector<1x12xf32>, vector<1x12xf32>, vector<1x12xf32>, vector<1x12xf32>, vector<1x12xf32> -> vector<16x12xf32>
    %249 = tpu.iota {dimensions = array<i32: 1>} : vector<1x48xi32>
    %c24_i32 = arith.constant 24 : i32
    %250 = vector.broadcast %c24_i32 : i32 to vector<1x48xi32>
    %251 = arith.cmpi sge, %249, %250 : vector<1x48xi32>
    %c36_i32 = arith.constant 36 : i32
    %252 = vector.broadcast %c36_i32 : i32 to vector<1x48xi32>
    %253 = arith.cmpi slt, %249, %252 : vector<1x48xi32>
    %254 = arith.andi %251, %253 : vector<1x48xi1>
    %cst_142 = arith.constant 1.000000e+00 : f32
    %cst_143 = arith.constant 5.000000e-01 : f32
    %255 = vector.broadcast %cst_142 : f32 to vector<1x48xf32>
    %256 = vector.broadcast %cst_143 : f32 to vector<1x48xf32>
    %257 = arith.select %254, %255, %256 : vector<1x48xi1>, vector<1x48xf32>
    %cst_144 = arith.constant 0.000000e+00 : f32
    %cst_145 = arith.constant 5.000000e-01 : f32
    %258 = vector.broadcast %cst_144 : f32 to vector<1x48xf32>
    %259 = vector.broadcast %cst_145 : f32 to vector<1x48xf32>
    %260 = arith.select %254, %258, %259 : vector<1x48xi1>, vector<1x48xf32>
    %c0_i32 = arith.constant 0 : i32
    %c120_i32 = arith.constant 120 : i32
    %261 = arith.addi %c0_i32, %c120_i32 : i32
    %c1_i32 = arith.constant 1 : i32
    %262 = scf.for %arg25 = %c0_i32 to %261 step %c1_i32 iter_args(%arg26 = %248) -> (vector<16x12xf32>)  : i32 {
      %296 = arith.index_cast %arg25 : i32 to index
      %c0_176 = arith.constant 0 : index
      %c0_177 = arith.constant 0 : index
      %297 = vector.load %arg11[%296, %c0_176, %c0_177] : memref<120x12x48xf32, #tpu.memory_space<vmem>>, vector<1x12x48xf32>
      %298 = vector.shape_cast %297 : vector<1x12x48xf32> to vector<12x48xf32>
      %299 = arith.index_cast %arg25 : i32 to index
      %c0_178 = arith.constant 0 : index
      %c0_179 = arith.constant 0 : index
      %300 = vector.load %arg12[%299, %c0_178, %c0_179] : memref<120x12x48xf32, #tpu.memory_space<vmem>>, vector<1x12x48xf32>
      %301 = vector.shape_cast %300 : vector<1x12x48xf32> to vector<12x48xf32>
      %302 = arith.index_cast %arg25 : i32 to index
      %c0_180 = arith.constant 0 : index
      %303 = vector.load %arg13[%302, %c0_180] : memref<120x48xf32, #tpu.memory_space<vmem>>, vector<1x48xf32>
      %cst_181 = arith.constant dense<0.000000e+00> : vector<16x48xf32>
      %304 = tpu.matmul %arg26, %298, %cst_181 {dimension_numbers = #tpu.dot_dimension_numbers<[1], [0], [0], [1], [0, 0, 1, 1], [], []>} : vector<16x12xf32>, vector<12x48xf32>, vector<16x48xf32> -> vector<16x48xf32>
      %305 = vector.broadcast %303 : vector<1x48xf32> to vector<16x48xf32>
      %306 = arith.addf %304, %305 : vector<16x48xf32>
      %cst_182 = arith.constant 0.000000e+00 : f32
      %307 = vector.broadcast %cst_182 : f32 to vector<2x12xf32>
      %cst_183 = arith.constant 0.000000e+00 : f32
      %308 = vector.broadcast %cst_183 : f32 to vector<2x12xf32>
      %309 = vector.extract_strided_slice %306 {offsets = [0, 0], sizes = [2, 48], strides = [1, 1]} : vector<16x48xf32> to vector<2x48xf32>
      %cst_184 = arith.constant dense<0.000000e+00> : vector<2x48xf32>
      %310 = tpu.matmul %307, %301, %cst_184 {dimension_numbers = #tpu.dot_dimension_numbers<[1], [0], [0], [1], [0, 0, 1, 1], [], []>} : vector<2x12xf32>, vector<12x48xf32>, vector<2x48xf32> -> vector<2x48xf32>
      %311 = arith.addf %309, %310 : vector<2x48xf32>
      %312 = math.tanh %311 : vector<2x48xf32>
      %313 = vector.broadcast %257 : vector<1x48xf32> to vector<2x48xf32>
      %314 = arith.mulf %312, %313 : vector<2x48xf32>
      %315 = vector.broadcast %260 : vector<1x48xf32> to vector<2x48xf32>
      %316 = arith.addf %314, %315 : vector<2x48xf32>
      %317 = vector.extract_strided_slice %316 {offsets = [0, 0], sizes = [2, 12], strides = [1, 1]} : vector<2x48xf32> to vector<2x12xf32>
      %318 = vector.extract_strided_slice %316 {offsets = [0, 12], sizes = [2, 12], strides = [1, 1]} : vector<2x48xf32> to vector<2x12xf32>
      %319 = vector.extract_strided_slice %316 {offsets = [0, 24], sizes = [2, 12], strides = [1, 1]} : vector<2x48xf32> to vector<2x12xf32>
      %320 = vector.extract_strided_slice %316 {offsets = [0, 36], sizes = [2, 12], strides = [1, 1]} : vector<2x48xf32> to vector<2x12xf32>
      %321 = arith.mulf %318, %308 : vector<2x12xf32>
      %322 = arith.mulf %317, %319 : vector<2x12xf32>
      %323 = arith.addf %321, %322 : vector<2x12xf32>
      %324 = math.tanh %323 : vector<2x12xf32>
      %325 = arith.mulf %320, %324 : vector<2x12xf32>
      %326 = vector.extract_strided_slice %306 {offsets = [2, 0], sizes = [2, 48], strides = [1, 1]} : vector<16x48xf32> to vector<2x48xf32>
      %cst_185 = arith.constant dense<0.000000e+00> : vector<2x48xf32>
      %327 = tpu.matmul %325, %301, %cst_185 {dimension_numbers = #tpu.dot_dimension_numbers<[1], [0], [0], [1], [0, 0, 1, 1], [], []>} : vector<2x12xf32>, vector<12x48xf32>, vector<2x48xf32> -> vector<2x48xf32>
      %328 = arith.addf %326, %327 : vector<2x48xf32>
      %329 = math.tanh %328 : vector<2x48xf32>
      %330 = vector.broadcast %257 : vector<1x48xf32> to vector<2x48xf32>
      %331 = arith.mulf %329, %330 : vector<2x48xf32>
      %332 = vector.broadcast %260 : vector<1x48xf32> to vector<2x48xf32>
      %333 = arith.addf %331, %332 : vector<2x48xf32>
      %334 = vector.extract_strided_slice %333 {offsets = [0, 0], sizes = [2, 12], strides = [1, 1]} : vector<2x48xf32> to vector<2x12xf32>
      %335 = vector.extract_strided_slice %333 {offsets = [0, 12], sizes = [2, 12], strides = [1, 1]} : vector<2x48xf32> to vector<2x12xf32>
      %336 = vector.extract_strided_slice %333 {offsets = [0, 24], sizes = [2, 12], strides = [1, 1]} : vector<2x48xf32> to vector<2x12xf32>
      %337 = vector.extract_strided_slice %333 {offsets = [0, 36], sizes = [2, 12], strides = [1, 1]} : vector<2x48xf32> to vector<2x12xf32>
      %338 = arith.mulf %335, %323 : vector<2x12xf32>
      %339 = arith.mulf %334, %336 : vector<2x12xf32>
      %340 = arith.addf %338, %339 : vector<2x12xf32>
      %341 = math.tanh %340 : vector<2x12xf32>
      %342 = arith.mulf %337, %341 : vector<2x12xf32>
      %343 = vector.extract_strided_slice %306 {offsets = [4, 0], sizes = [2, 48], strides = [1, 1]} : vector<16x48xf32> to vector<2x48xf32>
      %cst_186 = arith.constant dense<0.000000e+00> : vector<2x48xf32>
      %344 = tpu.matmul %342, %301, %cst_186 {dimension_numbers = #tpu.dot_dimension_numbers<[1], [0], [0], [1], [0, 0, 1, 1], [], []>} : vector<2x12xf32>, vector<12x48xf32>, vector<2x48xf32> -> vector<2x48xf32>
      %345 = arith.addf %343, %344 : vector<2x48xf32>
      %346 = math.tanh %345 : vector<2x48xf32>
      %347 = vector.broadcast %257 : vector<1x48xf32> to vector<2x48xf32>
      %348 = arith.mulf %346, %347 : vector<2x48xf32>
      %349 = vector.broadcast %260 : vector<1x48xf32> to vector<2x48xf32>
      %350 = arith.addf %348, %349 : vector<2x48xf32>
      %351 = vector.extract_strided_slice %350 {offsets = [0, 0], sizes = [2, 12], strides = [1, 1]} : vector<2x48xf32> to vector<2x12xf32>
      %352 = vector.extract_strided_slice %350 {offsets = [0, 12], sizes = [2, 12], strides = [1, 1]} : vector<2x48xf32> to vector<2x12xf32>
      %353 = vector.extract_strided_slice %350 {offsets = [0, 24], sizes = [2, 12], strides = [1, 1]} : vector<2x48xf32> to vector<2x12xf32>
      %354 = vector.extract_strided_slice %350 {offsets = [0, 36], sizes = [2, 12], strides = [1, 1]} : vector<2x48xf32> to vector<2x12xf32>
      %355 = arith.mulf %352, %340 : vector<2x12xf32>
      %356 = arith.mulf %351, %353 : vector<2x12xf32>
      %357 = arith.addf %355, %356 : vector<2x12xf32>
      %358 = math.tanh %357 : vector<2x12xf32>
      %359 = arith.mulf %354, %358 : vector<2x12xf32>
      %360 = vector.extract_strided_slice %306 {offsets = [6, 0], sizes = [2, 48], strides = [1, 1]} : vector<16x48xf32> to vector<2x48xf32>
      %cst_187 = arith.constant dense<0.000000e+00> : vector<2x48xf32>
      %361 = tpu.matmul %359, %301, %cst_187 {dimension_numbers = #tpu.dot_dimension_numbers<[1], [0], [0], [1], [0, 0, 1, 1], [], []>} : vector<2x12xf32>, vector<12x48xf32>, vector<2x48xf32> -> vector<2x48xf32>
      %362 = arith.addf %360, %361 : vector<2x48xf32>
      %363 = math.tanh %362 : vector<2x48xf32>
      %364 = vector.broadcast %257 : vector<1x48xf32> to vector<2x48xf32>
      %365 = arith.mulf %363, %364 : vector<2x48xf32>
      %366 = vector.broadcast %260 : vector<1x48xf32> to vector<2x48xf32>
      %367 = arith.addf %365, %366 : vector<2x48xf32>
      %368 = vector.extract_strided_slice %367 {offsets = [0, 0], sizes = [2, 12], strides = [1, 1]} : vector<2x48xf32> to vector<2x12xf32>
      %369 = vector.extract_strided_slice %367 {offsets = [0, 12], sizes = [2, 12], strides = [1, 1]} : vector<2x48xf32> to vector<2x12xf32>
      %370 = vector.extract_strided_slice %367 {offsets = [0, 24], sizes = [2, 12], strides = [1, 1]} : vector<2x48xf32> to vector<2x12xf32>
      %371 = vector.extract_strided_slice %367 {offsets = [0, 36], sizes = [2, 12], strides = [1, 1]} : vector<2x48xf32> to vector<2x12xf32>
      %372 = arith.mulf %369, %357 : vector<2x12xf32>
      %373 = arith.mulf %368, %370 : vector<2x12xf32>
      %374 = arith.addf %372, %373 : vector<2x12xf32>
      %375 = math.tanh %374 : vector<2x12xf32>
      %376 = arith.mulf %371, %375 : vector<2x12xf32>
      %377 = vector.extract_strided_slice %306 {offsets = [8, 0], sizes = [2, 48], strides = [1, 1]} : vector<16x48xf32> to vector<2x48xf32>
      %cst_188 = arith.constant dense<0.000000e+00> : vector<2x48xf32>
      %378 = tpu.matmul %376, %301, %cst_188 {dimension_numbers = #tpu.dot_dimension_numbers<[1], [0], [0], [1], [0, 0, 1, 1], [], []>} : vector<2x12xf32>, vector<12x48xf32>, vector<2x48xf32> -> vector<2x48xf32>
      %379 = arith.addf %377, %378 : vector<2x48xf32>
      %380 = math.tanh %379 : vector<2x48xf32>
      %381 = vector.broadcast %257 : vector<1x48xf32> to vector<2x48xf32>
      %382 = arith.mulf %380, %381 : vector<2x48xf32>
      %383 = vector.broadcast %260 : vector<1x48xf32> to vector<2x48xf32>
      %384 = arith.addf %382, %383 : vector<2x48xf32>
      %385 = vector.extract_strided_slice %384 {offsets = [0, 0], sizes = [2, 12], strides = [1, 1]} : vector<2x48xf32> to vector<2x12xf32>
      %386 = vector.extract_strided_slice %384 {offsets = [0, 12], sizes = [2, 12], strides = [1, 1]} : vector<2x48xf32> to vector<2x12xf32>
      %387 = vector.extract_strided_slice %384 {offsets = [0, 24], sizes = [2, 12], strides = [1, 1]} : vector<2x48xf32> to vector<2x12xf32>
      %388 = vector.extract_strided_slice %384 {offsets = [0, 36], sizes = [2, 12], strides = [1, 1]} : vector<2x48xf32> to vector<2x12xf32>
      %389 = arith.mulf %386, %374 : vector<2x12xf32>
      %390 = arith.mulf %385, %387 : vector<2x12xf32>
      %391 = arith.addf %389, %390 : vector<2x12xf32>
      %392 = math.tanh %391 : vector<2x12xf32>
      %393 = arith.mulf %388, %392 : vector<2x12xf32>
      %394 = vector.extract_strided_slice %306 {offsets = [10, 0], sizes = [2, 48], strides = [1, 1]} : vector<16x48xf32> to vector<2x48xf32>
      %cst_189 = arith.constant dense<0.000000e+00> : vector<2x48xf32>
      %395 = tpu.matmul %393, %301, %cst_189 {dimension_numbers = #tpu.dot_dimension_numbers<[1], [0], [0], [1], [0, 0, 1, 1], [], []>} : vector<2x12xf32>, vector<12x48xf32>, vector<2x48xf32> -> vector<2x48xf32>
      %396 = arith.addf %394, %395 : vector<2x48xf32>
      %397 = math.tanh %396 : vector<2x48xf32>
      %398 = vector.broadcast %257 : vector<1x48xf32> to vector<2x48xf32>
      %399 = arith.mulf %397, %398 : vector<2x48xf32>
      %400 = vector.broadcast %260 : vector<1x48xf32> to vector<2x48xf32>
      %401 = arith.addf %399, %400 : vector<2x48xf32>
      %402 = vector.extract_strided_slice %401 {offsets = [0, 0], sizes = [2, 12], strides = [1, 1]} : vector<2x48xf32> to vector<2x12xf32>
      %403 = vector.extract_strided_slice %401 {offsets = [0, 12], sizes = [2, 12], strides = [1, 1]} : vector<2x48xf32> to vector<2x12xf32>
      %404 = vector.extract_strided_slice %401 {offsets = [0, 24], sizes = [2, 12], strides = [1, 1]} : vector<2x48xf32> to vector<2x12xf32>
      %405 = vector.extract_strided_slice %401 {offsets = [0, 36], sizes = [2, 12], strides = [1, 1]} : vector<2x48xf32> to vector<2x12xf32>
      %406 = arith.mulf %403, %391 : vector<2x12xf32>
      %407 = arith.mulf %402, %404 : vector<2x12xf32>
      %408 = arith.addf %406, %407 : vector<2x12xf32>
      %409 = math.tanh %408 : vector<2x12xf32>
      %410 = arith.mulf %405, %409 : vector<2x12xf32>
      %411 = vector.extract_strided_slice %306 {offsets = [12, 0], sizes = [2, 48], strides = [1, 1]} : vector<16x48xf32> to vector<2x48xf32>
      %cst_190 = arith.constant dense<0.000000e+00> : vector<2x48xf32>
      %412 = tpu.matmul %410, %301, %cst_190 {dimension_numbers = #tpu.dot_dimension_numbers<[1], [0], [0], [1], [0, 0, 1, 1], [], []>} : vector<2x12xf32>, vector<12x48xf32>, vector<2x48xf32> -> vector<2x48xf32>
      %413 = arith.addf %411, %412 : vector<2x48xf32>
      %414 = math.tanh %413 : vector<2x48xf32>
      %415 = vector.broadcast %257 : vector<1x48xf32> to vector<2x48xf32>
      %416 = arith.mulf %414, %415 : vector<2x48xf32>
      %417 = vector.broadcast %260 : vector<1x48xf32> to vector<2x48xf32>
      %418 = arith.addf %416, %417 : vector<2x48xf32>
      %419 = vector.extract_strided_slice %418 {offsets = [0, 0], sizes = [2, 12], strides = [1, 1]} : vector<2x48xf32> to vector<2x12xf32>
      %420 = vector.extract_strided_slice %418 {offsets = [0, 12], sizes = [2, 12], strides = [1, 1]} : vector<2x48xf32> to vector<2x12xf32>
      %421 = vector.extract_strided_slice %418 {offsets = [0, 24], sizes = [2, 12], strides = [1, 1]} : vector<2x48xf32> to vector<2x12xf32>
      %422 = vector.extract_strided_slice %418 {offsets = [0, 36], sizes = [2, 12], strides = [1, 1]} : vector<2x48xf32> to vector<2x12xf32>
      %423 = arith.mulf %420, %408 : vector<2x12xf32>
      %424 = arith.mulf %419, %421 : vector<2x12xf32>
      %425 = arith.addf %423, %424 : vector<2x12xf32>
      %426 = math.tanh %425 : vector<2x12xf32>
      %427 = arith.mulf %422, %426 : vector<2x12xf32>
      %428 = vector.extract_strided_slice %306 {offsets = [14, 0], sizes = [2, 48], strides = [1, 1]} : vector<16x48xf32> to vector<2x48xf32>
      %cst_191 = arith.constant dense<0.000000e+00> : vector<2x48xf32>
      %429 = tpu.matmul %427, %301, %cst_191 {dimension_numbers = #tpu.dot_dimension_numbers<[1], [0], [0], [1], [0, 0, 1, 1], [], []>} : vector<2x12xf32>, vector<12x48xf32>, vector<2x48xf32> -> vector<2x48xf32>
      %430 = arith.addf %428, %429 : vector<2x48xf32>
      %431 = math.tanh %430 : vector<2x48xf32>
      %432 = vector.broadcast %257 : vector<1x48xf32> to vector<2x48xf32>
      %433 = arith.mulf %431, %432 : vector<2x48xf32>
      %434 = vector.broadcast %260 : vector<1x48xf32> to vector<2x48xf32>
      %435 = arith.addf %433, %434 : vector<2x48xf32>
      %436 = vector.extract_strided_slice %435 {offsets = [0, 0], sizes = [2, 12], strides = [1, 1]} : vector<2x48xf32> to vector<2x12xf32>
      %437 = vector.extract_strided_slice %435 {offsets = [0, 12], sizes = [2, 12], strides = [1, 1]} : vector<2x48xf32> to vector<2x12xf32>
      %438 = vector.extract_strided_slice %435 {offsets = [0, 24], sizes = [2, 12], strides = [1, 1]} : vector<2x48xf32> to vector<2x12xf32>
      %439 = vector.extract_strided_slice %435 {offsets = [0, 36], sizes = [2, 12], strides = [1, 1]} : vector<2x48xf32> to vector<2x12xf32>
      %440 = arith.mulf %437, %425 : vector<2x12xf32>
      %441 = arith.mulf %436, %438 : vector<2x12xf32>
      %442 = arith.addf %440, %441 : vector<2x12xf32>
      %443 = math.tanh %442 : vector<2x12xf32>
      %444 = arith.mulf %439, %443 : vector<2x12xf32>
      %c2_i32 = arith.constant 2 : i32
      %445 = arith.muli %arg25, %c2_i32 : i32
      %446 = arith.index_cast %445 : i32 to index
      %c0_192 = arith.constant 0 : index
      %447 = vector.load %arg24[%446, %c0_192] : memref<240x12xf32, #tpu.memory_space<vmem>>, vector<2x12xf32>
      tpu.vector_store %arg24[%446, %c0_192], %444 {strides = array<i32>} : memref<240x12xf32, #tpu.memory_space<vmem>>, vector<2x12xf32>,
      %448 = tpu.concatenate %325, %342, %359, %376, %393, %410, %427, %444 in 0 : vector<2x12xf32>, vector<2x12xf32>, vector<2x12xf32>, vector<2x12xf32>, vector<2x12xf32>, vector<2x12xf32>, vector<2x12xf32>, vector<2x12xf32> -> vector<16x12xf32>
      scf.yield %448 : vector<16x12xf32>
    }
    %c120_i32_146 = arith.constant 120 : i32
    %c0_147 = arith.constant 0 : index
    %c0_148 = arith.constant 0 : index
    %263 = vector.load %arg24[%c0_147, %c0_148] : memref<240x12xf32, #tpu.memory_space<vmem>>, vector<240x12xf32>
    %c0_149 = arith.constant 0 : index
    %c0_150 = arith.constant 0 : index
    %264 = vector.load %arg14[%c0_149, %c0_150] : memref<12x12xf32, #tpu.memory_space<vmem>>, vector<12x12xf32>
    %cst_151 = arith.constant dense<0.000000e+00> : vector<240x12xf32>
    %265 = tpu.matmul %263, %264, %cst_151 {dimension_numbers = #tpu.dot_dimension_numbers<[1], [0], [0], [1], [0, 0, 1, 1], [], []>} : vector<240x12xf32>, vector<12x12xf32>, vector<240x12xf32> -> vector<240x12xf32>
    %c0_152 = arith.constant 0 : index
    %c0_153 = arith.constant 0 : index
    %266 = vector.load %arg15[%c0_152, %c0_153] : memref<1x12xf32, #tpu.memory_space<vmem>>, vector<1x12xf32>
    %267 = vector.broadcast %266 : vector<1x12xf32> to vector<240x12xf32>
    %268 = arith.addf %265, %267 : vector<240x12xf32>
    %cst_154 = arith.constant 0.000000e+00 : f32
    %269 = vector.broadcast %cst_154 : f32 to vector<240x12xf32>
    %270 = arith.maximumf %268, %269 : vector<240x12xf32>
    %c0_155 = arith.constant 0 : index
    %c0_156 = arith.constant 0 : index
    %271 = vector.load %arg16[%c0_155, %c0_156] : memref<12x12xf32, #tpu.memory_space<vmem>>, vector<12x12xf32>
    %cst_157 = arith.constant dense<0.000000e+00> : vector<240x12xf32>
    %272 = tpu.matmul %270, %271, %cst_157 {dimension_numbers = #tpu.dot_dimension_numbers<[1], [0], [0], [1], [0, 0, 1, 1], [], []>} : vector<240x12xf32>, vector<12x12xf32>, vector<240x12xf32> -> vector<240x12xf32>
    %c0_158 = arith.constant 0 : index
    %c0_159 = arith.constant 0 : index
    %273 = vector.load %arg17[%c0_158, %c0_159] : memref<1x12xf32, #tpu.memory_space<vmem>>, vector<1x12xf32>
    %274 = vector.broadcast %273 : vector<1x12xf32> to vector<240x12xf32>
    %275 = arith.addf %272, %274 : vector<240x12xf32>
    %cst_160 = arith.constant 0.000000e+00 : f32
    %276 = vector.broadcast %cst_160 : f32 to vector<240x12xf32>
    %277 = arith.maximumf %275, %276 : vector<240x12xf32>
    %c0_161 = arith.constant 0 : index
    %c0_162 = arith.constant 0 : index
    %278 = vector.load %arg18[%c0_161, %c0_162] : memref<12x12xf32, #tpu.memory_space<vmem>>, vector<12x12xf32>
    %cst_163 = arith.constant dense<0.000000e+00> : vector<240x12xf32>
    %279 = tpu.matmul %277, %278, %cst_163 {dimension_numbers = #tpu.dot_dimension_numbers<[1], [0], [0], [1], [0, 0, 1, 1], [], []>} : vector<240x12xf32>, vector<12x12xf32>, vector<240x12xf32> -> vector<240x12xf32>
    %c0_164 = arith.constant 0 : index
    %c0_165 = arith.constant 0 : index
    %280 = vector.load %arg19[%c0_164, %c0_165] : memref<1x12xf32, #tpu.memory_space<vmem>>, vector<1x12xf32>
    %281 = vector.broadcast %280 : vector<1x12xf32> to vector<240x12xf32>
    %282 = arith.addf %279, %281 : vector<240x12xf32>
    %c0_166 = arith.constant 0 : index
    %c0_167 = arith.constant 0 : index
    %283 = vector.load %arg20[%c0_166, %c0_167] : memref<12x12xf32, #tpu.memory_space<vmem>>, vector<12x12xf32>
    %cst_168 = arith.constant dense<0.000000e+00> : vector<240x12xf32>
    %284 = tpu.matmul %277, %283, %cst_168 {dimension_numbers = #tpu.dot_dimension_numbers<[1], [0], [0], [1], [0, 0, 1, 1], [], []>} : vector<240x12xf32>, vector<12x12xf32>, vector<240x12xf32> -> vector<240x12xf32>
    %c0_169 = arith.constant 0 : index
    %c0_170 = arith.constant 0 : index
    %285 = vector.load %arg21[%c0_169, %c0_170] : memref<1x12xf32, #tpu.memory_space<vmem>>, vector<1x12xf32>
    %286 = vector.broadcast %285 : vector<1x12xf32> to vector<240x12xf32>
    %287 = arith.addf %284, %286 : vector<240x12xf32>
    %cst_171 = arith.constant 5.000000e-01 : f32
    %288 = vector.broadcast %cst_171 : f32 to vector<240x12xf32>
    %289 = arith.mulf %287, %288 : vector<240x12xf32>
    %290 = math.exp %289 : vector<240x12xf32>
    %c0_172 = arith.constant 0 : index
    %c0_173 = arith.constant 0 : index
    %291 = vector.load %arg22[%c0_172, %c0_173] : memref<240x12xf32, #tpu.memory_space<vmem>>, vector<240x12xf32>
    %292 = arith.mulf %290, %291 : vector<240x12xf32>
    %293 = arith.addf %282, %292 : vector<240x12xf32>
    %294 = tpu.concatenate %293, %277, %282, %287 in 1 : vector<240x12xf32>, vector<240x12xf32>, vector<240x12xf32>, vector<240x12xf32> -> vector<240x48xf32>
    %c0_174 = arith.constant 0 : index
    %c0_175 = arith.constant 0 : index
    %295 = vector.load %arg23[%c0_174, %c0_175] : memref<240x48xf32, #tpu.memory_space<vmem>>, vector<240x48xf32>
    tpu.vector_store %arg23[%c0_174, %c0_175], %294 {strides = array<i32>} : memref<240x48xf32, #tpu.memory_space<vmem>>, vector<240x48xf32>,
    return
  }
}

</mosaic_0001>

<bundles_post_ra>
// kernel: tpu_custom_call.1
= control target key start
LH: loop header
LB: loop body
LE: loop exit
PB: predicated region body
PF: predicated region fallthrough
CT: control target
= control target key end

     0   :  { %vm90_vm0 = vcmask 1045504   ;;  %vm85_vm1 = vcmask 48128   ;;  %vm81_vm2 = vcmask 1046528   ;;  %vm186_vm3 = vcmask 1044480   ;;  %s4624_s1 = inlined_call_operand.vmem [shape: f32[5,6,6], index: 1, kind: input, shape index: {}]   ;;  %s4625_s11 = inlined_call_operand.vmem [shape: f32[120,12,48], index: 11, kind: input, shape index: {}]   ;;  %s4626_s12 = inlined_call_operand.vmem [shape: f32[120,12,48], index: 12, kind: input, shape index: {}]   ;;  %s4627_s13 = inlined_call_operand.vmem [shape: f32[120,48], index: 13, kind: input, shape index: {}]   ;;  %s4628_s14 = inlined_call_operand.vmem [shape: f32[12,12], index: 14, kind: input, shape index: {}]   ;;  %s4629_s15 = inlined_call_operand.vmem [shape: f32[1,12], index: 15, kind: input, shape index: {}]   ;;  %s4630_s16 = inlined_call_operand.vmem [shape: f32[12,12], index: 16, kind: input, shape index: {}]   ;;  %s4631_s17 = inlined_call_operand.vmem [shape: f32[1,12], index: 17, kind: input, shape index: {}]   ;;  %s4632_s18 = inlined_call_operand.vmem [shape: f32[12,12], index: 18, kind: input, shape index: {}]   ;;  %s4633_s19 = inlined_call_operand.vmem [shape: f32[1,12], index: 19, kind: input, shape index: {}]   ;;  %s4634_s20 = inlined_call_operand.vmem [shape: f32[12,12], index: 20, kind: input, shape index: {}]   ;;  %s4635_s21 = inlined_call_operand.vmem [shape: f32[1,12], index: 21, kind: input, shape index: {}]   ;;  %s4636_s22 = inlined_call_operand.vmem [shape: f32[240,12], index: 22, kind: input, shape index: {}]   ;;  %s4637_s23 = inlined_call_operand.vmem [shape: f32[240,48], index: 23, kind: output, shape index: {}]   ;;  %s4638_s0 = inlined_call_operand.vmem [shape: f32[2,16,6], index: 0, kind: input, shape index: {}]   ;;  %s4639_s2 = inlined_call_operand.vmem [shape: f32[1,6], index: 2, kind: input, shape index: {}]   ;;  %s4640_s5 = inlined_call_operand.vmem [shape: f32[1,6], index: 5, kind: input, shape index: {}]   ;;  %s4641_s6 = inlined_call_operand.vmem [shape: f32[1,6], index: 6, kind: input, shape index: {}]   ;;  %s4642_s3 = inlined_call_operand.vmem [shape: f32[5,6,6], index: 3, kind: input, shape index: {}]   ;;  %s4643_s4 = inlined_call_operand.vmem [shape: f32[1,6], index: 4, kind: input, shape index: {}]   ;;  %s4644_s7 = inlined_call_operand.vmem [shape: f32[1,6], index: 7, kind: input, shape index: {}]   ;;  %s4645_s8 = inlined_call_operand.vmem [shape: f32[1,6], index: 8, kind: input, shape index: {}]   ;;  %s4646_s10 = inlined_call_operand.vmem [shape: f32[1,12], index: 10, kind: input, shape index: {}]   ;;  %s4647_s9 = inlined_call_operand.vmem [shape: f32[6,12], index: 9, kind: input, shape index: {}]  }
   0x1   :  { %4651 = sst [smem:[#allocation3_spill]] %s4624_s1  ;;  %v74_v3 = vld [vmem:[%s4638_s0] sm:$0xff]  ;;  %v75_v4 = vld [vmem:[%s4638_s0 + $0x8] sm:$0xff]  ;;  %v2974_v16 = vld [vmem:[%s4638_s0 + $0x10] sm:$0xff]  ;;  %vm224_vm4 = vcmask 1043456   ;;  %vm427_vm5 = vcmask 44032  }
   0x2   :  { %4652 = sst [smem:[#allocation4_spill]] %s4625_s11  ;;  %v82_v6 = vrot.slane %v74_v3, 1  ;;  %v83_v7 = vrot.slane %v75_v4, 1  ;;  %v149_v8 = vrot.slane %v74_v3, 2  ;;  %v150_v9 = vrot.slane %v75_v4, 2  ;;  %v2975_v17 = vld [vmem:[%s4638_s0 + $0x18] sm:$0xff] }
   0x3   :  { %4653 = sst [smem:[#allocation5_spill]] %s4626_s12  ;;  %v187_v11 = vrot.slane %v74_v3, 3  ;;  %v188_v12 = vrot.slane %v75_v4, 3  ;;  %v271_v18 = vrot.slane %v2974_v16, 1  ;;  %v272_v19 = vrot.slane %v2975_v17, 1 }
   0x4   :  { %4654 = sst [smem:[#allocation6_spill]] %s4627_s13  ;;  %v84_v13 = vsel %vm81_vm2, %v82_v6, %v83_v7  ;;  %v151_v14 = vsel %vm90_vm0, %v149_v8, %v150_v9  ;;  %v225_v20 = vrot.slane %v74_v3, 4  ;;  %v226_v21 = vrot.slane %v75_v4, 4  ;;  %v3198_v53 = vld [vmem:[%s4639_s2] ss:$0 sm:$0xff] }
   0x5   :  { %4655 = sst [smem:[#allocation7_spill]] %s4628_s14  ;;  %v189_v15 = vsel %vm186_vm3, %v187_v11, %v188_v12  ;;  %v273_v22 = vsel %vm81_vm2, %v271_v18, %v272_v19  ;;  %v328_v23 = vrot.slane %v2974_v16, 2  ;;  %v329_v24 = vrot.slane %v2975_v17, 2 }
   0x6   :  { %4656 = sst [smem:[#allocation8_spill]] %s4629_s15  ;;  %v227_v25 = vsel %vm224_vm4, %v225_v20, %v226_v21  ;;  %v392_v27 = vrot.slane %v2974_v16, 4  ;;  %v393_v28 = vrot.slane %v2975_v17, 4  ;;  %v360_v29 = vrot.slane %v2974_v16, 3 }
   0x7   :  { %4657 = sst [smem:[#allocation9_spill]] %s4630_s16  ;;  %v330_v26 = vsel %vm90_vm0, %v328_v23, %v329_v24  ;;  %v361_v30 = vrot.slane %v2975_v17, 3  ;;  %v3336_v8 = vmov 24.0  }
   0x8   :  { %4658 = sst [smem:[#allocation10_spill]] %s4631_s17  ;;  %v394_v31 = vsel %vm224_vm4, %v392_v27, %v393_v28  ;;  %3205 = vrcp.f32 %v3336_v8 }
   0x9   :  { %s4659_s24 = sld [smem:[#allocation3_spill]]  ;;  %v362_v32 = vsel %vm186_vm3, %v360_v29, %v361_v30 }
   0xe   :  { %v3206_v18 = vpop.eup %3205 }
   0xf   :  { %v2955_v0 = vld [vmem:[%s4659_s24 + $0x8] sm:$0x3f]  ;;  %v76_v1 = vld [vmem:[%s4659_s24] sm:$0x3f]  ;;  %v2962_v2 = vld [vmem:[%s4659_s24 + $0x10] sm:$0x3f]  ;;  %vm476_vm6 = vweird.f32 %v3206_v18 }
  0x10   :  { %2956 = vmatpush.msk.msra.mxu0 %vm90_vm0, %v2955_v0  ;;  %2959 = vmatpush.msk.msra.mxu1 %vm90_vm0, %v76_v1  ;;  %v2970_v5 = vld [vmem:[%s4659_s24 + $0x20] sm:$0x3f]  ;;  %v2966_v10 = vld [vmem:[%s4659_s24 + $0x18] sm:$0x3f] }
  0x11   :  { %2963 = vmatpush.msk.msra.mxu2 %vm90_vm0, %v2962_v2  ;;  %2960 = vmatmul.msk.f32.vlgmr.msra.gmra.mxu1 %vm85_vm1, %v74_v3 }
  0x12   :  { %2971 = vmatpush.msk.msrb.mxu0 %vm90_vm0, %v2970_v5  ;;  %2967 = vmatpush.msk.msra.mxu3 %vm90_vm0, %v2966_v10 }
  0x13   :  { %2976 = vmatpush.msk.msrb.mxu1 %vm90_vm0, %v2955_v0  ;;  %2979 = vmatpush.msk.msrb.mxu2 %vm90_vm0, %v76_v1 }
  0x14   :  { %2957 = vmatmul.msk.f32.vlgmr.msra.gmra.mxu0 %vm85_vm1, %v84_v13  ;;  %2964 = vmatmul.msk.f32.vlgmr.msra.gmra.mxu2 %vm85_vm1, %v151_v14 }
  0x15   :  { %2968 = vmatmul.msk.f32.vlgmr.msra.gmra.mxu3 %vm85_vm1, %v189_v15  ;;  %2985 = vmatpush.msk.msra.mxu0 %vm90_vm0, %v2966_v10 }
  0x16   :  { %2982 = vmatpush.msk.msrb.mxu3 %vm90_vm0, %v2962_v2  ;;  %2988 = vmatpush.msk.msra.mxu1 %vm90_vm0, %v2970_v5 }
  0x19   :  { %2961 = vmatmul.msk.f32.gmra.mxu1 %vm85_vm1, %v75_v4 }
  0x1c   :  { %2958 = vmatmul.msk.f32.gmra.mxu0 %vm85_vm1, %v83_v7  ;;  %2965 = vmatmul.msk.f32.gmra.mxu2 %vm85_vm1, %v150_v9 }
  0x1d   :  { %2969 = vmatmul.msk.f32.gmra.mxu3 %vm85_vm1, %v188_v12 }
  0x21   :  { %2977 = vmatmul.msk.f32.vlgmr.msrb.gmra.mxu1 %vm85_vm1, %v273_v22 }
  0x24   :  { %2972 = vmatmul.msk.f32.vlgmr.msrb.gmra.mxu0 %vm85_vm1, %v227_v25  ;;  %2980 = vmatmul.msk.f32.vlgmr.msrb.gmra.mxu2 %vm85_vm1, %v2974_v16 }
  0x25   :  { %2983 = vmatmul.msk.f32.vlgmr.msrb.gmra.mxu3 %vm85_vm1, %v330_v26 }
  0x29   :  { %2978 = vmatmul.msk.f32.gmra.mxu1 %vm85_vm1, %v272_v19 }
  0x2c   :  { %2973 = vmatmul.msk.f32.gmra.mxu0 %vm85_vm1, %v226_v21  ;;  %2981 = vmatmul.msk.f32.gmra.mxu2 %vm85_vm1, %v2975_v17 }
  0x2d   :  { %2984 = vmatmul.msk.f32.gmra.mxu3 %vm85_vm1, %v329_v24  ;;  %v472_v24 = vmul.f32 24.0, %v3206_v18 }
  0x31   :  { %2989 = vmatmul.msk.f32.vlgmr.msra.gmra.mxu1 %vm85_vm1, %v394_v31 }
  0x34   :  { %2986 = vmatmul.msk.f32.vlgmr.msra.gmra.mxu0 %vm85_vm1, %v362_v32 }
  0x39   :  { %2990 = vmatmul.msk.f32.gmra.mxu1 %vm85_vm1, %v393_v28 }
  0x3c   :  { %2987 = vmatmul.msk.f32.gmra.mxu0 %vm85_vm1, %v361_v30 }
  0x8e   :  { %v141_v33 = vpop.f32.mrf.mxu1 }
  0x91   :  { %v111_v34 = vpop.f32.mrf.mxu0 }
  0x92   :  { %v142_v43 = vadd.f32 %v141_v33, %v111_v34  ;;  %v473_v33 = vsub.f32 1.0, %v472_v24 }
  0x96   :  { %v144_v35 = vpop.f32.mrf.mxu1 }
  0x97   :  { %v176_v36 = vpop.f32.mrf.mxu2 }
  0x98   :  { %v214_v37 = vpop.f32.mrf.mxu3  ;;  %v182_v45 = vadd.f32 %v176_v36, %v142_v43 }
  0x99   :  { %v114_v38 = vpop.f32.mrf.mxu0 }
  0x9a   :  { %v145_v44 = vadd.f32 %v144_v35, %v114_v38  ;;  %v220_v49 = vadd.f32 %v214_v37, %v182_v45 }
  0x9e   :  { %v295_v39 = vpop.f32.mrf.mxu1 }
  0x9f   :  { %v179_v40 = vpop.f32.mrf.mxu2 }
  0xa0   :  { %v217_v41 = vpop.f32.mrf.mxu3  ;;  %v183_v46 = vadd.f32 %v179_v40, %v145_v44  ;;  %v474_v40 = vmul.f32 %v3206_v18, %v473_v33 }
  0xa1   :  { %v252_v42 = vpop.f32.mrf.mxu0 }
  0xa2   :  { %v221_v50 = vadd.f32 %v217_v41, %v183_v46  ;;  %v258_v52 = vadd.f32 %v252_v42, %v220_v49 }
  0xa4   :  { %v3537_v58 = vadd.f32 %v3198_v53, %v258_v52 }
  0xa6   :  { %v298_v47 = vpop.f32.mrf.mxu1  ;;  %v437_v0 = vmul.f32 %v3537_v58, %v3537_v58  ;;  %v426_v3 = vsel %vm85_vm1, %v3537_v58, 0.0 }
  0xa7   :  { %v322_v48 = vpop.f32.mrf.mxu2 }
  0xa8   :  { %v352_v55 = vpop.f32.mrf.mxu3  ;;  %v323_v56 = vadd.f32 %v322_v48, %v295_v39  ;;  %v439_v9 = vsel %vm85_vm1, %v437_v0, 0.0 }
  0xa9   :  { %v255_v51 = vpop.f32.mrf.mxu0 }
  0xaa   :  { %v259_v54 = vadd.f32 %v255_v51, %v221_v50  ;;  %v358_v61 = vadd.f32 %v352_v55, %v323_v56 }
  0xac   :  { %v3535_v57 = vadd.f32 %v3198_v53, %v259_v54 }
  0xae   :  { %v416_v59 = vpop.f32.mrf.mxu1  ;;  %v438_v60 = vmul.f32 %v3535_v57, %v3535_v57  ;;  %v428_v1 = vsel %vm427_vm5, %v3535_v57, 0.0 }
  0xaf   :  { %v325_v62 = vpop.f32.mrf.mxu2  ;;  %v429_v6 = vadd.f32 %v428_v1, %v426_v3 }
  0xb0   :  { %v440_v4 = vsel %vm427_vm5, %v438_v60, 0.0  ;;  %v326_v5 = vadd.f32 %v325_v62, %v298_v47  ;;  %v355_v7 = vpop.f32.mrf.mxu3  ;;  %v475_v47 = vadd.f32 %v3206_v18, %v474_v40  ;;  %v2991_v62 = vld [vmem:[%s4642_s3 + $0x8] sm:$0x3f] }
  0xb1   :  { %v384_v63 = vpop.f32.mrf.mxu0  ;;  %v441_v11 = vadd.f32 %v440_v4, %v439_v9  ;;  %v430_v13 = vrot.slane %v429_v6, 4  ;;  %2992 = vmatpush.msk.msra.mxu2 %vm90_vm0, %v2991_v62  ;;  %3005 = vmatpush.msk.msrb.mxu1 %vm90_vm0, %v2991_v62  ;;  %v2996_v4 = vld [vmem:[%s4642_s3 + $0x10] sm:$0x3f] }
  0xb2   :  { %v390_v2 = vadd.f32 %v384_v63, %v358_v61  ;;  %v359_v12 = vadd.f32 %v355_v7, %v326_v5  ;;  %v477_v54 = vsel %vm476_vm6, %v3206_v18, %v475_v47  ;;  %v3569_v63 = vld [vmem:[%s4642_s3] sm:$0x3f]  ;;  %vm967_vm6 = vcmask 1041408  }
  0xb3   :  { %v442_v19 = vrot.slane %v441_v11, 4  ;;  %v431_v21 = vadd.f32 %v430_v13, %v429_v6  ;;  %2994 = vmatpush.msk.msra.mxu3 %vm90_vm0, %v3569_v63  ;;  %2997 = vmatpush.msk.msrb.mxu2 %vm90_vm0, %v2996_v4  ;;  %v2999_v6 = vld [vmem:[%s4642_s3 + $0x18] sm:$0x3f] }
  0xb4   :  { %v422_v10 = vadd.f32 %v416_v59, %v390_v2  ;;  %v3002_v2 = vld [vmem:[%s4642_s3 + $0x20] sm:$0x3f] }
  0xb5   :  { %v443_v25 = vadd.f32 %v442_v19, %v441_v11  ;;  %v432_v29 = vrot.slane %v431_v21, 2  ;;  %3003 = vmatpush.msk.msrb.mxu0 %vm90_vm0, %v3002_v2  ;;  %3013 = vmatpush.msk.msra.mxu1 %vm90_vm0, %v3002_v2 }
  0xb6   :  { %v419_v15 = vpop.f32.mrf.mxu1  ;;  %v3549_v16 = vadd.f32 %v3198_v53, %v422_v10  ;;  %3000 = vmatpush.msk.msrb.mxu3 %vm90_vm0, %v2999_v6 }
  0xb7   :  { %v444_v34 = vrot.slane %v443_v25, 2  ;;  %v433_v37 = vadd.f32 %v432_v29, %v431_v21  ;;  %3011 = vmatpush.msk.msra.mxu0 %vm90_vm0, %v2999_v6  ;;  %v3200_v21 = vld [vmem:[%s4641_s6] ss:$0 sm:$0xff] }
  0xb8   :  { %v459_v22 = vmul.f32 %v3549_v16, %v3549_v16  ;;  %v449_v26 = vsel %vm85_vm1, %v3549_v16, 0.0 }
  0xb9   :  { %v387_v14 = vpop.f32.mrf.mxu0  ;;  %v445_v41 = vadd.f32 %v444_v34, %v443_v25  ;;  %v434_v44 = vrot.slane %v433_v37, 1 }
  0xba   :  { %v391_v17 = vadd.f32 %v387_v14, %v359_v12  ;;  %v461_v31 = vsel %vm85_vm1, %v459_v22, 0.0  ;;  %v3199_v14 = vld [vmem:[%s4640_s5] ss:$0 sm:$0xff] }
  0xbb   :  { %v446_v48 = vrot.slane %v445_v41, 1  ;;  %v435_v51 = vadd.f32 %v434_v44, %v433_v37 }
  0xbc   :  { %v423_v20 = vadd.f32 %v419_v15, %v391_v17 }
  0xbd   :  { %v447_v55 = vadd.f32 %v446_v48, %v445_v41 }
  0xbe   :  { %v3553_v23 = vadd.f32 %v3198_v53, %v423_v20 }
  0xc0   :  { %v450_v27 = vsel %vm427_vm5, %v3553_v23, 0.0  ;;  %v460_v28 = vmul.f32 %v3553_v23, %v3553_v23 }
  0xc1   :  { %v451_v30 = vadd.f32 %v450_v27, %v449_v26 }
  0xc2   :  { %v462_v32 = vsel %vm427_vm5, %v460_v28, 0.0 }
  0xc3   :  { %v452_v35 = vrot.slane %v451_v30, 4  ;;  %v463_v36 = vadd.f32 %v462_v32, %v461_v31 }
  0xc5   :  { %v453_v38 = vadd.f32 %v452_v35, %v451_v30  ;;  %v464_v39 = vrot.slane %v463_v36, 4 }
  0xc7   :  { %v454_v42 = vrot.slane %v453_v38, 2  ;;  %v465_v43 = vadd.f32 %v464_v39, %v463_v36 }
  0xc9   :  { %v455_v45 = vadd.f32 %v454_v42, %v453_v38  ;;  %v466_v46 = vrot.slane %v465_v43, 2 }
  0xcb   :  { %v456_v49 = vrot.slane %v455_v45, 1  ;;  %v467_v50 = vadd.f32 %v466_v46, %v465_v43 }
  0xcd   :  { %v457_v52 = vadd.f32 %v456_v49, %v455_v45  ;;  %v468_v53 = vrot.slane %v467_v50, 1 }
  0xcf   :  { %v458_v56 = vadd.f32 %v457_v52, %v435_v51  ;;  %v469_v59 = vadd.f32 %v468_v53, %v467_v50 }
  0xd1   :  { %v470_v60 = vadd.f32 %v469_v59, %v447_v55  ;;  %v478_v61 = vmul.f32 %v477_v54, %v458_v56 }
  0xd3   :  { %v479_v0 = vmul.f32 %v477_v54, %v470_v60  ;;  %v480_v1 = vmul.f32 %v478_v61, %v478_v61  ;;  %v494_v13 = vsub.f32 %v3535_v57, %v478_v61  ;;  %v511_v15 = vsub.f32 %v3549_v16, %v478_v61 }
  0xd4   :  { %v512_v17 = vsub.f32 %v3553_v23, %v478_v61  ;;  %v493_v18 = vsub.f32 %v3537_v58, %v478_v61 }
  0xd5   :  { %v481_v3 = vsub.f32 %v479_v0, %v480_v1 }
  0xd7   :  { %v482_v5 = vadd.f32 1e-05, %v481_v3 }
  0xd9   :  { %3207 = vrsqrt.f32 %v482_v5  ;;  %vm489_vm8 = vweird.f32 %v482_v5 }
  0xdf   :  { %v3208_v7 = vpop.eup %3207 }
  0xe0   :  { %v484_v8 = vmul.f32 %v3208_v7, %v482_v5  ;;  %vm490_vm7 = vweird.f32 %v3208_v7 }
  0xe1   :  { %vm491_vm9 = vmor %vm489_vm8, %vm490_vm7  ;;  %vm969_vm7 = vcmask 1042432  }
  0xe2   :  { %v485_v9 = vmul.f32 %v3208_v7, %v484_v8 }
  0xe4   :  { %v486_v10 = vmul.f32 0.5, %v485_v9 }
  0xe6   :  { %v487_v11 = vsub.f32 1.5, %v486_v10 }
  0xe8   :  { %v488_v12 = vmul.f32 %v3208_v7, %v487_v11 }
  0xea   :  { %v492_v19 = vsel %vm491_vm9, %v3208_v7, %v488_v12  ;;  %v3337_v7 = vmov 16.0  }
  0xeb   :  { %v496_v20 = vmul.f32 %v494_v13, %v492_v19  ;;  %v513_v22 = vmul.f32 %v511_v15, %v492_v19  ;;  %v514_v24 = vmul.f32 %v512_v17, %v492_v19  ;;  %v495_v25 = vmul.f32 %v493_v18, %v492_v19 }
  0xec   :  { %3209 = vrcp.f32 %v3337_v7 }
  0xed   :  { %v502_v57 = vmul.f32 %v3199_v14, %v496_v20  ;;  %v515_v26 = vmul.f32 %v3199_v14, %v513_v22  ;;  %v516_v27 = vmul.f32 %v3199_v14, %v514_v24  ;;  %v501_v28 = vmul.f32 %v3199_v14, %v495_v25 }
  0xef   :  { %v517_v29 = vadd.f32 %v3200_v21, %v515_v26  ;;  %v518_v30 = vadd.f32 %v3200_v21, %v516_v27  ;;  %v507_v16 = vadd.f32 %v3200_v21, %v501_v28  ;;  %v508_v31 = vadd.f32 %v3200_v21, %v502_v57 }
  0xf1   :  { %v519_v23 = vmax.f32 %v517_v29, 0.0  ;;  %v520_v32 = vmax.f32 %v518_v30, 0.0  ;;  %v509_v58 = vmax.f32 %v507_v16, 0.0  ;;  %v510_v33 = vmax.f32 %v508_v31, 0.0 }
  0xf2   :  { %v3210_v18 = vpop.eup %3209 }
  0xf3   :  { %2995 = vmatmul.msk.f32.vlgmr.msra.gmra.mxu3 %vm85_vm1, %v509_v58  ;;  %v526_v34 = vrot.slane %v509_v58, 1  ;;  %v527_v35 = vrot.slane %v510_v33, 1  ;;  %v643_v36 = vrot.slane %v509_v58, 4  ;;  %v644_v37 = vrot.slane %v510_v33, 4 }
  0xf4   :  { %v679_v38 = vrot.slane %v519_v23, 1  ;;  %v680_v39 = vrot.slane %v520_v32, 1  ;;  %3009 = vmatpush.msk.msra.mxu3 %vm90_vm0, %v2996_v4  ;;  %v612_v43 = vrot.slane %v509_v58, 3  ;;  %v613_v44 = vrot.slane %v510_v33, 3  ;;  %v3201_v4 = vld [vmem:[%s4643_s4] ss:$0 sm:$0xff] }
  0xf5   :  { %v528_v40 = vsel %vm81_vm2, %v526_v34, %v527_v35  ;;  %v645_v41 = vsel %vm224_vm4, %v643_v36, %v644_v37  ;;  %v581_v45 = vrot.slane %v509_v58, 2  ;;  %v582_v46 = vrot.slane %v510_v33, 2 }
  0xf6   :  { %2993 = vmatmul.msk.f32.vlgmr.msra.gmra.mxu2 %vm85_vm1, %v528_v40  ;;  %3004 = vmatmul.msk.f32.vlgmr.msrb.gmra.mxu0 %vm85_vm1, %v645_v41  ;;  %v681_v42 = vsel %vm81_vm2, %v679_v38, %v680_v39  ;;  %v752_v47 = vrot.slane %v519_v23, 3  ;;  %v753_v48 = vrot.slane %v520_v32, 3  ;;  %v614_v49 = vsel %vm186_vm3, %v612_v43, %v613_v44 }
  0xf7   :  { %3006 = vmatmul.msk.f32.vlgmr.msrb.gmra.mxu1 %vm85_vm1, %v681_v42  ;;  %3007 = vmatpush.msk.msra.mxu2 %vm90_vm0, %v3569_v63  ;;  %v778_v50 = vrot.slane %v519_v23, 4  ;;  %v779_v51 = vrot.slane %v520_v32, 4  ;;  %v583_v52 = vsel %vm90_vm0, %v581_v45, %v582_v46  ;;  %v726_v55 = vrot.slane %v519_v23, 2  ;;  %v879_v46 = vld [vmem:[%s4647_s9] sm:$0x3f] }
  0xf8   :  { %v754_v53 = vsel %vm186_vm3, %v752_v47, %v753_v48  ;;  %v727_v56 = vrot.slane %v520_v32, 2  ;;  %v840_v57 = vmul.f32 16.0, %v3210_v18  ;;  %vm844_vm10 = vweird.f32 %v3210_v18 }
  0xf9   :  { %v780_v54 = vsel %vm224_vm4, %v778_v50, %v779_v51 }
  0xfa   :  { %v728_v59 = vsel %vm90_vm0, %v726_v55, %v727_v56  ;;  %v841_v16 = vsub.f32 1.0, %v840_v57 }
  0xfb   :  { %3001 = vmatmul.msk.f32.vlgmr.msrb.gmra.mxu3 %vm85_vm1, %v614_v49 }
  0xfc   :  { %v842_v35 = vmul.f32 %v3210_v18, %v841_v16  ;;  %3017 = vmatpush.msk.msrb.mxu3 %vm90_vm0, %v879_v46 }
  0xfe   :  { %2998 = vmatmul.msk.f32.vlgmr.msrb.gmra.mxu2 %vm85_vm1, %v583_v52  ;;  %3012 = vmatmul.msk.f32.vlgmr.msra.gmra.mxu0 %vm85_vm1, %v754_v53  ;;  %v843_v42 = vadd.f32 %v3210_v18, %v842_v35 }
  0xff   :  { %3014 = vmatmul.msk.f32.vlgmr.msra.gmra.mxu1 %vm85_vm1, %v780_v54  ;;  %3015 = vmatpush.msk.msrb.mxu2 %vm90_vm0, %v879_v46 }
 0x100   :  { %v845_v50 = vsel %vm844_vm10, %v3210_v18, %v843_v42 }
 0x103   :  { %3010 = vmatmul.msk.f32.vlgmr.msra.gmra.mxu3 %vm85_vm1, %v728_v59 }
 0x106   :  { %3008 = vmatmul.msk.f32.vlgmr.msra.gmra.mxu2 %vm85_vm1, %v519_v23 }
 0x173   :  { %v668_v2 = vpop.f32.mrf.mxu0 }
 0x174   :  { %v701_v5 = vpop.f32.mrf.mxu1 }
 0x176   :  { %v576_v60 = vpop.f32.mrf.mxu3 }
 0x179   :  { %v551_v61 = vpop.f32.mrf.mxu2 }
 0x17a   :  { %v577_v62 = vadd.f32 %v576_v60, %v551_v61 }
 0x17b   :  { %v774_v19 = vpop.f32.mrf.mxu0 }
 0x17c   :  { %v800_v22 = vpop.f32.mrf.mxu1 }
 0x17e   :  { %v637_v63 = vpop.f32.mrf.mxu3 }
 0x181   :  { %v606_v0 = vpop.f32.mrf.mxu2 }
 0x182   :  { %v609_v1 = vadd.f32 %v606_v0, %v577_v62 }
 0x184   :  { %v640_v3 = vadd.f32 %v637_v63, %v609_v1 }
 0x186   :  { %v671_v6 = vadd.f32 %v668_v2, %v640_v3  ;;  %v748_v14 = vpop.f32.mrf.mxu3 }
 0x188   :  { %v3623_v8 = vadd.f32 %v3201_v4, %v671_v6  ;;  %v3202_v6 = vld [vmem:[%s4644_s7] ss:$0 sm:$0xff] }
 0x189   :  { %v723_v9 = vpop.f32.mrf.mxu2 }
 0x18a   :  { %v805_v10 = vsel %vm85_vm1, %v3623_v8, 0.0  ;;  %v813_v11 = vmul.f32 %v3623_v8, %v3623_v8  ;;  %v724_v12 = vadd.f32 %v723_v9, %v701_v5 }
 0x18b   :  { %v806_v13 = vrot.slane %v805_v10, 4 }
 0x18c   :  { %v814_v15 = vsel %vm85_vm1, %v813_v11, 0.0  ;;  %v751_v17 = vadd.f32 %v748_v14, %v724_v12  ;;  %v3203_v11 = vld [vmem:[%s4645_s8] ss:$0 sm:$0xff] }
 0x18d   :  { %v815_v20 = vrot.slane %v814_v15, 4  ;;  %v807_v24 = vadd.f32 %v806_v13, %v805_v10 }
 0x18e   :  { %v777_v21 = vadd.f32 %v774_v19, %v751_v17 }
 0x18f   :  { %v816_v26 = vadd.f32 %v815_v20, %v814_v15  ;;  %v808_v28 = vrot.slane %v807_v24, 2  ;;  %v3338_v20 = vmov 0.5  }
 0x190   :  { %v803_v25 = vadd.f32 %v800_v22, %v777_v21 }
 0x191   :  { %v817_v31 = vrot.slane %v816_v26, 2  ;;  %v809_v58 = vadd.f32 %v808_v28, %v807_v24  ;;  %v3204_v24 = vld [vmem:[%s4646_s10] ss:$0 sm:$0xff]  ;;  %s3667_s10 = smov 0  }
 0x192   :  { %v804_v27 = vadd.f32 %v3201_v4, %v803_v25 }
 0x193   :  { %v818_v36 = vadd.f32 %v817_v31, %v816_v26  ;;  %v810_v39 = vrot.slane %v809_v58, 1 }
 0x194   :  { %v822_v29 = vsel %vm85_vm1, %v804_v27, 0.0  ;;  %v830_v30 = vmul.f32 %v804_v27, %v804_v27 }
 0x195   :  { %v823_v23 = vrot.slane %v822_v29, 4  ;;  %v819_v43 = vrot.slane %v818_v36, 1  ;;  %v811_v47 = vadd.f32 %v810_v39, %v809_v58 }
 0x196   :  { %v831_v32 = vsel %vm85_vm1, %v830_v30, 0.0 }
 0x197   :  { %v824_v33 = vadd.f32 %v823_v23, %v822_v29  ;;  %v832_v34 = vrot.slane %v831_v32, 4  ;;  %v820_v51 = vadd.f32 %v819_v43, %v818_v36 }
 0x199   :  { %v825_v37 = vrot.slane %v824_v33, 2  ;;  %v833_v38 = vadd.f32 %v832_v34, %v831_v32 }
 0x19b   :  { %v826_v40 = vadd.f32 %v825_v37, %v824_v33  ;;  %v834_v41 = vrot.slane %v833_v38, 2 }
 0x19d   :  { %v827_v44 = vrot.slane %v826_v40, 1  ;;  %v835_v45 = vadd.f32 %v834_v41, %v833_v38 }
 0x19f   :  { %v828_v48 = vadd.f32 %v827_v44, %v826_v40  ;;  %v836_v49 = vrot.slane %v835_v45, 1 }
 0x1a1   :  { %v829_v52 = vadd.f32 %v828_v48, %v811_v47  ;;  %v837_v53 = vadd.f32 %v836_v49, %v835_v45 }
 0x1a3   :  { %v838_v54 = vadd.f32 %v837_v53, %v820_v51  ;;  %v846_v55 = vmul.f32 %v845_v50, %v829_v52 }
 0x1a5   :  { %v847_v56 = vmul.f32 %v845_v50, %v838_v54  ;;  %v848_v59 = vmul.f32 %v846_v55, %v846_v55  ;;  %v874_v4 = vsub.f32 %v804_v27, %v846_v55  ;;  %v861_v5 = vsub.f32 %v3623_v8, %v846_v55 }
 0x1a6   :  { %v982_v8 = vlaneseq }
 0x1a7   :  { %v849_v60 = vsub.f32 %v847_v56, %v848_v59 }
 0x1a8   :  { %v983_v19 = vand.u32 127, %v982_v8 }
 0x1a9   :  { %v850_v61 = vadd.f32 1e-05, %v849_v60 }
 0x1aa   :  { %vm984_vm14 = vcmp.ge.s32.totalorder %v983_v19, 24  ;;  %vm985_vm15 = vcmp.lt.s32.totalorder %v983_v19, 36 }
 0x1ab   :  { %3211 = vrsqrt.f32 %v850_v61  ;;  %vm857_vm12 = vweird.f32 %v850_v61  ;;  %vm986_vm5 = vmand %vm984_vm14, %vm985_vm15 }
 0x1ac   :  { %v3646_v21 = vsel %vm986_vm5, 1.0, %v3338_v20  ;;  %v3648_v22 = vsel %vm986_vm5, 0.0, %v3338_v20 }
 0x1b1   :  { %v3212_v62 = vpop.eup %3211 }
 0x1b2   :  { %v852_v63 = vmul.f32 %v3212_v62, %v850_v61  ;;  %vm858_vm11 = vweird.f32 %v3212_v62 }
 0x1b3   :  { %vm859_vm13 = vmor %vm857_vm12, %vm858_vm11 }
 0x1b4   :  { %v853_v0 = vmul.f32 %v3212_v62, %v852_v63 }
 0x1b6   :  { %v854_v1 = vmul.f32 0.5, %v853_v0 }
 0x1b8   :  { %v855_v2 = vsub.f32 1.5, %v854_v1 }
 0x1ba   :  { %v856_v3 = vmul.f32 %v3212_v62, %v855_v2 }
 0x1bc   :  { %v860_v7 = vsel %vm859_vm13, %v3212_v62, %v856_v3 }
 0x1bd   :  { %v875_v9 = vmul.f32 %v874_v4, %v860_v7  ;;  %v862_v10 = vmul.f32 %v861_v5, %v860_v7 }
 0x1bf   :  { %v867_v12 = vmul.f32 %v3202_v6, %v862_v10  ;;  %v876_v13 = vmul.f32 %v3202_v6, %v875_v9 }
 0x1c1   :  { %v872_v14 = vadd.f32 %v3203_v11, %v867_v12  ;;  %v877_v15 = vadd.f32 %v3203_v11, %v876_v13 }
 0x1c3   :  { %v873_v17 = vmax.f32 %v872_v14, 0.0  ;;  %v878_v18 = vmax.f32 %v877_v15, 0.0 }
 0x1c5   :  { %3016 = vmatmul.msk.f32.vlgmr.msrb.gmra.mxu2 %vm85_vm1, %v873_v17  ;;  %3018 = vmatmul.msk.f32.vlgmr.msrb.gmra.mxu3 %vm85_vm1, %v878_v18  ;;  %vm965_vm1 = vcmask 1040384  }
 0x248   :  { %v907_v25 = vpop.f32.mrf.mxu2  ;;  %v931_v57 = vpop.f32.mrf.mxu3 }
 0x249   :  { %v908_v26 = vadd.f32 %v3204_v24, %v907_v25  ;;  %v932_v27 = vadd.f32 %v3204_v24, %v931_v57 }
 0x24b   :  { %v910_v28 = vmax.f32 %v908_v26, 0.0  ;;  %v934_v29 = vmax.f32 %v932_v27, 0.0 }
 0x24d   :  { %v939_v30 = vrot.slane %v910_v28, 7  ;;  %v951_v16 = vrot.slane %v910_v28, 4  ;;  %v955_v31 = vrot.slane %v910_v28, 3  ;;  %v936_v23 = vrot.slane %v934_v29, 7 }
 0x24e   :  { %v953_v32 = vrot.slane %v934_v29, 3  ;;  %v941_v58 = vrot.slane %v934_v29, 6  ;;  %v943_v34 = vrot.slane %v910_v28, 6  ;;  %v957_v35 = vrot.slane %v934_v29, 2 }
 0x24f   :  { %v966_v33 = vsel %vm965_vm1, %v910_v28, %v936_v23  ;;  %v959_v38 = vrot.slane %v910_v28, 2  ;;  %v945_v39 = vrot.slane %v934_v29, 5  ;;  %v947_v42 = vrot.slane %v910_v28, 5 }
 0x250   :  { %v968_v36 = vsel %vm967_vm6, %v966_v33, %v939_v30  ;;  %v975_v37 = vsel %vm965_vm1, %v951_v16, %v953_v32  ;;  %v961_v43 = vrot.slane %v934_v29, 1  ;;  %v963_v46 = vrot.slane %v910_v28, 1 }
 0x251   :  { %v970_v40 = vsel %vm969_vm7, %v968_v36, %v941_v58  ;;  %v976_v41 = vsel %vm967_vm6, %v975_v37, %v955_v31  ;;  %v949_v47 = vrot.slane %v934_v29, 4 }
 0x252   :  { %v971_v44 = vsel %vm224_vm4, %v970_v40, %v943_v34  ;;  %v977_v45 = vsel %vm969_vm7, %v976_v41, %v957_v35 }
 0x253   :  { %v972_v48 = vsel %vm186_vm3, %v971_v44, %v945_v39  ;;  %v978_v49 = vsel %vm224_vm4, %v977_v45, %v959_v38 }
 0x254   :  { %v973_v50 = vsel %vm90_vm0, %v972_v48, %v947_v42  ;;  %v979_v51 = vsel %vm186_vm3, %v978_v49, %v961_v43 }
 0x255   :  { %v974_v52 = vsel %vm81_vm2, %v973_v50, %v949_v47   ;;  %v980_v53 = vsel %vm90_vm0, %v979_v51, %v963_v46 }
 0x256   :  { %v981_v54 = vsel %vm81_vm2, %v980_v53, %v934_v29  }
 0x257 LB: > { %s3019_s2 = sshll.u32 %s3334_s10, 4  ;;  %s4660_s12 = sld [smem:[#allocation6_spill]]  ;;  %vm1007_vm2 = vcmask 97280   ;;  %v3339_v61 = vmov 0.0   ;;  %vm1459_vm3 = vcmask 97286   ;;  %s3334_s10 = sphi %s3667_s10, %s994_s10   ;;  %v3330_v52 = vphi %v974_v52, %v1470_v52   ;;  %v3326_v54 = vphi %v981_v54, %v1472_v54  }
 0x258   : > { %s4661_s28 = sld [smem:[#allocation4_spill]]  ;;  %s3340_s30 = smov 104  }
 0x259   : > { %s4662_s14 = sld [smem:[#allocation5_spill]]  ;;  %s3341_s5 = smov 12  }
 0x25a   : > { %s3342_s6 = smov 24   ;;  %s3343_s4 = smov 92  }
 0x25b   : > { %s3038_s24 = sshll.u32 %s3334_s10, 1 }
 0x25c   : > { %s1458_s9 = scalar_lea.vmem [#allocation2], %s3038_s24 }
 0x25d   : > { %s1004_s16 = scalar_lea.vmem %s4660_s12, %s3334_s10  ;;  %s994_s10 = sadd.s32 1, %s3334_s10  }
 0x25e   : > { %s998_s29 = scalar_lea.vmem %s4661_s28, %s3019_s2  ;;  %v3697_v62 = vld [vmem:[%s1004_s16] ss:$0 sm:$0xff]  ;;  %p991_p0 = scmp.ge.s32.totalorder %s994_s10, 120  }
 0x25f   : > { %s1001_s3 = scalar_lea.vmem %s4662_s14, %s3019_s2  ;;  %v1000_v55 = vld [vmem:[%s998_s29 + $0x8] sm:$0xf]  ;;  %v999_v60 = vld [vmem:[%s998_s29] sm:$0xff]  ;;  %s4663_s15 = sld [smem:[#allocation7_spill]] (%p991_p0)  ;;  %vm2902_vm8 = vcmask (%p991_p0), 392192  }
 0x260   : > { %v1002_v56 = vld [vmem:[%s1001_s3] sm:$0xff]  ;;  %v1003_v59 = vld [vmem:[%s1001_s3 + $0x8] sm:$0xf]  ;;  %3020 = vmatpush.msk.msra.mxu0 %vm224_vm4, %v1000_v55  ;;  %s4664_s11 = sld [smem:[#allocation9_spill]] (%p991_p0)  ;;  %s3346_s7 = smov (%p991_p0), 36  }
 0x261   : > { %3023 = vmatpush.msk.msra.mxu1 %vm224_vm4, %v1003_v59  ;;  %3024 = vmatpush.msk.msra.mxu2 %vm224_vm4, %v1003_v59  ;;  %s4665_s17 = sld [smem:[#allocation8_spill]] (%p991_p0) }
 0x262   : > { %3026 = vmatpush.msk.msra.mxu3 %vm224_vm4, %v1003_v59  ;;  %1032 = vmatpush.msra.mxu0 %v999_v60 }
 0x263   : > { %1061 = vmatpush.msra.mxu1 %v1002_v56  ;;  %3021 = vmatmul.msk.f32.vlgmr.msra.gmra.mxu0 %vm1007_vm2, %v3330_v52 }
 0x264   : > { %1062 = vmatmul.f32.vlgmr.msra.gmra.mxu1 %v3339_v61  ;;  %1107 = vmatpush.msra.mxu2 %v1002_v56 }
 0x265   : > { %1160 = vmatpush.msra.mxu3 %v1002_v56  ;;  %3028 = vmatpush.msk.msrb.mxu1 %vm224_vm4, %v1003_v59 }
 0x266   : > { %3030 = vmatpush.msk.msrb.mxu2 %vm224_vm4, %v1003_v59  ;;  %3034 = vmatpush.msk.msrb.mxu0 %vm224_vm4, %v1003_v59 }
 0x267   : > { %3032 = vmatpush.msk.msrb.mxu3 %vm224_vm4, %v1003_v59  ;;  %1213 = vmatpush.msrb.mxu1 %v1002_v56 }
 0x268   : > { %1266 = vmatpush.msrb.mxu2 %v1002_v56  ;;  %1368 = vmatpush.msrb.mxu0 %v1002_v56 }
 0x269   : > { %1315 = vmatpush.msrb.mxu3 %v1002_v56  ;;  %3036 = vmatpush.msk.msra.mxu1 %vm224_vm4, %v1003_v59 }
 0x26b   : > { %1421 = vmatpush.msra.mxu1 %v1002_v56  ;;  %3022 = vmatmul.msk.f32.gmra.mxu0 %vm1007_vm2, %v3326_v54 }
 0x2e0   : > { %v1034_v63 = vpop.f32.mrf.mxu0 }
 0x2e1   : > { %v1063_v0 = vpop.f32.mrf.mxu1  ;;  %v3700_v1 = vadd.f32 %v3697_v62, %v1034_v63 }
 0x2e3   : > { %v1066_v2 = vadd.f32 %v1063_v0, %v3700_v1 }
 0x2e5   : > { %3214 = vtanh.f32 %v1066_v2 }
 0x2eb   : > { %v3215_v3 = vpop.eup %3214 }
 0x2ec   : > { %v1068_v4 = vmul.f32 %v3215_v3, %v3646_v21 }
 0x2ee   : > { %v1069_v5 = vadd.f32 %v1068_v4, %v3648_v22 }
 0x2f0   : > { %1072 = vrot.lane.b32.xlu0 %v1069_v5, %s3340_s30  ;;  %v1070_v9 = vmul.f32 0.0, %v1069_v5 }
 0x362   : > { %v1073_v6 = vpop.permute.xlu0 %1072 }
 0x363   : > { %v1075_v7 = vmul.f32 %v1073_v6, %v1069_v5 }
 0x365   : > { %1077 = vrot.lane.b32.xlu0 %v1075_v7, %s3341_s5 }
 0x3d7   : > { %v1078_v10 = vpop.permute.xlu0 %1077 }
 0x3d8   : > { %v1080_v11 = vadd.f32 %v1078_v10, %v1070_v9  ;;  %v1037_v10 = vpop.f32.mrf.mxu0 }
 0x3da   : > { %3216 = vtanh.f32 %v1080_v11  ;;  %v1120_v26 = vrot.slane %v1080_v11, 6  ;;  %v3742_v11 = vadd.f32 %v3697_v62, %v1037_v10 }
 0x3e0   : > { %v3217_v12 = vpop.eup %3216 }
 0x3e1   : > { %1083 = vrot.lane.b32.xlu1 %v3217_v12, %s3342_s6 }
 0x453   : > { %v1084_v13 = vpop.permute.xlu1 %1083 }
 0x454   : > { %v1086_v14 = vmul.f32 %v1084_v13, %v1069_v5 }
 0x456   : > { %1088 = vrot.lane.b32.xlu1 %v1086_v14, %s3343_s4 }
 0x4c8   : > { %v1089_v15 = vpop.permute.xlu1 %1088 }
 0x4c9   : > { %3025 = vmatmul.msk.f32.vlgmr.msra.gmra.mxu2 %vm1007_vm2, %v1089_v15 }
 0x54c   : > { %v1109_v17 = vpop.f32.mrf.mxu2 }
 0x54d   : > { %v1113_v18 = vrot.slane %v1109_v17, 6 }
 0x54f   : > { %v1115_v8 = vadd.f32 %v1113_v18, %v3700_v1 }
 0x551   : > { %3218 = vtanh.f32 %v1115_v8 }
 0x557   : > { %v3219_v19 = vpop.eup %3218 }
 0x558   : > { %v1117_v20 = vmul.f32 %v3219_v19, %v3646_v21 }
 0x55a   : > { %v1118_v24 = vadd.f32 %v1117_v20, %v3648_v22 }
 0x55c   : > { %1124 = vrot.lane.b32.xlu2 %v1118_v24, %s3340_s30  ;;  %v1122_v27 = vmul.f32 %v1120_v26, %v1118_v24 }
 0x5b6   : > { %v1125_v25 = vpop.permute.xlu2 %1124 }
 0x5b7   : > { %v1127_v57 = vmul.f32 %v1125_v25, %v1118_v24 }
 0x5b9   : > { %1129 = vrot.lane.b32.xlu2 %v1127_v57, %s3341_s5 }
 0x613   : > { %v1130_v28 = vpop.permute.xlu2 %1129 }
 0x614   : > { %v1132_v29 = vadd.f32 %v1130_v28, %v1122_v27 }
 0x616   : > { %3220 = vtanh.f32 %v1132_v29  ;;  %v1173_v40 = vrot.slane %v1132_v29, 6 }
 0x61c   : > { %v3221_v30 = vpop.eup %3220 }
 0x61d   : > { %1135 = vrot.lane.b32.xlu0 %v3221_v30, %s3342_s6 }
 0x68f   : > { %v1136_v16 = vpop.permute.xlu0 %1135 }
 0x690   : > { %v1138_v31 = vmul.f32 %v1136_v16, %v1118_v24 }
 0x692   : > { %v1140_v23 = vrot.slane %v1138_v31, 2  ;;  %v1461_v47 = vsel %vm967_vm6, %v1086_v14, %v1138_v31 }
 0x694   : > { %1141 = vrot.lane.b32.xlu1 %v1140_v23, %s3343_s4 }
 0x706   : > { %v1142_v32 = vpop.permute.xlu1 %1141 }
 0x707   : > { %3027 = vmatmul.msk.f32.vlgmr.msra.gmra.mxu3 %vm1007_vm2, %v1142_v32 }
 0x78a   : > { %v1162_v58 = vpop.f32.mrf.mxu3 }
 0x78b   : > { %v1166_v33 = vrot.slane %v1162_v58, 4 }
 0x78d   : > { %v1168_v34 = vadd.f32 %v1166_v33, %v3700_v1 }
 0x78f   : > { %3222 = vtanh.f32 %v1168_v34 }
 0x795   : > { %v3223_v35 = vpop.eup %3222 }
 0x796   : > { %v1170_v36 = vmul.f32 %v3223_v35, %v3646_v21 }
 0x798   : > { %v1171_v37 = vadd.f32 %v1170_v36, %v3648_v22 }
 0x79a   : > { %1177 = vrot.lane.b32.xlu2 %v1171_v37, %s3340_s30  ;;  %v1175_v41 = vmul.f32 %v1173_v40, %v1171_v37 }
 0x7f4   : > { %v1178_v38 = vpop.permute.xlu2 %1177 }
 0x7f5   : > { %v1180_v39 = vmul.f32 %v1178_v38, %v1171_v37 }
 0x7f7   : > { %1182 = vrot.lane.b32.xlu0 %v1180_v39, %s3341_s5 }
 0x869   : > { %v1183_v42 = vpop.permute.xlu0 %1182 }
 0x86a   : > { %v1185_v43 = vadd.f32 %v1183_v42, %v1175_v41 }
 0x86c   : > { %3224 = vtanh.f32 %v1185_v43  ;;  %v1226_v63 = vrot.slane %v1185_v43, 6 }
 0x872   : > { %v3225_v44 = vpop.eup %3224 }
 0x873   : > { %1188 = vrot.lane.b32.xlu1 %v3225_v44, %s3342_s6 }
 0x8e5   : > { %v1189_v45 = vpop.permute.xlu1 %1188 }
 0x8e6   : > { %v1191_v46 = vmul.f32 %v1189_v45, %v1171_v37 }
 0x8e8   : > { %v1193_v48 = vrot.slane %v1191_v46, 4  ;;  %v1462_v49 = vsel %vm224_vm4, %v1461_v47, %v1191_v46 }
 0x8ea   : > { %1194 = vrot.lane.b32.xlu2 %v1193_v48, %s3343_s4 }
 0x944   : > { %v1195_v50 = vpop.permute.xlu2 %1194 }
 0x945   : > { %3029 = vmatmul.msk.f32.vlgmr.msrb.gmra.mxu1 %vm1007_vm2, %v1195_v50 }
 0x9c2   : > { %v1215_v51 = vpop.f32.mrf.mxu1 }
 0x9c3   : > { %v1219_v52 = vrot.slane %v1215_v51, 2 }
 0x9c5   : > { %v1221_v53 = vadd.f32 %v1219_v52, %v3700_v1 }
 0x9c7   : > { %3226 = vtanh.f32 %v1221_v53 }
 0x9cd   : > { %v3227_v55 = vpop.eup %3226 }
 0x9ce   : > { %v1223_v56 = vmul.f32 %v3227_v55, %v3646_v21 }
 0x9d0   : > { %v1224_v59 = vadd.f32 %v1223_v56, %v3648_v22 }
 0x9d2   : > { %1230 = vrot.lane.b32.xlu0 %v1224_v59, %s3340_s30  ;;  %v1228_v0 = vmul.f32 %v1226_v63, %v1224_v59 }
 0xa44   : > { %v1231_v60 = vpop.permute.xlu0 %1230 }
 0xa45   : > { %v1233_v61 = vmul.f32 %v1231_v60, %v1224_v59 }
 0xa47   : > { %1235 = vrot.lane.b32.xlu1 %v1233_v61, %s3341_s5 }
 0xab9   : > { %v1236_v2 = vpop.permute.xlu1 %1235 }
 0xaba   : > { %v1238_v3 = vadd.f32 %v1236_v2, %v1228_v0 }
 0xabc   : > { %3228 = vtanh.f32 %v1238_v3  ;;  %v1276_v8 = vrot.slane %v1238_v3, 6 }
 0xac2   : > { %v3229_v4 = vpop.eup %3228 }
 0xac3   : > { %1241 = vrot.lane.b32.xlu2 %v3229_v4, %s3342_s6 }
 0xb1d   : > { %v1242_v1 = vpop.permute.xlu2 %1241 }
 0xb1e   : > { %v1244_v5 = vmul.f32 %v1242_v1, %v1224_v59 }
 0xb20   : > { %v1246_v6 = vrot.slane %v1244_v5, 6  ;;  %v3735_v7 = vsel %vm90_vm0, %v1462_v49, %v1244_v5 }
 0xb22   : > { %1247 = vrot.lane.b32.xlu0 %v1246_v6, %s3343_s4 }
 0xb94   : > { %v1248_v9 = vpop.permute.xlu0 %1247 }
 0xb95   : > { %3031 = vmatmul.msk.f32.vlgmr.msrb.gmra.mxu2 %vm1007_vm2, %v1248_v9 }
 0xc18   : > { %v1268_v12 = vpop.f32.mrf.mxu2 }
 0xc19   : > { %v1271_v13 = vadd.f32 %v1268_v12, %v3742_v11 }
 0xc1b   : > { %3230 = vtanh.f32 %v1271_v13 }
 0xc21   : > { %v3231_v14 = vpop.eup %3230 }
 0xc22   : > { %v1273_v15 = vmul.f32 %v3231_v14, %v3646_v21 }
 0xc24   : > { %v1274_v17 = vadd.f32 %v1273_v15, %v3648_v22 }
 0xc26   : > { %1280 = vrot.lane.b32.xlu1 %v1274_v17, %s3340_s30  ;;  %v1278_v19 = vmul.f32 %v1276_v8, %v1274_v17  ;;  %v1506_v8 = vld [vmem:[%s4663_s15 + $0x8] sm:$0xf] (%p991_p0) }
 0xc27   :  { %3039 = vmatpush.msk.msra.mxu0 (%p991_p0), %vm224_vm4, %v1506_v8 }
 0xc98   : > { %v1281_v18 = vpop.permute.xlu1 %1280 }
 0xc99   : > { %v1283_v54 = vmul.f32 %v1281_v18, %v1274_v17 }
 0xc9b   : > { %1285 = vrot.lane.b32.xlu2 %v1283_v54, %s3341_s5 }
 0xcf5   : > { %v1286_v20 = vpop.permute.xlu2 %1285 }
 0xcf6   : > { %v1288_v62 = vadd.f32 %v1286_v20, %v1278_v19  ;;  %v1505_v19 = vld [vmem:[%s4663_s15] sm:$0xff] (%p991_p0)  ;;  %s3345_s15 = smov (%p991_p0), 24  }
 0xcf7   :  { %1620 = vmatpush.msra.mxu0 (%p991_p0), %v1505_v19 }
 0xcf8   : > { %3232 = vtanh.f32 %v1288_v62  ;;  %v1328_v58 = vrot.slane %v1288_v62, 6 }
 0xcfe   : > { %v3233_v24 = vpop.eup %3232 }
 0xcff   : > { %1291 = vrot.lane.b32.xlu0 %v3233_v24, %s3342_s6 }
 0xd71   : > { %v1292_v25 = vpop.permute.xlu0 %1291 }
 0xd72   : > { %v1294_v57 = vmul.f32 %v1292_v25, %v1274_v17 }
 0xd74   : > { %1296 = vrot.lane.b32.xlu1 %v1294_v57, %s3343_s4 }
 0xde6   : > { %v1297_v26 = vpop.permute.xlu1 %1296 }
 0xde7   : > { %3033 = vmatmul.msk.f32.vlgmr.msrb.gmra.mxu3 %vm1007_vm2, %v1297_v26 }
 0xe6a   : > { %v1317_v27 = vpop.f32.mrf.mxu3 }
 0xe6b   : > { %v1321_v28 = vrot.slane %v1317_v27, 6 }
 0xe6d   : > { %v1323_v29 = vadd.f32 %v1321_v28, %v3742_v11 }
 0xe6f   : > { %3234 = vtanh.f32 %v1323_v29 }
 0xe75   : > { %v3235_v30 = vpop.eup %3234 }
 0xe76   : > { %v1325_v16 = vmul.f32 %v3235_v30, %v3646_v21 }
 0xe78   : > { %v1326_v31 = vadd.f32 %v1325_v16, %v3648_v22  ;;  %v1743_v16 = vld [vmem:[%s4664_s11 + $0x8] sm:$0xf] (%p991_p0) }
 0xe7a   : > { %1332 = vrot.lane.b32.xlu2 %v1326_v31, %s3340_s30  ;;  %v1330_v33 = vmul.f32 %v1328_v58, %v1326_v31 }
 0xed4   : > { %v1333_v23 = vpop.permute.xlu2 %1332 }
 0xed5   : > { %v1335_v32 = vmul.f32 %v1333_v23, %v1326_v31 }
 0xed7   : > { %1337 = vrot.lane.b32.xlu0 %v1335_v32, %s3341_s5 }
 0xf49   : > { %v1338_v34 = vpop.permute.xlu0 %1337 }
 0xf4a   : > { %v1340_v35 = vadd.f32 %v1338_v34, %v1330_v33  ;;  %v3822_v33 = vld [vmem:[%s4665_s17] ss:$0 sm:$0xff] (%p991_p0) }
 0xf4c   : > { %3236 = vtanh.f32 %v1340_v35  ;;  %v1381_v49 = vrot.slane %v1340_v35, 6 }
 0xf52   : > { %v3237_v36 = vpop.eup %3236 }
 0xf53   : > { %1343 = vrot.lane.b32.xlu1 %v3237_v36, %s3342_s6 }
 0xfc5   : > { %v1344_v37 = vpop.permute.xlu1 %1343 }
 0xfc6   : > { %v1346_v38 = vmul.f32 %v1344_v37, %v1326_v31  ;;  %v1742_v31 = vld [vmem:[%s4664_s11] sm:$0xff] (%p991_p0) }
 0xfc8   : > { %v1348_v39 = vrot.slane %v1346_v38, 2  ;;  %v1464_v59 = vsel %vm967_vm6, %v1294_v57, %v1346_v38 }
 0xfca   : > { %1349 = vrot.lane.b32.xlu2 %v1348_v39, %s3343_s4 }
0x1024   : > { %v1350_v40 = vpop.permute.xlu2 %1349 }
0x1025   : > { %3035 = vmatmul.msk.f32.vlgmr.msrb.gmra.mxu0 %vm1007_vm2, %v1350_v40 }
0x10a2   : > { %v1370_v41 = vpop.f32.mrf.mxu0 }
0x10a3   : > { %v1374_v42 = vrot.slane %v1370_v41, 4 }
0x10a5   : > { %v1376_v43 = vadd.f32 %v1374_v42, %v3742_v11 }
0x10a7   : > { %3238 = vtanh.f32 %v1376_v43 }
0x10ad   : > { %v3239_v44 = vpop.eup %3238 }
0x10ae   : > { %v1378_v45 = vmul.f32 %v3239_v44, %v3646_v21 }
0x10b0   : > { %v1379_v46 = vadd.f32 %v1378_v45, %v3648_v22 }
0x10b2   : > { %1385 = vrot.lane.b32.xlu0 %v1379_v46, %s3340_s30  ;;  %v1383_v50 = vmul.f32 %v1381_v49, %v1379_v46 }
0x1124   : > { %v1386_v47 = vpop.permute.xlu0 %1385 }
0x1125   : > { %v1388_v48 = vmul.f32 %v1386_v47, %v1379_v46 }
0x1127   : > { %1390 = vrot.lane.b32.xlu1 %v1388_v48, %s3341_s5 }
0x1199   : > { %v1391_v51 = vpop.permute.xlu1 %1390 }
0x119a   : > { %v1393_v52 = vadd.f32 %v1391_v51, %v1383_v50 }
0x119c   : > { %3240 = vtanh.f32 %v1393_v52  ;;  %v1434_v10 = vrot.slane %v1393_v52, 6 }
0x11a2   : > { %v3241_v53 = vpop.eup %3240 }
0x11a3   : > { %1396 = vrot.lane.b32.xlu2 %v3241_v53, %s3342_s6 }
0x11fd   : > { %v1397_v55 = vpop.permute.xlu2 %1396 }
0x11fe   : > { %v1399_v56 = vmul.f32 %v1397_v55, %v1379_v46 }
0x1200   : > { %v1401_v60 = vrot.slane %v1399_v56, 4  ;;  %v1465_v61 = vsel %vm224_vm4, %v1464_v59, %v1399_v56 }
0x1202   : > { %1402 = vrot.lane.b32.xlu0 %v1401_v60, %s3343_s4 }
0x1274   : > { %v1403_v63 = vpop.permute.xlu0 %1402 }
0x1275   : > { %3037 = vmatmul.msk.f32.vlgmr.msra.gmra.mxu1 %vm1007_vm2, %v1403_v63 }
0x1276   :  { %3070 = vmatpush.msk.msra.mxu1 (%p991_p0), %vm224_vm4, %v1743_v16 }
0x1278   :  { %1856 = vmatpush.msra.mxu1 (%p991_p0), %v1742_v31 }
0x12f2   : > { %v1423_v0 = vpop.f32.mrf.mxu1 }
0x12f3   : > { %v1427_v2 = vrot.slane %v1423_v0, 2 }
0x12f5   : > { %v1429_v3 = vadd.f32 %v1427_v2, %v3742_v11 }
0x12f7   : > { %3242 = vtanh.f32 %v1429_v3 }
0x12fd   : > { %v3243_v4 = vpop.eup %3242 }
0x12fe   : > { %v1431_v1 = vmul.f32 %v3243_v4, %v3646_v21 }
0x1300   : > { %v1432_v5 = vadd.f32 %v1431_v1, %v3648_v22 }
0x1302   : > { %1438 = vrot.lane.b32.xlu1 %v1432_v5, %s3340_s30  ;;  %v1436_v12 = vmul.f32 %v1434_v10, %v1432_v5 }
0x1374   : > { %v1439_v6 = vpop.permute.xlu1 %1438 }
0x1375   : > { %v1441_v9 = vmul.f32 %v1439_v6, %v1432_v5 }
0x1377   : > { %1443 = vrot.lane.b32.xlu2 %v1441_v9, %s3341_s5 }
0x137f   : > { %1469 = vrot.lane.b32.xlu2 %v3735_v7, %s3343_s4 }
0x13d1   : > { %v1444_v13 = vpop.permute.xlu2 %1443 }
0x13d2   : > { %v1446_v11 = vadd.f32 %v1444_v13, %v1436_v12 }
0x13d4   : > { %3244 = vtanh.f32 %v1446_v11 }
0x13d9   : > { %v1470_v52 = vpop.permute.xlu2 %1469  }
0x13da   : > { %v3245_v14 = vpop.eup %3244 }
0x13db   : > { %1449 = vrot.lane.b32.xlu0 %v3245_v14, %s3342_s6  ;;  %s4666_s6 = sld [smem:[#allocation10_spill]] (%p991_p0) }
0x144d   : > { %v1450_v15 = vpop.permute.xlu0 %1449 }
0x144e   : > { %v1452_v17 = vmul.f32 %v1450_v15, %v1432_v5 }
0x1450   : > { %1455 = vrot.lane.b32.xlu1 %v1452_v17, %s3343_s4  ;;  %v1466_v18 = vsel %vm90_vm0, %v1465_v61, %v1452_v17  ;;  %vm2840_vm0 = vcmask (%p991_p0), 195584  }
0x1451   : > { %1471 = vrot.lane.b32.xlu0 %v1466_v18, %s3343_s4  ;;  %s3344_s4 = smov (%p991_p0), 12  }
0x14bf   :  { %993 = sbr.rel (!%p991_p0) target bundleno = 599 (0x257), region = 132 }
0x14c2   : > { %v1456_v7 = vpop.permute.xlu1 %1455 }
0x14c3   : > { %1460 = vst.msk [vmem:[%s1458_s9 - $0x6] sm:$0xc0] %vm1459_vm3, %v1456_v7  ;;  %v1472_v54 = vpop.permute.xlu0 %1471  }
0x14ca   :  { %v1475_v20 = vld [vmem:[#allocation2] sm:$0xff]  ;;  %v1476_v62 = vld [vmem:[#allocation2 + $0x8] sm:$0xff]  ;;  %v1477_v24 = vld [vmem:[#allocation2 + $0x10] sm:$0xff] }
0x14cb   :  { %3040 = vmatmul.msk.f32.vlgmr.msra.gmra.mxu0 %vm1007_vm2, %v1475_v20  ;;  %v1478_v21 = vld [vmem:[#allocation2 + $0x18] sm:$0xff]  ;;  %v1479_v22 = vld [vmem:[#allocation2 + $0x20] sm:$0xff]  ;;  %v1480_v54 = vld [vmem:[#allocation2 + $0x28] sm:$0xff] }
0x14cc   :  { %v1481_v25 = vld [vmem:[#allocation2 + $0x30] sm:$0xff]  ;;  %v1482_v57 = vld [vmem:[#allocation2 + $0x38] sm:$0xff]  ;;  %v1483_v26 = vld [vmem:[#allocation2 + $0x40] sm:$0xff] }
0x14cd   :  { %v1484_v27 = vld [vmem:[#allocation2 + $0x48] sm:$0xff]  ;;  %v1485_v28 = vld [vmem:[#allocation2 + $0x50] sm:$0xff]  ;;  %v1486_v29 = vld [vmem:[#allocation2 + $0x58] sm:$0xff] }
0x14ce   :  { %v1487_v30 = vld [vmem:[#allocation2 + $0x60] sm:$0xff]  ;;  %v1488_v23 = vld [vmem:[#allocation2 + $0x68] sm:$0xff]  ;;  %v1489_v32 = vld [vmem:[#allocation2 + $0x70] sm:$0xff] }
0x14cf   :  { %v1490_v58 = vld [vmem:[#allocation2 + $0x78] sm:$0xff]  ;;  %v1491_v35 = vld [vmem:[#allocation2 + $0x80] sm:$0xff]  ;;  %v1492_v39 = vld [vmem:[#allocation2 + $0x88] sm:$0xff] }
0x14d0   :  { %v1493_v43 = vld [vmem:[#allocation2 + $0x90] sm:$0xff]  ;;  %v1494_v47 = vld [vmem:[#allocation2 + $0x98] sm:$0xff]  ;;  %v1495_v51 = vld [vmem:[#allocation2 + $0xa0] sm:$0xff] }
0x14d1   :  { %v1496_v56 = vld [vmem:[#allocation2 + $0xa8] sm:$0xff]  ;;  %v1497_v63 = vld [vmem:[#allocation2 + $0xb0] sm:$0xff]  ;;  %v1498_v4 = vld [vmem:[#allocation2 + $0xb8] sm:$0xff] }
0x14d2   :  { %v1499_v9 = vld [vmem:[#allocation2 + $0xc0] sm:$0xff]  ;;  %v1500_v11 = vld [vmem:[#allocation2 + $0xc8] sm:$0xff]  ;;  %v1501_v18 = vld [vmem:[#allocation2 + $0xd0] sm:$0xff] }
0x14d3   :  { %3041 = vmatmul.msk.f32.gmra.mxu0 %vm1007_vm2, %v1476_v62  ;;  %v1502_v20 = vld [vmem:[#allocation2 + $0xd8] sm:$0xff] }
0x14db   :  { %3042 = vmatmul.msk.f32.gmra.mxu0 %vm1007_vm2, %v1477_v24 }
0x14e3   :  { %3043 = vmatmul.msk.f32.gmra.mxu0 %vm1007_vm2, %v1478_v21 }
0x14eb   :  { %3044 = vmatmul.msk.f32.gmra.mxu0 %vm1007_vm2, %v1479_v22  ;;  %v1503_v22 = vld [vmem:[#allocation2 + $0xe0] sm:$0xff] }
0x14f3   :  { %3045 = vmatmul.msk.f32.gmra.mxu0 %vm1007_vm2, %v1480_v54 }
0x14fb   :  { %3046 = vmatmul.msk.f32.gmra.mxu0 %vm1007_vm2, %v1481_v25 }
0x1503   :  { %3047 = vmatmul.msk.f32.gmra.mxu0 %vm1007_vm2, %v1482_v57  ;;  %v1979_v57 = vld [vmem:[%s4632_s18 + $0x8] sm:$0xf] }
0x1504   :  { %3101 = vmatpush.msk.msra.mxu2 %vm224_vm4, %v1979_v57 }
0x150b   :  { %3048 = vmatmul.msk.f32.gmra.mxu0 %vm1007_vm2, %v1483_v26  ;;  %v2185_v26 = vld [vmem:[%s4634_s20 + $0x8] sm:$0xf] }
0x150c   :  { %3132 = vmatpush.msk.msra.mxu3 %vm224_vm4, %v2185_v26  ;;  %vm2871_vm4 = vcmask 293888  }
0x1513   :  { %3049 = vmatmul.msk.f32.gmra.mxu0 %vm1007_vm2, %v1484_v27  ;;  %v1978_v27 = vld [vmem:[%s4632_s18] sm:$0xff] }
0x1514   :  { %2092 = vmatpush.msra.mxu2 %v1978_v27 }
0x151b   :  { %3050 = vmatmul.msk.f32.gmra.mxu0 %vm1007_vm2, %v1485_v28  ;;  %v2184_v28 = vld [vmem:[%s4634_s20] sm:$0xff] }
0x151c   :  { %2208 = vmatpush.msra.mxu3 %v2184_v28 }
0x1523   :  { %3051 = vmatmul.msk.f32.gmra.mxu0 %vm1007_vm2, %v1486_v29 }
0x152b   :  { %3052 = vmatmul.msk.f32.gmra.mxu0 %vm1007_vm2, %v1487_v30  ;;  %v1504_v30 = vld [vmem:[#allocation2 + $0xe8] sm:$0xff] }
0x1533   :  { %3053 = vmatmul.msk.f32.gmra.mxu0 %vm1007_vm2, %v1488_v23 }
0x153b   :  { %3054 = vmatmul.msk.f32.gmra.mxu0 %vm1007_vm2, %v1489_v32 }
0x1543   :  { %3055 = vmatmul.msk.f32.gmra.mxu0 %vm1007_vm2, %v1490_v58 }
0x1548   :  { %v1622_v34 = vpop.f32.mrf.mxu0 }
0x1549   :  { %v1623_v36 = vadd.f32 %v3822_v33, %v1622_v34 }
0x154b   :  { %3056 = vmatmul.msk.f32.gmra.mxu0 %vm1007_vm2, %v1491_v35  ;;  %v1712_v37 = vmax.f32 %v1623_v36, 0.0 }
0x154d   :  { %3071 = vmatmul.msk.f32.vlgmr.msra.gmra.mxu1 %vm1007_vm2, %v1712_v37  ;;  %v3887_v37 = vld [vmem:[%s4666_s6] ss:$0 sm:$0xff] }
0x1550   :  { %v1625_v38 = vpop.f32.mrf.mxu0 }
0x1551   :  { %v1626_v40 = vadd.f32 %v3822_v33, %v1625_v38 }
0x1553   :  { %3057 = vmatmul.msk.f32.gmra.mxu0 %vm1007_vm2, %v1492_v39  ;;  %v1713_v41 = vmax.f32 %v1626_v40, 0.0 }
0x1555   :  { %3072 = vmatmul.msk.f32.gmra.mxu1 %vm1007_vm2, %v1713_v41 }
0x1558   :  { %v1628_v42 = vpop.f32.mrf.mxu0 }
0x1559   :  { %v1629_v44 = vadd.f32 %v3822_v33, %v1628_v42 }
0x155b   :  { %3058 = vmatmul.msk.f32.gmra.mxu0 %vm1007_vm2, %v1493_v43  ;;  %v1714_v45 = vmax.f32 %v1629_v44, 0.0 }
0x155d   :  { %3073 = vmatmul.msk.f32.gmra.mxu1 %vm1007_vm2, %v1714_v45 }
0x1560   :  { %v1631_v46 = vpop.f32.mrf.mxu0 }
0x1561   :  { %v1632_v48 = vadd.f32 %v3822_v33, %v1631_v46 }
0x1563   :  { %3059 = vmatmul.msk.f32.gmra.mxu0 %vm1007_vm2, %v1494_v47  ;;  %v1715_v49 = vmax.f32 %v1632_v48, 0.0 }
0x1565   :  { %3074 = vmatmul.msk.f32.gmra.mxu1 %vm1007_vm2, %v1715_v49 }
0x1568   :  { %v1634_v50 = vpop.f32.mrf.mxu0 }
0x1569   :  { %v1635_v52 = vadd.f32 %v3822_v33, %v1634_v50 }
0x156b   :  { %3060 = vmatmul.msk.f32.gmra.mxu0 %vm1007_vm2, %v1495_v51  ;;  %v1716_v53 = vmax.f32 %v1635_v52, 0.0 }
0x156d   :  { %3075 = vmatmul.msk.f32.gmra.mxu1 %vm1007_vm2, %v1716_v53 }
0x1570   :  { %v1637_v55 = vpop.f32.mrf.mxu0 }
0x1571   :  { %v1638_v59 = vadd.f32 %v3822_v33, %v1637_v55 }
0x1573   :  { %3061 = vmatmul.msk.f32.gmra.mxu0 %vm1007_vm2, %v1496_v56  ;;  %v1717_v60 = vmax.f32 %v1638_v59, 0.0 }
0x1575   :  { %3076 = vmatmul.msk.f32.gmra.mxu1 %vm1007_vm2, %v1717_v60 }
0x1578   :  { %v1640_v61 = vpop.f32.mrf.mxu0 }
0x1579   :  { %v1641_v0 = vadd.f32 %v3822_v33, %v1640_v61 }
0x157b   :  { %v1718_v2 = vmax.f32 %v1641_v0, 0.0  ;;  %3062 = vmatmul.msk.f32.gmra.mxu0 %vm1007_vm2, %v1497_v63 }
0x157d   :  { %3077 = vmatmul.msk.f32.gmra.mxu1 %vm1007_vm2, %v1718_v2 }
0x1580   :  { %v1643_v3 = vpop.f32.mrf.mxu0 }
0x1581   :  { %v1644_v1 = vadd.f32 %v3822_v33, %v1643_v3 }
0x1583   :  { %v1719_v5 = vmax.f32 %v1644_v1, 0.0  ;;  %3063 = vmatmul.msk.f32.gmra.mxu0 %vm1007_vm2, %v1498_v4 }
0x1585   :  { %3078 = vmatmul.msk.f32.gmra.mxu1 %vm1007_vm2, %v1719_v5 }
0x1588   :  { %v1646_v6 = vpop.f32.mrf.mxu0 }
0x1589   :  { %v1647_v10 = vadd.f32 %v3822_v33, %v1646_v6 }
0x158b   :  { %v1720_v12 = vmax.f32 %v1647_v10, 0.0  ;;  %3064 = vmatmul.msk.f32.gmra.mxu0 %vm1007_vm2, %v1499_v9 }
0x158d   :  { %3079 = vmatmul.msk.f32.gmra.mxu1 %vm1007_vm2, %v1720_v12 }
0x1590   :  { %v1649_v13 = vpop.f32.mrf.mxu0 }
0x1591   :  { %v1650_v14 = vadd.f32 %v3822_v33, %v1649_v13 }
0x1593   :  { %v1721_v15 = vmax.f32 %v1650_v14, 0.0  ;;  %3065 = vmatmul.msk.f32.gmra.mxu0 %vm1007_vm2, %v1500_v11 }
0x1595   :  { %3080 = vmatmul.msk.f32.gmra.mxu1 %vm1007_vm2, %v1721_v15 }
0x1598   :  { %v1652_v17 = vpop.f32.mrf.mxu0 }
0x1599   :  { %v1653_v7 = vadd.f32 %v3822_v33, %v1652_v17 }
0x159b   :  { %v1722_v8 = vmax.f32 %v1653_v7, 0.0  ;;  %3066 = vmatmul.msk.f32.gmra.mxu0 %vm1007_vm2, %v1501_v18 }
0x159d   :  { %3081 = vmatmul.msk.f32.gmra.mxu1 %vm1007_vm2, %v1722_v8 }
0x15a0   :  { %v1655_v19 = vpop.f32.mrf.mxu0 }
0x15a1   :  { %v1656_v62 = vadd.f32 %v3822_v33, %v1655_v19 }
0x15a3   :  { %v1723_v24 = vmax.f32 %v1656_v62, 0.0  ;;  %3067 = vmatmul.msk.f32.gmra.mxu0 %vm1007_vm2, %v1502_v20 }
0x15a5   :  { %3082 = vmatmul.msk.f32.gmra.mxu1 %vm1007_vm2, %v1723_v24 }
0x15a8   :  { %v1658_v21 = vpop.f32.mrf.mxu0 }
0x15a9   :  { %v1659_v54 = vadd.f32 %v3822_v33, %v1658_v21 }
0x15ab   :  { %v1724_v25 = vmax.f32 %v1659_v54, 0.0  ;;  %3068 = vmatmul.msk.f32.gmra.mxu0 %vm1007_vm2, %v1503_v22 }
0x15ad   :  { %3083 = vmatmul.msk.f32.gmra.mxu1 %vm1007_vm2, %v1724_v25 }
0x15b0   :  { %v1661_v29 = vpop.f32.mrf.mxu0 }
0x15b1   :  { %v1662_v16 = vadd.f32 %v3822_v33, %v1661_v29 }
0x15b3   :  { %v1725_v31 = vmax.f32 %v1662_v16, 0.0  ;;  %3069 = vmatmul.msk.f32.gmra.mxu0 %vm1007_vm2, %v1504_v30 }
0x15b5   :  { %3084 = vmatmul.msk.f32.gmra.mxu1 %vm1007_vm2, %v1725_v31 }
0x15b8   :  { %v1664_v23 = vpop.f32.mrf.mxu0 }
0x15b9   :  { %v1665_v32 = vadd.f32 %v3822_v33, %v1664_v23 }
0x15bb   :  { %v1726_v58 = vmax.f32 %v1665_v32, 0.0 }
0x15bd   :  { %3085 = vmatmul.msk.f32.gmra.mxu1 %vm1007_vm2, %v1726_v58 }
0x15c0   :  { %v1667_v34 = vpop.f32.mrf.mxu0 }
0x15c1   :  { %v1668_v35 = vadd.f32 %v3822_v33, %v1667_v34 }
0x15c3   :  { %v1727_v36 = vmax.f32 %v1668_v35, 0.0 }
0x15c5   :  { %3086 = vmatmul.msk.f32.gmra.mxu1 %vm1007_vm2, %v1727_v36 }
0x15c8   :  { %v1670_v38 = vpop.f32.mrf.mxu0 }
0x15c9   :  { %v1671_v39 = vadd.f32 %v3822_v33, %v1670_v38 }
0x15ca   :  { %v1858_v40 = vpop.f32.mrf.mxu1 }
0x15cb   :  { %v1728_v41 = vmax.f32 %v1671_v39, 0.0  ;;  %v1859_v42 = vadd.f32 %v3887_v37, %v1858_v40 }
0x15cd   :  { %v1948_v43 = vmax.f32 %v1859_v42, 0.0  ;;  %3087 = vmatmul.msk.f32.gmra.mxu1 %vm1007_vm2, %v1728_v41 }
0x15cf   :  { %2480 = vrot.lane.b32.xlu0 %v1948_v43, %s3344_s4  ;;  %3102 = vmatmul.msk.f32.vlgmr.msra.gmra.mxu2 %vm1007_vm2, %v1948_v43 }
0x15d0   :  { %3133 = vmatmul.msk.f32.vlgmr.msra.gmra.mxu3 %vm1007_vm2, %v1948_v43  ;;  %v1673_v44 = vpop.f32.mrf.mxu0 }
0x15d1   :  { %v1674_v45 = vadd.f32 %v3822_v33, %v1673_v44 }
0x15d2   :  { %v1861_v46 = vpop.f32.mrf.mxu1 }
0x15d3   :  { %v1729_v47 = vmax.f32 %v1674_v45, 0.0  ;;  %v1862_v48 = vadd.f32 %v3887_v37, %v1861_v46 }
0x15d5   :  { %v1949_v49 = vmax.f32 %v1862_v48, 0.0  ;;  %3088 = vmatmul.msk.f32.gmra.mxu1 %vm1007_vm2, %v1729_v47 }
0x15d7   :  { %2482 = vrot.lane.b32.xlu0 %v1949_v49, %s3344_s4  ;;  %3103 = vmatmul.msk.f32.gmra.mxu2 %vm1007_vm2, %v1949_v49 }
0x15d8   :  { %3134 = vmatmul.msk.f32.gmra.mxu3 %vm1007_vm2, %v1949_v49  ;;  %v1676_v50 = vpop.f32.mrf.mxu0 }
0x15d9   :  { %v1677_v51 = vadd.f32 %v3822_v33, %v1676_v50 }
0x15da   :  { %v1864_v52 = vpop.f32.mrf.mxu1 }
0x15db   :  { %v1730_v53 = vmax.f32 %v1677_v51, 0.0  ;;  %v1865_v55 = vadd.f32 %v3887_v37, %v1864_v52 }
0x15dd   :  { %v1950_v56 = vmax.f32 %v1865_v55, 0.0  ;;  %3089 = vmatmul.msk.f32.gmra.mxu1 %vm1007_vm2, %v1730_v53 }
0x15df   :  { %2484 = vrot.lane.b32.xlu1 %v1950_v56, %s3344_s4  ;;  %3104 = vmatmul.msk.f32.gmra.mxu2 %vm1007_vm2, %v1950_v56 }
0x15e0   :  { %3135 = vmatmul.msk.f32.gmra.mxu3 %vm1007_vm2, %v1950_v56  ;;  %v1679_v59 = vpop.f32.mrf.mxu0 }
0x15e1   :  { %v1680_v60 = vadd.f32 %v3822_v33, %v1679_v59 }
0x15e2   :  { %v1867_v61 = vpop.f32.mrf.mxu1 }
0x15e3   :  { %v1731_v63 = vmax.f32 %v1680_v60, 0.0  ;;  %v1868_v0 = vadd.f32 %v3887_v37, %v1867_v61 }
0x15e5   :  { %v1951_v2 = vmax.f32 %v1868_v0, 0.0  ;;  %3090 = vmatmul.msk.f32.gmra.mxu1 %vm1007_vm2, %v1731_v63 }
0x15e7   :  { %2486 = vrot.lane.b32.xlu1 %v1951_v2, %s3344_s4  ;;  %3105 = vmatmul.msk.f32.gmra.mxu2 %vm1007_vm2, %v1951_v2 }
0x15e8   :  { %3136 = vmatmul.msk.f32.gmra.mxu3 %vm1007_vm2, %v1951_v2  ;;  %v1682_v3 = vpop.f32.mrf.mxu0 }
0x15e9   :  { %v1683_v4 = vadd.f32 %v3822_v33, %v1682_v3 }
0x15ea   :  { %v1870_v1 = vpop.f32.mrf.mxu1 }
0x15eb   :  { %v1732_v5 = vmax.f32 %v1683_v4, 0.0  ;;  %v1871_v6 = vadd.f32 %v3887_v37, %v1870_v1 }
0x15ed   :  { %v1952_v9 = vmax.f32 %v1871_v6, 0.0  ;;  %3091 = vmatmul.msk.f32.gmra.mxu1 %vm1007_vm2, %v1732_v5 }
0x15ef   :  { %2488 = vrot.lane.b32.xlu2 %v1952_v9, %s3344_s4  ;;  %3106 = vmatmul.msk.f32.gmra.mxu2 %vm1007_vm2, %v1952_v9 }
0x15f0   :  { %3137 = vmatmul.msk.f32.gmra.mxu3 %vm1007_vm2, %v1952_v9  ;;  %v1685_v10 = vpop.f32.mrf.mxu0 }
0x15f1   :  { %v1686_v12 = vadd.f32 %v3822_v33, %v1685_v10  ;;  %v3987_v10 = vld [vmem:[%s4633_s19] ss:$0 sm:$0xff] }
0x15f2   :  { %v1873_v13 = vpop.f32.mrf.mxu1 }
0x15f3   :  { %v1733_v11 = vmax.f32 %v1686_v12, 0.0  ;;  %v1874_v14 = vadd.f32 %v3887_v37, %v1873_v13  ;;  %v3993_v12 = vld [vmem:[%s4635_s21] ss:$0 sm:$0xff] }
0x15f5   :  { %v1953_v15 = vmax.f32 %v1874_v14, 0.0  ;;  %3092 = vmatmul.msk.f32.gmra.mxu1 %vm1007_vm2, %v1733_v11 }
0x15f7   :  { %2490 = vrot.lane.b32.xlu2 %v1953_v15, %s3344_s4  ;;  %3107 = vmatmul.msk.f32.gmra.mxu2 %vm1007_vm2, %v1953_v15 }
0x15f8   :  { %3138 = vmatmul.msk.f32.gmra.mxu3 %vm1007_vm2, %v1953_v15  ;;  %v1688_v17 = vpop.f32.mrf.mxu0 }
0x15f9   :  { %v1689_v18 = vadd.f32 %v3822_v33, %v1688_v17 }
0x15fa   :  { %v1876_v7 = vpop.f32.mrf.mxu1 }
0x15fb   :  { %v1734_v8 = vmax.f32 %v1689_v18, 0.0  ;;  %v1877_v19 = vadd.f32 %v3887_v37, %v1876_v7 }
0x15fd   :  { %v1954_v20 = vmax.f32 %v1877_v19, 0.0  ;;  %3093 = vmatmul.msk.f32.gmra.mxu1 %vm1007_vm2, %v1734_v8 }
0x15ff   :  { %2492 = vrot.lane.b32.xlu0 %v1954_v20, %s3344_s4  ;;  %3108 = vmatmul.msk.f32.gmra.mxu2 %vm1007_vm2, %v1954_v20 }
0x1600   :  { %3139 = vmatmul.msk.f32.gmra.mxu3 %vm1007_vm2, %v1954_v20  ;;  %v1691_v62 = vpop.f32.mrf.mxu0 }
0x1601   :  { %v1692_v24 = vadd.f32 %v3822_v33, %v1691_v62 }
0x1602   :  { %v1879_v21 = vpop.f32.mrf.mxu1 }
0x1603   :  { %v1735_v22 = vmax.f32 %v1692_v24, 0.0  ;;  %v1880_v54 = vadd.f32 %v3887_v37, %v1879_v21 }
0x1605   :  { %v1955_v25 = vmax.f32 %v1880_v54, 0.0  ;;  %3094 = vmatmul.msk.f32.gmra.mxu1 %vm1007_vm2, %v1735_v22 }
0x1607   :  { %2494 = vrot.lane.b32.xlu1 %v1955_v25, %s3344_s4  ;;  %3109 = vmatmul.msk.f32.gmra.mxu2 %vm1007_vm2, %v1955_v25 }
0x1608   :  { %3140 = vmatmul.msk.f32.gmra.mxu3 %vm1007_vm2, %v1955_v25  ;;  %v1694_v57 = vpop.f32.mrf.mxu0 }
0x1609   :  { %v1695_v26 = vadd.f32 %v3822_v33, %v1694_v57 }
0x160a   :  { %v1882_v27 = vpop.f32.mrf.mxu1 }
0x160b   :  { %v1736_v28 = vmax.f32 %v1695_v26, 0.0  ;;  %v1883_v29 = vadd.f32 %v3887_v37, %v1882_v27  ;;  %v2390_v26 = vld [vmem:[%s4636_s22] sm:$0xff] }
0x160d   :  { %v1956_v30 = vmax.f32 %v1883_v29, 0.0  ;;  %3095 = vmatmul.msk.f32.gmra.mxu1 %vm1007_vm2, %v1736_v28 }
0x160f   :  { %2496 = vrot.lane.b32.xlu2 %v1956_v30, %s3344_s4  ;;  %3110 = vmatmul.msk.f32.gmra.mxu2 %vm1007_vm2, %v1956_v30 }
0x1610   :  { %3141 = vmatmul.msk.f32.gmra.mxu3 %vm1007_vm2, %v1956_v30  ;;  %v1697_v16 = vpop.f32.mrf.mxu0 }
0x1611   :  { %v1698_v31 = vadd.f32 %v3822_v33, %v1697_v16 }
0x1612   :  { %v1885_v23 = vpop.f32.mrf.mxu1 }
0x1613   :  { %v1737_v32 = vmax.f32 %v1698_v31, 0.0  ;;  %v1886_v58 = vadd.f32 %v3887_v37, %v1885_v23 }
0x1615   :  { %v1957_v34 = vmax.f32 %v1886_v58, 0.0  ;;  %3096 = vmatmul.msk.f32.gmra.mxu1 %vm1007_vm2, %v1737_v32 }
0x1617   :  { %2498 = vrot.lane.b32.xlu0 %v1957_v34, %s3344_s4  ;;  %3111 = vmatmul.msk.f32.gmra.mxu2 %vm1007_vm2, %v1957_v34 }
0x1618   :  { %3142 = vmatmul.msk.f32.gmra.mxu3 %vm1007_vm2, %v1957_v34  ;;  %v1700_v35 = vpop.f32.mrf.mxu0 }
0x1619   :  { %v1701_v36 = vadd.f32 %v3822_v33, %v1700_v35 }
0x161a   :  { %v1888_v38 = vpop.f32.mrf.mxu1 }
0x161b   :  { %v1738_v39 = vmax.f32 %v1701_v36, 0.0  ;;  %v1889_v40 = vadd.f32 %v3887_v37, %v1888_v38  ;;  %v2391_v38 = vld [vmem:[%s4636_s22 + $0x8] sm:$0xff] }
0x161d   :  { %v1958_v41 = vmax.f32 %v1889_v40, 0.0  ;;  %3097 = vmatmul.msk.f32.gmra.mxu1 %vm1007_vm2, %v1738_v39 }
0x161f   :  { %2500 = vrot.lane.b32.xlu1 %v1958_v41, %s3344_s4  ;;  %3112 = vmatmul.msk.f32.gmra.mxu2 %vm1007_vm2, %v1958_v41 }
0x1620   :  { %3143 = vmatmul.msk.f32.gmra.mxu3 %vm1007_vm2, %v1958_v41  ;;  %v1703_v42 = vpop.f32.mrf.mxu0 }
0x1621   :  { %v1704_v43 = vadd.f32 %v3822_v33, %v1703_v42 }
0x1622   :  { %v1891_v44 = vpop.f32.mrf.mxu1 }
0x1623   :  { %v1739_v45 = vmax.f32 %v1704_v43, 0.0  ;;  %v1892_v46 = vadd.f32 %v3887_v37, %v1891_v44 }
0x1625   :  { %v1959_v47 = vmax.f32 %v1892_v46, 0.0  ;;  %3098 = vmatmul.msk.f32.gmra.mxu1 %vm1007_vm2, %v1739_v45 }
0x1627   :  { %2502 = vrot.lane.b32.xlu2 %v1959_v47, %s3344_s4  ;;  %3113 = vmatmul.msk.f32.gmra.mxu2 %vm1007_vm2, %v1959_v47 }
0x1628   :  { %3144 = vmatmul.msk.f32.gmra.mxu3 %vm1007_vm2, %v1959_v47  ;;  %v1706_v48 = vpop.f32.mrf.mxu0 }
0x1629   :  { %v1707_v49 = vadd.f32 %v3822_v33, %v1706_v48 }
0x162a   :  { %v1894_v50 = vpop.f32.mrf.mxu1 }
0x162b   :  { %v1740_v51 = vmax.f32 %v1707_v49, 0.0  ;;  %v1895_v52 = vadd.f32 %v3887_v37, %v1894_v50 }
0x162d   :  { %v1960_v53 = vmax.f32 %v1895_v52, 0.0  ;;  %3099 = vmatmul.msk.f32.gmra.mxu1 %vm1007_vm2, %v1740_v51  ;;  %v2392_v51 = vld [vmem:[%s4636_s22 + $0x10] sm:$0xff] }
0x162f   :  { %2504 = vrot.lane.b32.xlu0 %v1960_v53, %s3344_s4  ;;  %3114 = vmatmul.msk.f32.gmra.mxu2 %vm1007_vm2, %v1960_v53 }
0x1630   :  { %3145 = vmatmul.msk.f32.gmra.mxu3 %vm1007_vm2, %v1960_v53  ;;  %v1709_v55 = vpop.f32.mrf.mxu0 }
0x1631   :  { %v1710_v56 = vadd.f32 %v3822_v33, %v1709_v55 }
0x1632   :  { %v1897_v59 = vpop.f32.mrf.mxu1 }
0x1633   :  { %v1741_v60 = vmax.f32 %v1710_v56, 0.0  ;;  %v1898_v61 = vadd.f32 %v3887_v37, %v1897_v59 }
0x1635   :  { %v1961_v63 = vmax.f32 %v1898_v61, 0.0  ;;  %3100 = vmatmul.msk.f32.gmra.mxu1 %vm1007_vm2, %v1741_v60 }
0x1637   :  { %2506 = vrot.lane.b32.xlu1 %v1961_v63, %s3344_s4  ;;  %3115 = vmatmul.msk.f32.gmra.mxu2 %vm1007_vm2, %v1961_v63 }
0x1638   :  { %3146 = vmatmul.msk.f32.gmra.mxu3 %vm1007_vm2, %v1961_v63 }
0x163a   :  { %v1900_v0 = vpop.f32.mrf.mxu1 }
0x163b   :  { %v1901_v2 = vadd.f32 %v3887_v37, %v1900_v0 }
0x163d   :  { %v1962_v3 = vmax.f32 %v1901_v2, 0.0 }
0x163f   :  { %2508 = vrot.lane.b32.xlu2 %v1962_v3, %s3344_s4  ;;  %3116 = vmatmul.msk.f32.gmra.mxu2 %vm1007_vm2, %v1962_v3 }
0x1640   :  { %3147 = vmatmul.msk.f32.gmra.mxu3 %vm1007_vm2, %v1962_v3 }
0x1642   :  { %v1903_v33 = vpop.f32.mrf.mxu1 }
0x1643   :  { %v1904_v4 = vadd.f32 %v3887_v37, %v1903_v33 }
0x1645   :  { %v1963_v1 = vmax.f32 %v1904_v4, 0.0  ;;  %v2393_v4 = vld [vmem:[%s4636_s22 + $0x18] sm:$0xff] }
0x1647   :  { %2510 = vrot.lane.b32.xlu0 %v1963_v1, %s3344_s4  ;;  %3117 = vmatmul.msk.f32.gmra.mxu2 %vm1007_vm2, %v1963_v1 }
0x1648   :  { %3148 = vmatmul.msk.f32.gmra.mxu3 %vm1007_vm2, %v1963_v1 }
0x164a   :  { %v1906_v5 = vpop.f32.mrf.mxu1 }
0x164b   :  { %v1907_v6 = vadd.f32 %v3887_v37, %v1906_v5 }
0x164d   :  { %v1964_v9 = vmax.f32 %v1907_v6, 0.0 }
0x164f   :  { %2512 = vrot.lane.b32.xlu1 %v1964_v9, %s3344_s4  ;;  %3118 = vmatmul.msk.f32.gmra.mxu2 %vm1007_vm2, %v1964_v9 }
0x1650   :  { %3149 = vmatmul.msk.f32.gmra.mxu3 %vm1007_vm2, %v1964_v9 }
0x1652   :  { %v1909_v13 = vpop.f32.mrf.mxu1  ;;  %v2094_v11 = vpop.f32.mrf.mxu2 }
0x1653   :  { %v1910_v14 = vadd.f32 %v3887_v37, %v1909_v13  ;;  %v2095_v15 = vadd.f32 %v3987_v10, %v2094_v11  ;;  %v2210_v17 = vpop.f32.mrf.mxu3 }
0x1654   :  { %v2211_v18 = vadd.f32 %v3993_v12, %v2210_v17 }
0x1655   :  { %v1965_v7 = vmax.f32 %v1910_v14, 0.0  ;;  %2600 = vrot.lane.b32.xlu0 %v2095_v15, %s3345_s15 }
0x1656   :  { %v2300_v8 = vmul.f32 0.5, %v2211_v18 }
0x1657   :  { %2514 = vrot.lane.b32.xlu2 %v1965_v7, %s3344_s4  ;;  %3119 = vmatmul.msk.f32.gmra.mxu2 %vm1007_vm2, %v1965_v7 }
0x1658   :  { %v2330_v19 = vmul.f32 1.442695, %v2300_v8  ;;  %3150 = vmatmul.msk.f32.gmra.mxu3 %vm1007_vm2, %v1965_v7 }
0x165a   :  { %3250 = vpow2.f32 %v2330_v19  ;;  %v1912_v20 = vpop.f32.mrf.mxu1  ;;  %v2097_v62 = vpop.f32.mrf.mxu2  ;;  %v2394_v19 = vld [vmem:[%s4636_s22 + $0x20] sm:$0xff] }
0x165b   :  { %v1913_v24 = vadd.f32 %v3887_v37, %v1912_v20  ;;  %v2098_v21 = vadd.f32 %v3987_v10, %v2097_v62  ;;  %v2213_v22 = vpop.f32.mrf.mxu3 }
0x165c   :  { %v2214_v54 = vadd.f32 %v3993_v12, %v2213_v22 }
0x165d   :  { %v1966_v25 = vmax.f32 %v1913_v24, 0.0  ;;  %2602 = vrot.lane.b32.xlu1 %v2098_v21, %s3345_s15  ;;  %2720 = vrot.lane.b32.xlu0 %v2211_v18, %s3346_s7  ;;  %v4064_v24 = vpop.permute.xlu0 %2480 }
0x165e   :  { %v2301_v57 = vmul.f32 0.5, %v2214_v54 }
0x165f   :  { %3120 = vmatmul.msk.f32.gmra.mxu2 %vm1007_vm2, %v1966_v25 }
0x1660   :  { %v3251_v27 = vpop.eup %3250  ;;  %v2332_v28 = vmul.f32 1.442695, %v2301_v57  ;;  %3151 = vmatmul.msk.f32.gmra.mxu3 %vm1007_vm2, %v1966_v25 }
0x1661   :  { %v2420_v29 = vmul.f32 %v3251_v27, %v2390_v26 }
0x1662   :  { %3252 = vpow2.f32 %v2332_v28  ;;  %v1915_v30 = vpop.f32.mrf.mxu1  ;;  %v2100_v16 = vpop.f32.mrf.mxu2 }
0x1663   :  { %v1916_v31 = vadd.f32 %v3887_v37, %v1915_v30  ;;  %v2101_v23 = vadd.f32 %v3987_v10, %v2100_v16  ;;  %v2216_v32 = vpop.f32.mrf.mxu3  ;;  %v4014_v58 = vadd.f32 %v2420_v29, %v2095_v15 }
0x1664   :  { %v2217_v34 = vadd.f32 %v3993_v12, %v2216_v32 }
0x1665   :  { %v1967_v35 = vmax.f32 %v1916_v31, 0.0  ;;  %2604 = vrot.lane.b32.xlu2 %v2101_v23, %s3345_s15  ;;  %2722 = vrot.lane.b32.xlu1 %v2214_v54, %s3346_s7 }
0x1666   :  { %v2302_v36 = vmul.f32 0.5, %v2217_v34  ;;  %2516 = vrot.lane.b32.xlu0 %v1966_v25, %s3344_s4 }
0x1667   :  { %3121 = vmatmul.msk.f32.gmra.mxu2 %vm1007_vm2, %v1967_v35 }
0x1668   :  { %v3253_v39 = vpop.eup %3252  ;;  %v2334_v40 = vmul.f32 1.442695, %v2302_v36  ;;  %3152 = vmatmul.msk.f32.gmra.mxu3 %vm1007_vm2, %v1967_v35 }
0x1669   :  { %v2421_v41 = vmul.f32 %v3253_v39, %v2391_v38 }
0x166a   :  { %3254 = vpow2.f32 %v2334_v40  ;;  %v1918_v42 = vpop.f32.mrf.mxu1  ;;  %v2103_v43 = vpop.f32.mrf.mxu2 }
0x166b   :  { %v1919_v44 = vadd.f32 %v3887_v37, %v1918_v42  ;;  %v2104_v45 = vadd.f32 %v3987_v10, %v2103_v43  ;;  %v2219_v46 = vpop.f32.mrf.mxu3  ;;  %v4027_v47 = vadd.f32 %v2421_v41, %v2098_v21  ;;  %v2489_v21 = vpop.permute.xlu2 %2488 }
0x166c   :  { %v2220_v48 = vadd.f32 %v3993_v12, %v2219_v46 }
0x166d   :  { %v1968_v49 = vmax.f32 %v1919_v44, 0.0  ;;  %2724 = vrot.lane.b32.xlu2 %v2217_v34, %s3346_s7  ;;  %2518 = vrot.lane.b32.xlu1 %v1967_v35, %s3344_s4  ;;  %v4080_v35 = vpop.permute.xlu1 %2484  ;;  %v4084_v44 = vpop.permute.xlu0 %2482 }
0x166e   :  { %v2303_v50 = vmul.f32 0.5, %v2220_v48  ;;  %2606 = vrot.lane.b32.xlu0 %v2104_v45, %s3345_s15 }
0x166f   :  { %3122 = vmatmul.msk.f32.gmra.mxu2 %vm1007_vm2, %v1968_v49 }
0x1670   :  { %v3255_v52 = vpop.eup %3254  ;;  %v2336_v53 = vmul.f32 1.442695, %v2303_v50  ;;  %3153 = vmatmul.msk.f32.gmra.mxu3 %vm1007_vm2, %v1968_v49 }
0x1671   :  { %v2422_v55 = vmul.f32 %v3255_v52, %v2392_v51  ;;  %v2396_v51 = vld [vmem:[%s4636_s22 + $0x30] sm:$0xff] }
0x1672   :  { %3256 = vpow2.f32 %v2336_v53  ;;  %v1921_v56 = vpop.f32.mrf.mxu1  ;;  %v2106_v59 = vpop.f32.mrf.mxu2 }
0x1673   :  { %v1922_v60 = vadd.f32 %v3887_v37, %v1921_v56  ;;  %v2107_v61 = vadd.f32 %v3987_v10, %v2106_v59  ;;  %v2222_v63 = vpop.f32.mrf.mxu3  ;;  %v4040_v0 = vadd.f32 %v2422_v55, %v2101_v23  ;;  %v2395_v23 = vld [vmem:[%s4636_s22 + $0x28] sm:$0xff] }
0x1674   :  { %v2223_v2 = vadd.f32 %v3993_v12, %v2222_v63 }
0x1675   :  { %v1969_v3 = vmax.f32 %v1922_v60, 0.0  ;;  %2520 = vrot.lane.b32.xlu2 %v1968_v49, %s3344_s4  ;;  %2608 = vrot.lane.b32.xlu1 %v2107_v61, %s3345_s15 }
0x1676   :  { %v2304_v33 = vmul.f32 0.5, %v2223_v2  ;;  %2726 = vrot.lane.b32.xlu0 %v2220_v48, %s3346_s7 }
0x1677   :  { %3123 = vmatmul.msk.f32.gmra.mxu2 %vm1007_vm2, %v1969_v3 }
0x1678   :  { %v3257_v1 = vpop.eup %3256  ;;  %v2338_v5 = vmul.f32 1.442695, %v2304_v33  ;;  %3154 = vmatmul.msk.f32.gmra.mxu3 %vm1007_vm2, %v1969_v3  ;;  %v2493_v33 = vpop.permute.xlu0 %2492 }
0x1679   :  { %v2423_v6 = vmul.f32 %v3257_v1, %v2393_v4 }
0x167a   :  { %3258 = vpow2.f32 %v2338_v5  ;;  %v1924_v9 = vpop.f32.mrf.mxu1  ;;  %v2109_v13 = vpop.f32.mrf.mxu2 }
0x167b   :  { %v1925_v11 = vadd.f32 %v3887_v37, %v1924_v9  ;;  %v2110_v14 = vadd.f32 %v3987_v10, %v2109_v13  ;;  %v2225_v15 = vpop.f32.mrf.mxu3  ;;  %v4053_v17 = vadd.f32 %v2423_v6, %v2104_v45  ;;  %v2491_v45 = vpop.permute.xlu2 %2490  ;;  %v2397_v9 = vld [vmem:[%s4636_s22 + $0x38] sm:$0xff] }
0x167c   :  { %v2226_v18 = vadd.f32 %v3993_v12, %v2225_v15 }
0x167d   :  { %v1970_v7 = vmax.f32 %v1925_v11, 0.0  ;;  %2610 = vrot.lane.b32.xlu2 %v2110_v14, %s3345_s15  ;;  %2728 = vrot.lane.b32.xlu1 %v2223_v2, %s3346_s7 }
0x167e   :  { %v2305_v8 = vmul.f32 0.5, %v2226_v18  ;;  %2522 = vrot.lane.b32.xlu0 %v1969_v3, %s3344_s4  ;;  %v4100_v3 = vpop.permute.xlu1 %2486 }
0x167f   :  { %3124 = vmatmul.msk.f32.gmra.mxu2 %vm1007_vm2, %v1970_v7 }
0x1680   :  { %v3259_v20 = vpop.eup %3258  ;;  %v2340_v62 = vmul.f32 1.442695, %v2305_v8  ;;  %3155 = vmatmul.msk.f32.gmra.mxu3 %vm1007_vm2, %v1970_v7 }
0x1681   :  { %v2424_v22 = vmul.f32 %v3259_v20, %v2394_v19 }
0x1682   :  { %3260 = vpow2.f32 %v2340_v62  ;;  %v1927_v54 = vpop.f32.mrf.mxu1  ;;  %v2112_v25 = vpop.f32.mrf.mxu2 }
0x1683   :  { %v1928_v57 = vadd.f32 %v3887_v37, %v1927_v54  ;;  %v2113_v26 = vadd.f32 %v3987_v10, %v2112_v25  ;;  %v2228_v27 = vpop.f32.mrf.mxu3  ;;  %v2454_v28 = vadd.f32 %v2424_v22, %v2107_v61 }
0x1684   :  { %v2229_v29 = vadd.f32 %v3993_v12, %v2228_v27 }
0x1685   :  { %v1971_v30 = vmax.f32 %v1928_v57, 0.0  ;;  %2730 = vrot.lane.b32.xlu2 %v2226_v18, %s3346_s7  ;;  %2524 = vrot.lane.b32.xlu1 %v1970_v7, %s3344_s4  ;;  %v4072_v16 = vsel %vm1007_vm2, %v2454_v28, %v2489_v21  ;;  %v2398_v57 = vld [vmem:[%s4636_s22 + $0x40] sm:$0xff] }
0x1686   :  { %v2306_v31 = vmul.f32 0.5, %v2229_v29  ;;  %2612 = vrot.lane.b32.xlu0 %v2113_v26, %s3345_s15  ;;  %v2495_v62 = vpop.permute.xlu1 %2494 }
0x1687   :  { %3125 = vmatmul.msk.f32.gmra.mxu2 %vm1007_vm2, %v1971_v30 }
0x1688   :  { %v3261_v32 = vpop.eup %3260  ;;  %v2342_v34 = vmul.f32 1.442695, %v2306_v31  ;;  %3156 = vmatmul.msk.f32.gmra.mxu3 %vm1007_vm2, %v1971_v30 }
0x1689   :  { %v2425_v36 = vmul.f32 %v3261_v32, %v2395_v23 }
0x168a   :  { %3262 = vpow2.f32 %v2342_v34  ;;  %v1930_v38 = vpop.f32.mrf.mxu1  ;;  %v2115_v39 = vpop.f32.mrf.mxu2 }
0x168b   :  { %v1931_v40 = vadd.f32 %v3887_v37, %v1930_v38  ;;  %v2116_v41 = vadd.f32 %v3987_v10, %v2115_v39  ;;  %v2231_v42 = vpop.f32.mrf.mxu3  ;;  %v2455_v43 = vadd.f32 %v2425_v36, %v2110_v14 }
0x168c   :  { %v2232_v46 = vadd.f32 %v3993_v12, %v2231_v42  ;;  %v2399_v42 = vld [vmem:[%s4636_s22 + $0x48] sm:$0xff] }
0x168d   :  { %v1972_v48 = vmax.f32 %v1931_v40, 0.0  ;;  %2526 = vrot.lane.b32.xlu2 %v1971_v30, %s3344_s4  ;;  %2614 = vrot.lane.b32.xlu1 %v2116_v41, %s3345_s15  ;;  %v4090_v49 = vsel %vm1007_vm2, %v2455_v43, %v2491_v45 }
0x168e   :  { %v2307_v50 = vmul.f32 0.5, %v2232_v46  ;;  %2732 = vrot.lane.b32.xlu0 %v2229_v29, %s3346_s7 }
0x168f   :  { %3126 = vmatmul.msk.f32.gmra.mxu2 %vm1007_vm2, %v1972_v48 }
0x1690   :  { %v3263_v52 = vpop.eup %3262  ;;  %v2344_v53 = vmul.f32 1.442695, %v2307_v50  ;;  %3157 = vmatmul.msk.f32.gmra.mxu3 %vm1007_vm2, %v1972_v48 }
0x1691   :  { %v2426_v55 = vmul.f32 %v3263_v52, %v2396_v51 }
0x1692   :  { %3264 = vpow2.f32 %v2344_v53  ;;  %v1933_v56 = vpop.f32.mrf.mxu1  ;;  %v2118_v59 = vpop.f32.mrf.mxu2 }
0x1693   :  { %v1934_v60 = vadd.f32 %v3887_v37, %v1933_v56  ;;  %v2119_v61 = vadd.f32 %v3987_v10, %v2118_v59  ;;  %v2234_v63 = vpop.f32.mrf.mxu3  ;;  %v2456_v2 = vadd.f32 %v2426_v55, %v2113_v26  ;;  %v2497_v26 = vpop.permute.xlu2 %2496 }
0x1694   :  { %v2235_v4 = vadd.f32 %v3993_v12, %v2234_v63  ;;  %v2499_v59 = vpop.permute.xlu0 %2498 }
0x1695   :  { %v1973_v1 = vmax.f32 %v1934_v60, 0.0  ;;  %2616 = vrot.lane.b32.xlu2 %v2119_v61, %s3345_s15  ;;  %2734 = vrot.lane.b32.xlu1 %v2232_v46, %s3346_s7  ;;  %v4106_v5 = vsel %vm1007_vm2, %v2456_v2, %v2493_v33  ;;  %v2400_v33 = vld [vmem:[%s4636_s22 + $0x50] sm:$0xff] }
0x1696   :  { %v2308_v6 = vmul.f32 0.5, %v2235_v4  ;;  %2528 = vrot.lane.b32.xlu0 %v1972_v48, %s3344_s4 }
0x1697   :  { %3127 = vmatmul.msk.f32.gmra.mxu2 %vm1007_vm2, %v1973_v1 }
0x1698   :  { %v3265_v13 = vpop.eup %3264  ;;  %v2346_v11 = vmul.f32 1.442695, %v2308_v6  ;;  %3158 = vmatmul.msk.f32.gmra.mxu3 %vm1007_vm2, %v1973_v1 }
0x1699   :  { %v2427_v14 = vmul.f32 %v3265_v13, %v2397_v9 }
0x169a   :  { %3266 = vpow2.f32 %v2346_v11  ;;  %v1936_v15 = vpop.f32.mrf.mxu1  ;;  %v2121_v18 = vpop.f32.mrf.mxu2 }
0x169b   :  { %v1937_v7 = vadd.f32 %v3887_v37, %v1936_v15  ;;  %v2122_v8 = vadd.f32 %v3987_v10, %v2121_v18  ;;  %v2237_v19 = vpop.f32.mrf.mxu3  ;;  %v2457_v20 = vadd.f32 %v2427_v14, %v2116_v41  ;;  %v2503_v43 = vpop.permute.xlu2 %2502 }
0x169c   :  { %v2238_v21 = vadd.f32 %v3993_v12, %v2237_v19 }
0x169d   :  { %v1974_v22 = vmax.f32 %v1937_v7, 0.0  ;;  %2736 = vrot.lane.b32.xlu2 %v2235_v4, %s3346_s7  ;;  %2530 = vrot.lane.b32.xlu1 %v1973_v1, %s3344_s4  ;;  %v4120_v54 = vsel %vm1007_vm2, %v2457_v20, %v2495_v62 }
0x169e   :  { %v2309_v25 = vmul.f32 0.5, %v2238_v21  ;;  %2618 = vrot.lane.b32.xlu0 %v2122_v8, %s3345_s15 }
0x169f   :  { %3128 = vmatmul.msk.f32.gmra.mxu2 %vm1007_vm2, %v1974_v22 }
0x16a0   :  { %v3267_v27 = vpop.eup %3266  ;;  %v2348_v28 = vmul.f32 1.442695, %v2309_v25  ;;  %3159 = vmatmul.msk.f32.gmra.mxu3 %vm1007_vm2, %v1974_v22 }
0x16a1   :  { %v2428_v29 = vmul.f32 %v3267_v27, %v2398_v57 }
0x16a2   :  { %3268 = vpow2.f32 %v2348_v28  ;;  %v1939_v30 = vpop.f32.mrf.mxu1  ;;  %v2124_v31 = vpop.f32.mrf.mxu2 }
0x16a3   :  { %v1940_v23 = vadd.f32 %v3887_v37, %v1939_v30  ;;  %v2125_v32 = vadd.f32 %v3987_v10, %v2124_v31  ;;  %v2240_v34 = vpop.f32.mrf.mxu3  ;;  %v2458_v36 = vadd.f32 %v2428_v29, %v2119_v61  ;;  %v4154_v4 = vpop.permute.xlu2 %2508 }
0x16a4   :  { %v2241_v38 = vadd.f32 %v3993_v12, %v2240_v34 }
0x16a5   :  { %v1975_v39 = vmax.f32 %v1940_v23, 0.0  ;;  %2532 = vrot.lane.b32.xlu2 %v1974_v22, %s3344_s4  ;;  %2620 = vrot.lane.b32.xlu1 %v2125_v32, %s3345_s15  ;;  %v4134_v40 = vsel %vm1007_vm2, %v2458_v36, %v2497_v26  ;;  %v2505_v22 = vpop.permute.xlu0 %2504 }
0x16a6   :  { %v2310_v41 = vmul.f32 0.5, %v2241_v38  ;;  %2738 = vrot.lane.b32.xlu0 %v2238_v21, %s3346_s7 }
0x16a7   :  { %3129 = vmatmul.msk.f32.gmra.mxu2 %vm1007_vm2, %v1975_v39 }
0x16a8   :  { %v3269_v45 = vpop.eup %3268  ;;  %v2350_v46 = vmul.f32 1.442695, %v2310_v41  ;;  %3160 = vmatmul.msk.f32.gmra.mxu3 %vm1007_vm2, %v1975_v39 }
0x16a9   :  { %v2429_v48 = vmul.f32 %v3269_v45, %v2399_v42 }
0x16aa   :  { %3270 = vpow2.f32 %v2350_v46  ;;  %v1942_v50 = vpop.f32.mrf.mxu1  ;;  %v2127_v51 = vpop.f32.mrf.mxu2 }
0x16ab   :  { %v1943_v52 = vadd.f32 %v3887_v37, %v1942_v50  ;;  %v2128_v53 = vadd.f32 %v3987_v10, %v2127_v51  ;;  %v2243_v55 = vpop.f32.mrf.mxu3  ;;  %v2459_v56 = vadd.f32 %v2429_v48, %v2122_v8  ;;  %v2501_v8 = vpop.permute.xlu1 %2500 }
0x16ac   :  { %v2244_v60 = vadd.f32 %v3993_v12, %v2243_v55  ;;  %v2812_v55 = vsel %vm1007_vm2, %v4040_v0, %v4080_v35 }
0x16ad   :  { %v1976_v61 = vmax.f32 %v1943_v52, 0.0  ;;  %2622 = vrot.lane.b32.xlu2 %v2128_v53, %s3345_s15  ;;  %2740 = vrot.lane.b32.xlu1 %v2241_v38, %s3346_s7  ;;  %v4148_v63 = vsel %vm1007_vm2, %v2459_v56, %v2499_v59  ;;  %v2402_v38 = vld [vmem:[%s4636_s22 + $0x60] sm:$0xff] }
0x16ae   :  { %v2311_v2 = vmul.f32 0.5, %v2244_v60  ;;  %2534 = vrot.lane.b32.xlu0 %v1975_v39, %s3344_s4 }
0x16af   :  { %3130 = vmatmul.msk.f32.gmra.mxu2 %vm1007_vm2, %v1976_v61 }
0x16b0   :  { %v3271_v1 = vpop.eup %3270  ;;  %v2352_v6 = vmul.f32 1.442695, %v2311_v2  ;;  %3161 = vmatmul.msk.f32.gmra.mxu3 %vm1007_vm2, %v1976_v61 }
0x16b1   :  { %v2430_v9 = vmul.f32 %v3271_v1, %v2400_v33  ;;  %v4170_v25 = vpop.permute.xlu2 %2514 }
0x16b2   :  { %3272 = vpow2.f32 %v2352_v6  ;;  %v1945_v13 = vpop.f32.mrf.mxu1  ;;  %v2130_v11 = vpop.f32.mrf.mxu2 }
0x16b3   :  { %v1946_v14 = vadd.f32 %v3887_v37, %v1945_v13  ;;  %v2131_v15 = vadd.f32 %v3987_v10, %v2130_v11  ;;  %v2246_v18 = vpop.f32.mrf.mxu3  ;;  %v2460_v7 = vadd.f32 %v2430_v9, %v2125_v32  ;;  %v2401_v37 = vld [vmem:[%s4636_s22 + $0x58] sm:$0xff]  ;;  %v2507_v34 = vpop.permute.xlu1 %2506 }
0x16b4   :  { %v2247_v19 = vadd.f32 %v3993_v12, %v2246_v18 }
0x16b5   :  { %v1977_v20 = vmax.f32 %v1946_v14, 0.0  ;;  %2742 = vrot.lane.b32.xlu2 %v2244_v60, %s3346_s7  ;;  %2536 = vrot.lane.b32.xlu1 %v1976_v61, %s3344_s4  ;;  %v4164_v62 = vsel %vm1007_vm2, %v2460_v7, %v2501_v8  ;;  %v2403_v60 = vld [vmem:[%s4636_s22 + $0x68] sm:$0xff]  ;;  %v2404_v8 = vld [vmem:[%s4636_s22 + $0x70] sm:$0xff] }
0x16b6   :  { %v2312_v21 = vmul.f32 0.5, %v2247_v19  ;;  %2624 = vrot.lane.b32.xlu0 %v2131_v15, %s3345_s15 }
0x16b7   :  { %3131 = vmatmul.msk.f32.gmra.mxu2 %vm1007_vm2, %v1977_v20 }
0x16b8   :  { %v3273_v57 = vpop.eup %3272  ;;  %v2354_v26 = vmul.f32 1.442695, %v2312_v21  ;;  %3162 = vmatmul.msk.f32.gmra.mxu3 %vm1007_vm2, %v1977_v20 }
0x16b9   :  { %v2431_v27 = vmul.f32 %v3273_v57, %v2401_v37  ;;  %v4185_v39 = vpop.permute.xlu0 %2510 }
0x16ba   :  { %3274 = vpow2.f32 %v2354_v26  ;;  %v2133_v28 = vpop.f32.mrf.mxu2 }
0x16bb   :  { %v2134_v29 = vadd.f32 %v3987_v10, %v2133_v28  ;;  %v2249_v30 = vpop.f32.mrf.mxu3  ;;  %v2461_v31 = vadd.f32 %v2431_v27, %v2128_v53 }
0x16bc   :  { %v2250_v23 = vadd.f32 %v3993_v12, %v2249_v30 }
0x16bd   :  { %2538 = vrot.lane.b32.xlu2 %v1977_v20, %s3344_s4  ;;  %2626 = vrot.lane.b32.xlu1 %v2134_v29, %s3345_s15  ;;  %v4179_v32 = vsel %vm1007_vm2, %v2461_v31, %v2503_v43 }
0x16be   :  { %v2313_v36 = vmul.f32 0.5, %v2250_v23  ;;  %2744 = vrot.lane.b32.xlu0 %v2247_v19, %s3346_s7  ;;  %v2810_v19 = vsel %vm1007_vm2, %v4014_v58, %v4064_v24 }
0x16bf   :  { %v2605_v41 = vpop.permute.xlu2 %2604 }
0x16c0   :  { %v3275_v42 = vpop.eup %3274  ;;  %v2356_v45 = vmul.f32 1.442695, %v2313_v36  ;;  %v2843_v61 = vsel %vm2840_vm0, %v2812_v55, %v2605_v41 }
0x16c1   :  { %v2432_v46 = vmul.f32 %v3275_v42, %v2402_v38  ;;  %v4197_v56 = vpop.permute.xlu1 %2512  ;;  %v2405_v38 = vld [vmem:[%s4636_s22 + $0x78] sm:$0xff] }
0x16c2   :  { %3276 = vpow2.f32 %v2356_v45  ;;  %v2136_v48 = vpop.f32.mrf.mxu2 }
0x16c3   :  { %v2137_v50 = vadd.f32 %v3987_v10, %v2136_v48  ;;  %v2252_v43 = vpop.f32.mrf.mxu3  ;;  %v2462_v51 = vadd.f32 %v2432_v46, %v2131_v15 }
0x16c4   :  { %v2253_v52 = vadd.f32 %v3993_v12, %v2252_v43 }
0x16c5   :  { %2628 = vrot.lane.b32.xlu2 %v2137_v50, %s3345_s15  ;;  %2746 = vrot.lane.b32.xlu1 %v2250_v23, %s3346_s7  ;;  %v4192_v53 = vsel %vm1007_vm2, %v2462_v51, %v2505_v22 }
0x16c6   :  { %v2314_v59 = vmul.f32 0.5, %v2253_v52 }
0x16c7   :  { %v2725_v2 = vpop.permute.xlu2 %2724  ;;  %v2601_v33 = vpop.permute.xlu0 %2600 }
0x16c8   :  { %v3277_v1 = vpop.eup %3276  ;;  %v2358_v6 = vmul.f32 1.442695, %v2314_v59  ;;  %v2874_v9 = vsel %vm2871_vm4, %v2843_v61, %v2725_v2  ;;  %v2841_v22 = vsel %vm2840_vm0, %v2810_v19, %v2601_v33  ;;  %v2406_v61 = vld [vmem:[%s4636_s22 + $0x80] sm:$0xff]  ;;  %v2407_v19 = vld [vmem:[%s4636_s22 + $0x88] sm:$0xff] }
0x16c9   :  { %2905 = vst.msk [vmem:[%s4637_s23 + $0x10] sm:$0xff] %vm2902_vm8, %v2874_v9  ;;  %v2433_v0 = vmul.f32 %v3277_v1, %v2403_v60 }
0x16ca   :  { %3278 = vpow2.f32 %v2358_v6  ;;  %v2139_v35 = vpop.f32.mrf.mxu2 }
0x16cb   :  { %v2140_v13 = vadd.f32 %v3987_v10, %v2139_v35  ;;  %v2255_v11 = vpop.f32.mrf.mxu3  ;;  %v2463_v14 = vadd.f32 %v2433_v0, %v2134_v29 }
0x16cc   :  { %v2256_v15 = vadd.f32 %v3993_v12, %v2255_v11 }
0x16cd   :  { %2748 = vrot.lane.b32.xlu2 %v2253_v52, %s3346_s7  ;;  %2630 = vrot.lane.b32.xlu0 %v2140_v13, %s3345_s15  ;;  %v4213_v18 = vsel %vm1007_vm2, %v2463_v14, %v2507_v34  ;;  %v2811_v34 = vsel %vm1007_vm2, %v4027_v47, %v4084_v44 }
0x16ce   :  { %v2315_v7 = vmul.f32 0.5, %v2256_v15 }
0x16cf   :  { %v4221_v20 = vpop.permute.xlu2 %2520  ;;  %v2603_v21 = vpop.permute.xlu1 %2602 }
0x16d0   :  { %v3279_v37 = vpop.eup %3278  ;;  %v2360_v57 = vmul.f32 1.442695, %v2315_v7  ;;  %v2721_v26 = vpop.permute.xlu0 %2720  ;;  %v2842_v41 = vsel %vm2840_vm0, %v2811_v34, %v2603_v21  ;;  %v2813_v21 = vsel %vm1007_vm2, %v4053_v17, %v4100_v3 }
0x16d1   :  { %v2872_v27 = vsel %vm2871_vm4, %v2841_v22, %v2721_v26  ;;  %v2434_v28 = vmul.f32 %v3279_v37, %v2404_v8 }
0x16d2   :  { %3280 = vpow2.f32 %v2360_v57  ;;  %2903 = vst.msk [vmem:[%s4637_s23] sm:$0xff] %vm2902_vm8, %v2872_v27  ;;  %v2142_v29 = vpop.f32.mrf.mxu2 }
0x16d3   :  { %v2143_v58 = vadd.f32 %v3987_v10, %v2142_v29  ;;  %v2258_v24 = vpop.f32.mrf.mxu3  ;;  %v2464_v30 = vadd.f32 %v2434_v28, %v2137_v50 }
0x16d4   :  { %v2259_v31 = vadd.f32 %v3993_v12, %v2258_v24 }
0x16d5   :  { %2632 = vrot.lane.b32.xlu1 %v2143_v58, %s3345_s15  ;;  %2750 = vrot.lane.b32.xlu0 %v2256_v15, %s3346_s7  ;;  %v4235_v23 = vsel %vm1007_vm2, %v2464_v30, %v4154_v4 }
0x16d6   :  { %v2316_v36 = vmul.f32 0.5, %v2259_v31 }
0x16d7   :  { %v2611_v42 = vpop.permute.xlu2 %2610  ;;  %v2723_v45 = vpop.permute.xlu1 %2722 }
0x16d8   :  { %v3281_v46 = vpop.eup %3280  ;;  %v2362_v48 = vmul.f32 1.442695, %v2316_v36  ;;  %v2873_v50 = vsel %vm2871_vm4, %v2842_v41, %v2723_v45  ;;  %v4245_v43 = vpop.permute.xlu0 %2516  ;;  %v2846_v2 = vsel %vm2840_vm0, %v4090_v49, %v2611_v42  ;;  %v2408_v36 = vld [vmem:[%s4636_s22 + $0x90] sm:$0xff] }
0x16d9   :  { %2904 = vst.msk [vmem:[%s4637_s23 + $0x8] sm:$0xff] %vm2902_vm8, %v2873_v50  ;;  %v2435_v47 = vmul.f32 %v3281_v46, %v2405_v38 }
0x16da   :  { %3282 = vpow2.f32 %v2362_v48  ;;  %v2145_v44 = vpop.f32.mrf.mxu2 }
0x16db   :  { %v2146_v4 = vadd.f32 %v3987_v10, %v2145_v44  ;;  %v2261_v51 = vpop.f32.mrf.mxu3  ;;  %v2465_v52 = vadd.f32 %v2435_v47, %v2140_v13 }
0x16dc   :  { %v2262_v55 = vadd.f32 %v3993_v12, %v2261_v51 }
0x16dd   :  { %2634 = vrot.lane.b32.xlu2 %v2146_v4, %s3345_s15  ;;  %2752 = vrot.lane.b32.xlu1 %v2259_v31, %s3346_s7  ;;  %v4257_v59 = vsel %vm1007_vm2, %v2465_v52, %v4185_v39 }
0x16de   :  { %v2317_v60 = vmul.f32 0.5, %v2262_v55 }
0x16df   :  { %v2731_v33 = vpop.permute.xlu2 %2730  ;;  %v4264_v1 = vpop.permute.xlu1 %2518 }
0x16e0   :  { %v3283_v6 = vpop.eup %3282  ;;  %v2364_v9 = vmul.f32 1.442695, %v2317_v60  ;;  %v2877_v0 = vsel %vm2871_vm4, %v2846_v2, %v2731_v33  ;;  %v2607_v35 = vpop.permute.xlu0 %2606  ;;  %v2409_v60 = vld [vmem:[%s4636_s22 + $0x98] sm:$0xff] }
0x16e1   :  { %2908 = vst.msk [vmem:[%s4637_s23 + $0x28] sm:$0xff] %vm2902_vm8, %v2877_v0  ;;  %v2436_v39 = vmul.f32 %v3283_v6, %v2406_v61  ;;  %v2844_v26 = vsel %vm2840_vm0, %v2813_v21, %v2607_v35 }
0x16e2   :  { %3284 = vpow2.f32 %v2364_v9  ;;  %v2148_v13 = vpop.f32.mrf.mxu2 }
0x16e3   :  { %v2149_v11 = vadd.f32 %v3987_v10, %v2148_v13  ;;  %v2264_v14 = vpop.f32.mrf.mxu3  ;;  %v2466_v49 = vadd.f32 %v2436_v39, %v2143_v58 }
0x16e4   :  { %v2265_v15 = vadd.f32 %v3993_v12, %v2264_v14 }
0x16e5   :  { %2754 = vrot.lane.b32.xlu2 %v2262_v55, %s3346_s7  ;;  %2636 = vrot.lane.b32.xlu0 %v2149_v11, %s3345_s15  ;;  %v4277_v7 = vsel %vm1007_vm2, %v2466_v49, %v4197_v56 }
0x16e6   :  { %v2318_v8 = vmul.f32 0.5, %v2265_v15 }
0x16e7   :  { %v4285_v37 = vpop.permute.xlu2 %2526  ;;  %v2609_v22 = vpop.permute.xlu1 %2608 }
0x16e8   :  { %v3285_v57 = vpop.eup %3284  ;;  %v2366_v27 = vmul.f32 1.442695, %v2318_v8  ;;  %v2727_v28 = vpop.permute.xlu0 %2726  ;;  %v2845_v38 = vsel %vm2840_vm0, %v4072_v16, %v2609_v22  ;;  %v2410_v8 = vld [vmem:[%s4636_s22 + $0xa0] sm:$0xff] }
0x16e9   :  { %v2875_v56 = vsel %vm2871_vm4, %v2844_v26, %v2727_v28  ;;  %v2437_v29 = vmul.f32 %v3285_v57, %v2407_v19 }
0x16ea   :  { %3286 = vpow2.f32 %v2366_v27  ;;  %2906 = vst.msk [vmem:[%s4637_s23 + $0x18] sm:$0xff] %vm2902_vm8, %v2875_v56  ;;  %v2151_v58 = vpop.f32.mrf.mxu2 }
0x16eb   :  { %v2152_v17 = vadd.f32 %v3987_v10, %v2151_v58  ;;  %v2267_v3 = vpop.f32.mrf.mxu3  ;;  %v2467_v24 = vadd.f32 %v2437_v29, %v2146_v4 }
0x16ec   :  { %v2268_v30 = vadd.f32 %v3993_v12, %v2267_v3 }
0x16ed   :  { %2638 = vrot.lane.b32.xlu1 %v2152_v17, %s3345_s15  ;;  %2756 = vrot.lane.b32.xlu0 %v2265_v15, %s3346_s7  ;;  %v4299_v31 = vsel %vm1007_vm2, %v2467_v24, %v4170_v25 }
0x16ee   :  { %v2319_v34 = vmul.f32 0.5, %v2268_v30 }
0x16ef   :  { %v2617_v41 = vpop.permute.xlu2 %2616  ;;  %v2729_v42 = vpop.permute.xlu1 %2728 }
0x16f0   :  { %v3287_v45 = vpop.eup %3286  ;;  %v2368_v46 = vmul.f32 1.442695, %v2319_v34  ;;  %v2876_v48 = vsel %vm2871_vm4, %v2845_v38, %v2729_v42  ;;  %v4307_v50 = vpop.permute.xlu0 %2522  ;;  %v2849_v61 = vsel %vm2840_vm0, %v4134_v40, %v2617_v41 }
0x16f1   :  { %2907 = vst.msk [vmem:[%s4637_s23 + $0x20] sm:$0xff] %vm2902_vm8, %v2876_v48  ;;  %v2438_v25 = vmul.f32 %v3287_v45, %v2408_v36 }
0x16f2   :  { %3288 = vpow2.f32 %v2368_v46  ;;  %v2154_v47 = vpop.f32.mrf.mxu2 }
0x16f3   :  { %v2155_v44 = vadd.f32 %v3987_v10, %v2154_v47  ;;  %v2270_v4 = vpop.f32.mrf.mxu3  ;;  %v2468_v16 = vadd.f32 %v2438_v25, %v2149_v11 }
0x16f4   :  { %v2271_v51 = vadd.f32 %v3993_v12, %v2270_v4 }
0x16f5   :  { %2640 = vrot.lane.b32.xlu2 %v2155_v44, %s3345_s15  ;;  %2758 = vrot.lane.b32.xlu1 %v2268_v30, %s3346_s7  ;;  %v4319_v52 = vsel %vm1007_vm2, %v2468_v16, %v4245_v43  ;;  %v2411_v30 = vld [vmem:[%s4636_s22 + $0xa8] sm:$0xff] }
0x16f6   :  { %v2320_v55 = vmul.f32 0.5, %v2271_v51 }
0x16f7   :  { %v2737_v2 = vpop.permute.xlu2 %2736  ;;  %v4326_v33 = vpop.permute.xlu1 %2524 }
0x16f8   :  { %v3289_v6 = vpop.eup %3288  ;;  %v2370_v9 = vmul.f32 1.442695, %v2320_v55  ;;  %v2880_v0 = vsel %vm2871_vm4, %v2849_v61, %v2737_v2  ;;  %v2613_v35 = vpop.permute.xlu0 %2612 }
0x16f9   :  { %2911 = vst.msk [vmem:[%s4637_s23 + $0x40] sm:$0xff] %vm2902_vm8, %v2880_v0  ;;  %v2439_v43 = vmul.f32 %v3289_v6, %v2409_v60  ;;  %v2847_v57 = vsel %vm2840_vm0, %v4106_v5, %v2613_v35 }
0x16fa   :  { %3290 = vpow2.f32 %v2370_v9  ;;  %v2157_v39 = vpop.f32.mrf.mxu2 }
0x16fb   :  { %v2158_v13 = vadd.f32 %v3987_v10, %v2157_v39  ;;  %v2273_v11 = vpop.f32.mrf.mxu3  ;;  %v2469_v40 = vadd.f32 %v2439_v43, %v2152_v17 }
0x16fc   :  { %v2274_v14 = vadd.f32 %v3993_v12, %v2273_v11 }
0x16fd   :  { %2760 = vrot.lane.b32.xlu2 %v2271_v51, %s3346_s7  ;;  %2642 = vrot.lane.b32.xlu0 %v2158_v13, %s3345_s15  ;;  %v4339_v49 = vsel %vm1007_vm2, %v2469_v40, %v4264_v1  ;;  %v2412_v51 = vld [vmem:[%s4636_s22 + $0xb0] sm:$0xff] }
0x16fe   :  { %v2321_v15 = vmul.f32 0.5, %v2274_v14 }
0x16ff   :  { %v4344_v19 = vpop.permute.xlu2 %2532  ;;  %v2615_v21 = vpop.permute.xlu1 %2614 }
0x1700   :  { %v3291_v22 = vpop.eup %3290  ;;  %v2372_v26 = vmul.f32 1.442695, %v2321_v15  ;;  %v2733_v27 = vpop.permute.xlu0 %2732  ;;  %v2848_v34 = vsel %vm2840_vm0, %v4120_v54, %v2615_v21 }
0x1701   :  { %v2878_v28 = vsel %vm2871_vm4, %v2847_v57, %v2733_v27  ;;  %v2440_v56 = vmul.f32 %v3291_v22, %v2410_v8  ;;  %v4416_v27 = vld [vmem:[%s4633_s19] ss:$0 sm:$0xff] }
0x1702   :  { %3292 = vpow2.f32 %v2372_v26  ;;  %2909 = vst.msk [vmem:[%s4637_s23 + $0x30] sm:$0xff] %vm2902_vm8, %v2878_v28  ;;  %v2160_v1 = vpop.f32.mrf.mxu2 }
0x1703   :  { %v2161_v29 = vadd.f32 %v3987_v10, %v2160_v1  ;;  %v2276_v58 = vpop.f32.mrf.mxu3  ;;  %v2470_v17 = vadd.f32 %v2440_v56, %v2155_v44  ;;  %v4422_v1 = vld [vmem:[%s4635_s21] ss:$0 sm:$0xff] }
0x1704   :  { %v2277_v3 = vadd.f32 %v3993_v12, %v2276_v58 }
0x1705   :  { %2644 = vrot.lane.b32.xlu1 %v2161_v29, %s3345_s15  ;;  %2762 = vrot.lane.b32.xlu0 %v2274_v14, %s3346_s7  ;;  %v4359_v5 = vsel %vm1007_vm2, %v2470_v17, %v4221_v20  ;;  %v2413_v14 = vld [vmem:[%s4636_s22 + $0xb8] sm:$0xff] }
0x1706   :  { %v2322_v24 = vmul.f32 0.5, %v2277_v3 }
0x1707   :  { %v2623_v36 = vpop.permute.xlu2 %2622  ;;  %v2735_v38 = vpop.permute.xlu1 %2734 }
0x1708   :  { %v3293_v41 = vpop.eup %3292  ;;  %v2374_v42 = vmul.f32 1.442695, %v2322_v24  ;;  %v2879_v45 = vsel %vm2871_vm4, %v2848_v34, %v2735_v38  ;;  %v4367_v46 = vpop.permute.xlu0 %2528  ;;  %v2852_v55 = vsel %vm2840_vm0, %v4179_v32, %v2623_v36 }
0x1709   :  { %2910 = vst.msk [vmem:[%s4637_s23 + $0x38] sm:$0xff] %vm2902_vm8, %v2879_v45  ;;  %v2441_v20 = vmul.f32 %v3293_v41, %v2411_v30 }
0x170a   :  { %3294 = vpow2.f32 %v2374_v42  ;;  %v2163_v48 = vpop.f32.mrf.mxu2 }
0x170b   :  { %v2164_v25 = vadd.f32 %v3987_v10, %v2163_v48  ;;  %v2279_v47 = vpop.f32.mrf.mxu3  ;;  %v2471_v54 = vadd.f32 %v2441_v20, %v2158_v13 }
0x170c   :  { %v2280_v44 = vadd.f32 %v3993_v12, %v2279_v47 }
0x170d   :  { %2646 = vrot.lane.b32.xlu2 %v2164_v25, %s3345_s15  ;;  %2764 = vrot.lane.b32.xlu1 %v2277_v3, %s3346_s7  ;;  %v4379_v4 = vsel %vm1007_vm2, %v2471_v54, %v4307_v50  ;;  %v2414_v3 = vld [vmem:[%s4636_s22 + $0xc0] sm:$0xff] }
0x170e   :  { %v2323_v16 = vmul.f32 0.5, %v2280_v44 }
0x170f   :  { %v2743_v60 = vpop.permute.xlu2 %2742  ;;  %v4386_v61 = vpop.permute.xlu1 %2530 }
0x1710   :  { %v3295_v2 = vpop.eup %3294  ;;  %v2376_v6 = vmul.f32 1.442695, %v2323_v16  ;;  %v2883_v9 = vsel %vm2871_vm4, %v2852_v55, %v2743_v60  ;;  %v2619_v0 = vpop.permute.xlu0 %2618 }
0x1711   :  { %2914 = vst.msk [vmem:[%s4637_s23 + $0x58] sm:$0xff] %vm2902_vm8, %v2883_v9  ;;  %v2442_v50 = vmul.f32 %v3295_v2, %v2412_v51 }
0x1712   :  { %3296 = vpow2.f32 %v2376_v6  ;;  %v2166_v35 = vpop.f32.mrf.mxu2 }
0x1713   :  { %v2167_v43 = vadd.f32 %v3987_v10, %v2166_v35  ;;  %v2282_v39 = vpop.f32.mrf.mxu3  ;;  %v2472_v32 = vadd.f32 %v2442_v50, %v2161_v29 }
0x1714   :  { %v2283_v13 = vadd.f32 %v3993_v12, %v2282_v39  ;;  %v2850_v12 = vsel %vm2840_vm0, %v4148_v63, %v2619_v0 }
0x1715   :  { %2766 = vrot.lane.b32.xlu2 %v2280_v44, %s3346_s7  ;;  %2648 = vrot.lane.b32.xlu0 %v2167_v43, %s3345_s15  ;;  %v4399_v11 = vsel %vm1007_vm2, %v2472_v32, %v4326_v33  ;;  %v2415_v44 = vld [vmem:[%s4636_s22 + $0xc8] sm:$0xff] }
0x1716   :  { %v2324_v40 = vmul.f32 0.5, %v2283_v13 }
0x1717   :  { %v4404_v15 = vpop.permute.xlu2 %2538  ;;  %v2621_v10 = vpop.permute.xlu1 %2620 }
0x1718   :  { %v3297_v8 = vpop.eup %3296  ;;  %v2378_v21 = vmul.f32 1.442695, %v2324_v40  ;;  %v2739_v22 = vpop.permute.xlu0 %2738  ;;  %v2851_v24 = vsel %vm2840_vm0, %v4164_v62, %v2621_v10 }
0x1719   :  { %v2881_v57 = vsel %vm2871_vm4, %v2850_v12, %v2739_v22  ;;  %v2443_v26 = vmul.f32 %v3297_v8, %v2413_v14 }
0x171a   :  { %3298 = vpow2.f32 %v2378_v21  ;;  %2912 = vst.msk [vmem:[%s4637_s23 + $0x48] sm:$0xff] %vm2902_vm8, %v2881_v57  ;;  %v2169_v33 = vpop.f32.mrf.mxu2 }
0x171b   :  { %v2170_v28 = vadd.f32 %v4416_v27, %v2169_v33  ;;  %v2285_v63 = vpop.f32.mrf.mxu3  ;;  %v2473_v56 = vadd.f32 %v2443_v26, %v2164_v25 }
0x171c   :  { %v2286_v29 = vadd.f32 %v4422_v1, %v2285_v63 }
0x171d   :  { %2650 = vrot.lane.b32.xlu1 %v2170_v28, %s3345_s15  ;;  %2768 = vrot.lane.b32.xlu0 %v2283_v13, %s3346_s7  ;;  %v4429_v58 = vsel %vm1007_vm2, %v2473_v56, %v4285_v37  ;;  %v2416_v13 = vld [vmem:[%s4636_s22 + $0xd0] sm:$0xff]  ;;  %v2417_v56 = vld [vmem:[%s4636_s22 + $0xd8] sm:$0xff] }
0x171e   :  { %v2325_v17 = vmul.f32 0.5, %v2286_v29 }
0x171f   :  { %v2629_v30 = vpop.permute.xlu2 %2628  ;;  %v2741_v34 = vpop.permute.xlu1 %2740 }
0x1720   :  { %v3299_v36 = vpop.eup %3298  ;;  %v2380_v38 = vmul.f32 1.442695, %v2325_v17  ;;  %v2882_v41 = vsel %vm2871_vm4, %v2851_v24, %v2741_v34  ;;  %v4437_v42 = vpop.permute.xlu0 %2534  ;;  %v2855_v16 = vsel %vm2840_vm0, %v4235_v23, %v2629_v30 }
0x1721   :  { %2913 = vst.msk [vmem:[%s4637_s23 + $0x50] sm:$0xff] %vm2902_vm8, %v2882_v41  ;;  %v2444_v37 = vmul.f32 %v3299_v36, %v2414_v3 }
0x1722   :  { %3300 = vpow2.f32 %v2380_v38  ;;  %v2172_v45 = vpop.f32.mrf.mxu2 }
0x1723   :  { %v2173_v20 = vadd.f32 %v4416_v27, %v2172_v45  ;;  %v2288_v48 = vpop.f32.mrf.mxu3  ;;  %v2474_v62 = vadd.f32 %v2444_v37, %v2167_v43 }
0x1724   :  { %v2289_v25 = vadd.f32 %v4422_v1, %v2288_v48  ;;  %v2418_v48 = vld [vmem:[%s4636_s22 + $0xe0] sm:$0xff] }
0x1725   :  { %2652 = vrot.lane.b32.xlu2 %v2173_v20, %s3345_s15  ;;  %2770 = vrot.lane.b32.xlu1 %v2286_v29, %s3346_s7  ;;  %v4449_v47 = vsel %vm1007_vm2, %v2474_v62, %v4367_v46 }
0x1726   :  { %v2326_v54 = vmul.f32 0.5, %v2289_v25 }
0x1727   :  { %v2749_v51 = vpop.permute.xlu2 %2748  ;;  %v4456_v55 = vpop.permute.xlu1 %2536 }
0x1728   :  { %v3301_v60 = vpop.eup %3300  ;;  %v2382_v2 = vmul.f32 1.442695, %v2326_v54  ;;  %v2886_v6 = vsel %vm2871_vm4, %v2855_v16, %v2749_v51  ;;  %v2625_v9 = vpop.permute.xlu0 %2624 }
0x1729   :  { %2917 = vst.msk [vmem:[%s4637_s23 + $0x70] sm:$0xff] %vm2902_vm8, %v2886_v6  ;;  %v2445_v46 = vmul.f32 %v3301_v60, %v2415_v44  ;;  %v2853_v10 = vsel %vm2840_vm0, %v4192_v53, %v2625_v9 }
0x172a   :  { %3302 = vpow2.f32 %v2382_v2  ;;  %v2175_v0 = vpop.f32.mrf.mxu2 }
0x172b   :  { %v2176_v50 = vadd.f32 %v4416_v27, %v2175_v0  ;;  %v2291_v35 = vpop.f32.mrf.mxu3  ;;  %v2475_v23 = vadd.f32 %v2445_v46, %v2170_v28 }
0x172c   :  { %v2292_v43 = vadd.f32 %v4422_v1, %v2291_v35 }
0x172d   :  { %2772 = vrot.lane.b32.xlu2 %v2289_v25, %s3346_s7  ;;  %2654 = vrot.lane.b32.xlu0 %v2176_v50, %s3345_s15  ;;  %v4469_v39 = vsel %vm1007_vm2, %v2475_v23, %v4386_v61 }
0x172e   :  { %v2327_v32 = vmul.f32 0.5, %v2292_v43 }
0x172f   :  { %v2627_v40 = vpop.permute.xlu1 %2626 }
0x1730   :  { %v3303_v14 = vpop.eup %3302  ;;  %v2384_v8 = vmul.f32 1.442695, %v2327_v32  ;;  %v2745_v12 = vpop.permute.xlu0 %2744  ;;  %v2854_v29 = vsel %vm2840_vm0, %v4213_v18, %v2627_v40 }
0x1731   :  { %v2884_v21 = vsel %vm2871_vm4, %v2853_v10, %v2745_v12  ;;  %v2446_v22 = vmul.f32 %v3303_v14, %v2416_v13 }
0x1732   :  { %3304 = vpow2.f32 %v2384_v8  ;;  %2915 = vst.msk [vmem:[%s4637_s23 + $0x60] sm:$0xff] %vm2902_vm8, %v2884_v21  ;;  %v2178_v61 = vpop.f32.mrf.mxu2 }
0x1733   :  { %v2179_v57 = vadd.f32 %v4416_v27, %v2178_v61  ;;  %v2294_v26 = vpop.f32.mrf.mxu3  ;;  %v2476_v33 = vadd.f32 %v2446_v22, %v2173_v20 }
0x1734   :  { %v2295_v28 = vadd.f32 %v4422_v1, %v2294_v26 }
0x1735   :  { %2656 = vrot.lane.b32.xlu1 %v2179_v57, %s3345_s15  ;;  %2774 = vrot.lane.b32.xlu0 %v2292_v43, %s3346_s7  ;;  %v4487_v53 = vsel %vm1007_vm2, %v2476_v33, %v4344_v19 }
0x1736   :  { %v2328_v63 = vmul.f32 0.5, %v2295_v28 }
0x1737   :  { %v2635_v17 = vpop.permute.xlu2 %2634  ;;  %v2747_v3 = vpop.permute.xlu1 %2746 }
0x1738   :  { %v3305_v24 = vpop.eup %3304  ;;  %v2386_v30 = vmul.f32 1.442695, %v2328_v63  ;;  %v2885_v34 = vsel %vm2871_vm4, %v2854_v29, %v2747_v3 }
0x1739   :  { %2916 = vst.msk [vmem:[%s4637_s23 + $0x68] sm:$0xff] %vm2902_vm8, %v2885_v34  ;;  %v2447_v19 = vmul.f32 %v3305_v24, %v2417_v56 }
0x173a   :  { %3306 = vpow2.f32 %v2386_v30  ;;  %v2181_v36 = vpop.f32.mrf.mxu2 }
0x173b   :  { %v2182_v38 = vadd.f32 %v4416_v27, %v2181_v36  ;;  %v2297_v41 = vpop.f32.mrf.mxu3  ;;  %v2477_v37 = vadd.f32 %v2447_v19, %v2176_v50  ;;  %v2858_v27 = vsel %vm2840_vm0, %v4299_v31, %v2635_v17  ;;  %v2419_v31 = vld [vmem:[%s4636_s22 + $0xe8] sm:$0xff] }
0x173c   :  { %v2298_v18 = vadd.f32 %v4422_v1, %v2297_v41 }
0x173d   :  { %2658 = vrot.lane.b32.xlu2 %v2182_v38, %s3345_s15  ;;  %2776 = vrot.lane.b32.xlu1 %v2295_v28, %s3346_s7  ;;  %v4505_v45 = vsel %vm1007_vm2, %v2477_v37, %v4437_v42 }
0x173e   :  { %v2329_v20 = vmul.f32 0.5, %v2298_v18 }
0x173f   :  { %v2755_v62 = vpop.permute.xlu2 %2754  ;;  %v2631_v25 = vpop.permute.xlu0 %2630 }
0x1740   :  { %v3307_v54 = vpop.eup %3306  ;;  %v2388_v1 = vmul.f32 1.442695, %v2329_v20  ;;  %v2889_v44 = vsel %vm2871_vm4, %v2858_v27, %v2755_v62  ;;  %v2856_v60 = vsel %vm2840_vm0, %v4257_v59, %v2631_v25 }
0x1741   :  { %2920 = vst.msk [vmem:[%s4637_s23 + $0x88] sm:$0xff] %vm2902_vm8, %v2889_v44  ;;  %v2448_v42 = vmul.f32 %v3307_v54, %v2418_v48 }
0x1742   :  { %3308 = vpow2.f32 %v2388_v1 }
0x1743   :  { %v2478_v16 = vadd.f32 %v2448_v42, %v2179_v57 }
0x1745   :  { %2778 = vrot.lane.b32.xlu2 %v2298_v18, %s3346_s7  ;;  %v4520_v51 = vsel %vm1007_vm2, %v2478_v16, %v4456_v55 }
0x1747   :  { %v2633_v2 = vpop.permute.xlu1 %2632  ;;  %v2751_v6 = vpop.permute.xlu0 %2750 }
0x1748   :  { %v3309_v9 = vpop.eup %3308  ;;  %v2887_v46 = vsel %vm2871_vm4, %v2856_v60, %v2751_v6  ;;  %v2857_v35 = vsel %vm2840_vm0, %v4277_v7, %v2633_v2 }
0x1749   :  { %2918 = vst.msk [vmem:[%s4637_s23 + $0x78] sm:$0xff] %vm2902_vm8, %v2887_v46  ;;  %v2449_v0 = vmul.f32 %v3309_v9, %v2419_v31 }
0x174b   :  { %v2479_v55 = vadd.f32 %v2449_v0, %v2182_v38 }
0x174d   :  { %v2839_v50 = vsel %vm1007_vm2, %v2479_v55, %v4404_v15 }
0x174f   :  { %v2641_v23 = vpop.permute.xlu2 %2640  ;;  %v2753_v59 = vpop.permute.xlu1 %2752 }
0x1750   :  { %v2888_v43 = vsel %vm2871_vm4, %v2857_v35, %v2753_v59  ;;  %v2861_v32 = vsel %vm2840_vm0, %v4359_v5, %v2641_v23 }
0x1751   :  { %2919 = vst.msk [vmem:[%s4637_s23 + $0x80] sm:$0xff] %vm2902_vm8, %v2888_v43 }
0x1757   :  { %v2761_v13 = vpop.permute.xlu2 %2760  ;;  %v2637_v40 = vpop.permute.xlu0 %2636 }
0x1758   :  { %v2892_v14 = vsel %vm2871_vm4, %v2861_v32, %v2761_v13  ;;  %v2859_v7 = vsel %vm2840_vm0, %v4319_v52, %v2637_v40 }
0x1759   :  { %2923 = vst.msk [vmem:[%s4637_s23 + $0xa0] sm:$0xff] %vm2902_vm8, %v2892_v14 }
0x175f   :  { %v2639_v15 = vpop.permute.xlu1 %2638  ;;  %v2757_v10 = vpop.permute.xlu0 %2756 }
0x1760   :  { %v2890_v8 = vsel %vm2871_vm4, %v2859_v7, %v2757_v10  ;;  %v2860_v5 = vsel %vm2840_vm0, %v4339_v49, %v2639_v15 }
0x1761   :  { %2921 = vst.msk [vmem:[%s4637_s23 + $0x90] sm:$0xff] %vm2902_vm8, %v2890_v8 }
0x1767   :  { %v2647_v12 = vpop.permute.xlu2 %2646  ;;  %v2759_v21 = vpop.permute.xlu1 %2758 }
0x1768   :  { %v2891_v22 = vsel %vm2871_vm4, %v2860_v5, %v2759_v21  ;;  %v2864_v52 = vsel %vm2840_vm0, %v4429_v58, %v2647_v12 }
0x1769   :  { %2922 = vst.msk [vmem:[%s4637_s23 + $0x98] sm:$0xff] %vm2902_vm8, %v2891_v22 }
0x176f   :  { %v2767_v61 = vpop.permute.xlu2 %2766  ;;  %v2643_v57 = vpop.permute.xlu0 %2642 }
0x1770   :  { %v2895_v26 = vsel %vm2871_vm4, %v2864_v52, %v2767_v61  ;;  %v2862_v49 = vsel %vm2840_vm0, %v4379_v4, %v2643_v57 }
0x1771   :  { %2926 = vst.msk [vmem:[%s4637_s23 + $0xb8] sm:$0xff] %vm2902_vm8, %v2895_v26 }
0x1777   :  { %v2645_v33 = vpop.permute.xlu1 %2644  ;;  %v2763_v28 = vpop.permute.xlu0 %2762 }
0x1778   :  { %v2893_v63 = vsel %vm2871_vm4, %v2862_v49, %v2763_v28  ;;  %v2863_v58 = vsel %vm2840_vm0, %v4399_v11, %v2645_v33 }
0x1779   :  { %2924 = vst.msk [vmem:[%s4637_s23 + $0xa8] sm:$0xff] %vm2902_vm8, %v2893_v63 }
0x177f   :  { %v2653_v56 = vpop.permute.xlu2 %2652  ;;  %v2765_v29 = vpop.permute.xlu1 %2764 }
0x1780   :  { %v2894_v17 = vsel %vm2871_vm4, %v2863_v58, %v2765_v29  ;;  %v2867_v4 = vsel %vm2840_vm0, %v4487_v53, %v2653_v56 }
0x1781   :  { %2925 = vst.msk [vmem:[%s4637_s23 + $0xb0] sm:$0xff] %vm2902_vm8, %v2894_v17 }
0x1787   :  { %v2773_v3 = vpop.permute.xlu2 %2772  ;;  %v2649_v24 = vpop.permute.xlu0 %2648 }
0x1788   :  { %v2898_v30 = vsel %vm2871_vm4, %v2867_v4, %v2773_v3  ;;  %v2865_v11 = vsel %vm2840_vm0, %v4449_v47, %v2649_v24 }
0x1789   :  { %2929 = vst.msk [vmem:[%s4637_s23 + $0xd0] sm:$0xff] %vm2902_vm8, %v2898_v30 }
0x178f   :  { %v2651_v34 = vpop.permute.xlu1 %2650  ;;  %v2769_v19 = vpop.permute.xlu0 %2768 }
0x1790   :  { %v2896_v36 = vsel %vm2871_vm4, %v2865_v11, %v2769_v19  ;;  %v2866_v53 = vsel %vm2840_vm0, %v4469_v39, %v2651_v34 }
0x1791   :  { %2927 = vst.msk [vmem:[%s4637_s23 + $0xc0] sm:$0xff] %vm2902_vm8, %v2896_v36 }
0x1797   :  { %v2659_v38 = vpop.permute.xlu2 %2658  ;;  %v2771_v41 = vpop.permute.xlu1 %2770 }
0x1798   :  { %v2897_v37 = vsel %vm2871_vm4, %v2866_v53, %v2771_v41  ;;  %v2870_v47 = vsel %vm2840_vm0, %v2839_v50, %v2659_v38 }
0x1799   :  { %2928 = vst.msk [vmem:[%s4637_s23 + $0xc8] sm:$0xff] %vm2902_vm8, %v2897_v37 }
0x179f   :  { %v2779_v18 = vpop.permute.xlu2 %2778  ;;  %v2655_v20 = vpop.permute.xlu0 %2654 }
0x17a0   :  { %v2901_v48 = vsel %vm2871_vm4, %v2870_v47, %v2779_v18  ;;  %v2868_v39 = vsel %vm2840_vm0, %v4505_v45, %v2655_v20 }
0x17a1   :  { %2932 = vst.msk [vmem:[%s4637_s23 + $0xe8] sm:$0xff] %vm2902_vm8, %v2901_v48 }
0x17a7   :  { %v2657_v27 = vpop.permute.xlu1 %2656  ;;  %v2775_v62 = vpop.permute.xlu0 %2774 }
0x17a8   :  { %v2899_v25 = vsel %vm2871_vm4, %v2868_v39, %v2775_v62  ;;  %v2869_v54 = vsel %vm2840_vm0, %v4520_v51, %v2657_v27 }
0x17a9   :  { %2930 = vst.msk [vmem:[%s4637_s23 + $0xd8] sm:$0xff] %vm2902_vm8, %v2899_v25 }
0x17af   :  { %v2777_v1 = vpop.permute.xlu1 %2776 }
0x17b0   :  { %v2900_v44 = vsel %vm2871_vm4, %v2869_v54, %v2777_v1 }
0x17b1   :  { %2931 = vst.msk [vmem:[%s4637_s23 + $0xe0] sm:$0xff] %vm2902_vm8, %v2900_v44 }

</bundles_post_ra>
